<compile_context>
chip_gen: v7x
topology: tpu7x:2x2x1
jax: 0.10.0
libtpu: 0.0.40
codegen_flags: <defaults>
</compile_context>

<pallas_src>
import math
import functools
import itertools

import numpy as np
import jax
import jax.numpy as jnp
from jax.experimental import pallas as pl
from jax.experimental.pallas import tpu as pltpu

NUM_GROUPS = 8        # Normalize == GroupNorm(NUM_GROUPS, C, eps=1e-6, affine=True)
EPS = 1e-6
_VMEM_LIMIT = 48 * 1024 * 1024  # tiles below fit comfortably inside v7x's 64 MiB VMEM


def _ru(x, m):
    return ((x + m - 1) // m) * m


# ----------------------------------------------------------------------------
# Tiled GEMM:  out(Cout, M) = W(Cout, K) @ P(K, M) + bias  (+ optional residual)
# bf16 MXU inputs, f32 accumulation in a VMEM scratch, epilogue gated by pl.when
# ----------------------------------------------------------------------------
def _gemm_kernel(a_ref, b_ref, bias_ref, o_ref, acc_ref):
    k = pl.program_id(2)

    @pl.when(k == 0)
    def _():
        acc_ref[...] = jnp.zeros_like(acc_ref)

    acc_ref[...] += jnp.dot(
        a_ref[...].astype(jnp.bfloat16),
        b_ref[...].astype(jnp.bfloat16),
        preferred_element_type=jnp.float32,
    )

    @pl.when(k == pl.num_programs(2) - 1)
    def _():
        o_ref[...] = (acc_ref[...] + bias_ref[...]).astype(o_ref.dtype)


def _gemm_res_kernel(a_ref, b_ref, bias_ref, r_ref, o_ref, acc_ref):
    k = pl.program_id(2)

    @pl.when(k == 0)
    def _():
        acc_ref[...] = jnp.zeros_like(acc_ref)

    acc_ref[...] += jnp.dot(
        a_ref[...].astype(jnp.bfloat16),
        b_ref[...].astype(jnp.bfloat16),
        preferred_element_type=jnp.float32,
    )

    @pl.when(k == pl.num_programs(2) - 1)
    def _():
        o_ref[...] = (acc_ref[...] + bias_ref[...] + r_ref[...]).astype(o_ref.dtype)


def matmul_bias(w, p, bias, residual=None):
    """(Cout,K) @ (K,M) + bias(Cout,) [+ residual(Cout,M)] -> (Cout,M) f32."""
    Cout, K = w.shape
    M = p.shape[1]
    t_co = min(256, _ru(Cout, 8))
    t_k = min(512, _ru(K, 128))
    t_m = min(512, _ru(M, 128))
    Cp, Kp, Mp = _ru(Cout, t_co), _ru(K, t_k), _ru(M, t_m)

    wp = jnp.pad(w.astype(jnp.bfloat16), ((0, Cp - Cout), (0, Kp - K)))
    pp = jnp.pad(p, ((0, Kp - K), (0, Mp - M)))
    bp = jnp.pad(bias.reshape(Cout, 1), ((0, Cp - Cout), (0, 0)))

    in_specs = [
        pl.BlockSpec((t_co, t_k), lambda i, j, k: (i, k)),
        pl.BlockSpec((t_k, t_m), lambda i, j, k: (k, j)),
        pl.BlockSpec((t_co, 1), lambda i, j, k: (i, 0)),
    ]
    args = [wp, pp, bp]
    kernel = _gemm_kernel
    n_bytes = Cp * Kp * 2 + Kp * Mp * 4 + Cp * Mp * 4
    if residual is not None:
        rp = jnp.pad(residual, ((0, Cp - Cout), (0, Mp - M)))
        in_specs.append(pl.BlockSpec((t_co, t_m), lambda i, j, k: (i, j)))
        args.append(rp)
        kernel = _gemm_res_kernel
        n_bytes += Cp * Mp * 4

    out = pl.pallas_call(
        kernel,
        out_shape=jax.ShapeDtypeStruct((Cp, Mp), jnp.float32),
        grid_spec=pltpu.PrefetchScalarGridSpec(
            num_scalar_prefetch=0,
            grid=(Cp // t_co, Mp // t_m, Kp // t_k),
            in_specs=in_specs,
            out_specs=pl.BlockSpec((t_co, t_m), lambda i, j, k: (i, j)),
            scratch_shapes=[pltpu.VMEM((t_co, t_m), jnp.float32)],
        ),
        compiler_params=pltpu.CompilerParams(
            dimension_semantics=("parallel", "parallel", "arbitrary"),
            vmem_limit_bytes=_VMEM_LIMIT,
        ),
        cost_estimate=pl.CostEstimate(
            flops=2 * Cp * Kp * Mp, transcendentals=0, bytes_accessed=n_bytes
        ),
    )(*args)
    return out[:Cout, :M]


# ----------------------------------------------------------------------------
# GroupNorm (+ optional fused SiLU) on channel-major activations.
# One grid step handles one group across the whole batch (fat blocks).
# ----------------------------------------------------------------------------
def _gn_kernel(x_ref, g_ref, b_ref, o_ref, *, eps, apply_silu, inv_count):
    x = x_ref[0]                                     # (cg, N, S)
    s1 = jnp.sum(x, axis=2, keepdims=True)           # lane reduce   -> (cg, N, 1)
    mean = jnp.sum(s1, axis=0, keepdims=True) * inv_count           # (1, N, 1)
    d = x - mean
    s2 = jnp.sum(d * d, axis=2, keepdims=True)
    var = jnp.sum(s2, axis=0, keepdims=True) * inv_count
    y = d * jax.lax.rsqrt(var + eps)
    y = y * g_ref[0] + b_ref[0]                      # (cg,1,1) broadcast
    if apply_silu:
        y = y * jax.nn.sigmoid(y)
    o_ref[0] = y


def group_norm(x, gamma, beta, *, num_groups=NUM_GROUPS, eps=EPS, silu=False):
    """GroupNorm over channel-major (C, N, H, W) input, optionally fused with SiLU."""
    C, N, H, W = x.shape
    G = num_groups
    cg = C // G
    S = H * W
    xr = x.reshape(G, cg, N, S)
    gr = gamma.reshape(G, cg, 1, 1)
    br = beta.reshape(G, cg, 1, 1)
    out = pl.pallas_call(
        functools.partial(_gn_kernel, eps=eps, apply_silu=silu,
                          inv_count=1.0 / (cg * S)),
        out_shape=jax.ShapeDtypeStruct((G, cg, N, S), jnp.float32),
        grid=(G,),
        in_specs=[
            pl.BlockSpec((1, cg, N, S), lambda g: (g, 0, 0, 0)),
            pl.BlockSpec((1, cg, 1, 1), lambda g: (g, 0, 0, 0)),
            pl.BlockSpec((1, cg, 1, 1), lambda g: (g, 0, 0, 0)),
        ],
        out_specs=pl.BlockSpec((1, cg, N, S), lambda g: (g, 0, 0, 0)),
        compiler_params=pltpu.CompilerParams(dimension_semantics=("parallel",)),
    )(xr, gr, br)
    return out.reshape(C, N, H, W)


# ----------------------------------------------------------------------------
# Flash-style attention: grid (batch*heads, kv_tiles), online softmax scratch.
# ----------------------------------------------------------------------------
def _attn_kernel(q_ref, k_ref, v_ref, o_ref, m_ref, l_ref, acc_ref, *, scale):
    kv = pl.program_id(1)

    @pl.when(kv == 0)
    def _():
        m_ref[...] = jnp.full(m_ref.shape, -jnp.inf, dtype=m_ref.dtype)
        l_ref[...] = jnp.zeros(l_ref.shape, dtype=l_ref.dtype)
        acc_ref[...] = jnp.zeros(acc_ref.shape, dtype=acc_ref.dtype)

    q = q_ref[0].astype(jnp.bfloat16)                # (S, d)
    k = k_ref[0].astype(jnp.bfloat16)                # (t_kv, d)
    v = v_ref[0].astype(jnp.bfloat16)                # (t_kv, d)
    # scores (S, t_kv): contract the head dim of both operands (no in-kernel .T)
    s = jax.lax.dot_general(
        q, k, (((1,), (1,)), ((), ())), preferred_element_type=jnp.float32
    ) * scale
    m_cur = jnp.max(s, axis=-1, keepdims=True)       # (S, 1)
    m_new = jnp.maximum(m_ref[...], m_cur)
    alpha = jnp.exp(m_ref[...] - m_new)
    p = jnp.exp(s - m_new)                           # (S, t_kv)
    l_ref[...] = alpha * l_ref[...] + jnp.sum(p, axis=-1, keepdims=True)
    acc_ref[...] = alpha * acc_ref[...] + jnp.dot(
        p.astype(jnp.bfloat16), v, preferred_element_type=jnp.float32
    )                                                # (S, d)
    m_ref[...] = m_new

    @pl.when(kv == pl.num_programs(1) - 1)
    def _():
        o_ref[0] = (
            acc_ref[...] * pl.reciprocal(l_ref[...], approx=True)
        ).astype(o_ref.dtype)


def attention(q, k, v):
    """q,k,v: (N*heads, S, d) -> softmax(q k^T / sqrt(d)) v, tiled over the KV axis."""
    BH, S, D = q.shape
    scale = 1.0 / math.sqrt(D)
    t_kv = 512 if (S > 512 and S % 512 == 0) else S
    n_kv = S // t_kv
    return pl.pallas_call(
        functools.partial(_attn_kernel, scale=scale),
        out_shape=jax.ShapeDtypeStruct((BH, S, D), jnp.float32),
        grid_spec=pltpu.PrefetchScalarGridSpec(
            num_scalar_prefetch=0,
            grid=(BH, n_kv),
            in_specs=[
                pl.BlockSpec((1, S, D), lambda b, kv: (b, 0, 0)),
                pl.BlockSpec((1, t_kv, D), lambda b, kv: (b, kv, 0)),
                pl.BlockSpec((1, t_kv, D), lambda b, kv: (b, kv, 0)),
            ],
            out_specs=pl.BlockSpec((1, S, D), lambda b, kv: (b, 0, 0)),
            scratch_shapes=[
                pltpu.VMEM((S, 1), jnp.float32),
                pltpu.VMEM((S, 1), jnp.float32),
                pltpu.VMEM((S, D), jnp.float32),
            ],
        ),
        compiler_params=pltpu.CompilerParams(
            dimension_semantics=("parallel", "arbitrary"),
            vmem_limit_bytes=_VMEM_LIMIT,
        ),
    )(q, k, v)


# ----------------------------------------------------------------------------
# Conv via im2col (JAX glue) + tiled Pallas GEMM.  Channel-major layout means
# the GEMM output (Cout, N*Ho*Wo) is directly the next activation -> no
# post-conv transpose, and the residual add fuses into the GEMM epilogue.
# ----------------------------------------------------------------------------
def conv2d(x, w, b, *, stride=1, padding=None, residual=None):
    """x: (Cin, N, H, W), w: (Cout, Cin, kh, kw) [torch layout], b: (Cout,)."""
    Cin, N, H, W = x.shape
    Cout, _, kh, kw = w.shape
    if kh == 1 and kw == 1 and stride == 1:
        Ho, Wo = H, W
        patches = x.reshape(Cin, N * H * W)
    else:
        if padding is None:
            padding = ((kh // 2, kh // 2), (kw // 2, kw // 2))
        xp = jnp.pad(x, ((0, 0), (0, 0), padding[0], padding[1]))
        Hp, Wp = xp.shape[2], xp.shape[3]
        Ho = (Hp - kh) // stride + 1
        Wo = (Wp - kw) // stride + 1
        cols = []
        for ky in range(kh):
            for kx in range(kw):
                cols.append(
                    xp[:, :,
                       ky: ky + stride * (Ho - 1) + 1: stride,
                       kx: kx + stride * (Wo - 1) + 1: stride]
                )
        # rows ordered (Cin, kh, kw) to match the PyTorch weight flattening order
        patches = jnp.stack(cols, axis=1).reshape(Cin * kh * kw, N * Ho * Wo)
        # TODO(synk): im2col is still materialized through HBM (9x read
        # amplification for 3x3); generating patches in-kernel with strided
        # pl.ds loads would cut HBM traffic further (biggest win on v5e).
    wmat = w.reshape(Cout, Cin * kh * kw)
    r = None if residual is None else residual.reshape(Cout, N * Ho * Wo)
    out = matmul_bias(wmat, patches, b, residual=r)
    return out.reshape(Cout, N, Ho, Wo)


# ----------------------------------------------------------------------------
# Blocks
# ----------------------------------------------------------------------------
def res_block(x, p):
    h = group_norm(x, *p["norm1"], silu=True)
    h = conv2d(h, *p["conv1"])
    h = group_norm(h, *p["norm2"], silu=True)
    # dropout p = 0.0 -> identity
    skip = conv2d(x, *p["skip"]) if "skip" in p else x   # use_skip_conv -> 3x3 conv
    return conv2d(h, *p["conv2"], residual=skip)          # residual fused in GEMM


def self_attention_block(x, p, *, num_heads=1):
    C, N, H, W = x.shape
    S = H * W
    d = C // num_heads
    h = group_norm(x, *p["norm"], silu=False)
    q = conv2d(h, *p["q"])
    k = conv2d(h, *p["k"])
    v = conv2d(h, *p["v"])

    def split_heads(t):  # (C, N, H, W) -> (N*heads, S, d)
        return (t.reshape(num_heads, d, N, S)
                 .transpose(2, 0, 3, 1)
                 .reshape(N * num_heads, S, d))

    o = attention(split_heads(q), split_heads(k), split_heads(v))
    o = (o.reshape(N, num_heads, S, d)
          .transpose(1, 3, 0, 2)
          .reshape(C, N, H, W))
    return conv2d(o, *p["proj"], residual=x)               # residual fused in GEMM


def downsample(x, p):
    # TODO(synk): Downsample definition not given; using the LDM convention
    # (asymmetric pad (0,1,0,1) + 3x3 stride-2 conv).
    return conv2d(x, *p, stride=2, padding=((0, 1), (0, 1)))


def encoder_forward(params, x):
    # x arrives NCHW (PyTorch convention); compute internally channel-major.
    h = jnp.transpose(x, (1, 0, 2, 3))
    h = conv2d(h, *params["conv_in"])
    for db in params["down_blocks"]:
        for i, rb in enumerate(db["res_blocks"]):
            h = res_block(h, rb)
            if db["attn_blocks"] is not None:
                h = self_attention_block(h, db["attn_blocks"][i])
        if db["down"] is not None:
            h = downsample(h, db["down"])
    mb = params["mid_block"]
    h = res_block(h, mb["res_blocks"][0])
    for attn, rb in zip(mb["attn_blocks"], mb["res_blocks"][1:]):
        h = self_attention_block(h, attn)
        h = res_block(h, rb)
    # out_proj = Normalize -> SiLU -> 3x3 conv (double_z)
    h = group_norm(h, *params["out_norm"], silu=True)
    h = conv2d(h, *params["out_conv"])
    return jnp.transpose(h, (1, 0, 2, 3))   # back to NCHW


# ----------------------------------------------------------------------------
# Deterministic parameter construction
# ----------------------------------------------------------------------------
def make_params(
    in_channels=3,
    out_channels=3,
    hidden_channels=(16, 32),
    attention_levels=(1,),
    num_res_blocks=1,
    mid_num_layers=1,
    double_z=True,
):
    base_key = jax.random.PRNGKey(42)
    counter = itertools.count()

    def nkey():
        return jax.random.fold_in(base_key, next(counter))

    def conv_p(cout, cin, k):
        fan_in = cin * k * k
        w = jax.random.normal(nkey(), (cout, cin, k, k), jnp.float32) / np.sqrt(fan_in)
        b = 0.01 * jax.random.normal(nkey(), (cout,), jnp.float32)
        return (w, b)

    def norm_p(c):
        return (jnp.ones((c,), jnp.float32), jnp.zeros((c,), jnp.float32))

    def resblock_p(cin, cout):
        p = {
            "norm1": norm_p(cin),
            "conv1": conv_p(cout, cin, 3),
            "norm2": norm_p(cout),
            "conv2": conv_p(cout, cout, 3),
        }
        if cin != cout:
            p["skip"] = conv_p(cout, cin, 3)
        return p

    def attn_p(c):
        return {
            "norm": norm_p(c),
            "q": conv_p(c, c, 1),
            "k": conv_p(c, c, 1),
            "v": conv_p(c, c, 1),
            "proj": conv_p(c, c, 1),
        }

    params = {"conv_in": conv_p(hidden_channels[0], in_channels, 3)}
    down_blocks = []
    out_ch = hidden_channels[0]
    for i, hc in enumerate(hidden_channels):
        in_ch = out_ch
        out_ch = hc
        add_down = i != len(hidden_channels) - 1
        add_attn = i in attention_levels
        rbs = []
        for j in range(num_res_blocks):
            rin = in_ch if j == 0 else out_ch
            rbs.append(resblock_p(rin, out_ch))
        attns = [attn_p(out_ch) for _ in range(num_res_blocks)] if add_attn else None
        down = conv_p(out_ch, out_ch, 3) if add_down else None
        down_blocks.append({"res_blocks": rbs, "attn_blocks": attns, "down": down})
    params["down_blocks"] = down_blocks

    c_mid = hidden_channels[-1]
    params["mid_block"] = {
        "res_blocks": [resblock_p(c_mid, c_mid) for _ in range(mid_num_layers + 1)],
        "attn_blocks": [attn_p(c_mid) for _ in range(mid_num_layers)],
    }
    params["out_norm"] = norm_p(c_mid)
    params["out_conv"] = conv_p(2 * out_channels if double_z else out_channels, c_mid, 3)
    return params


if __name__ == "__main__":
    params = make_params()
    x = jax.random.normal(jax.random.PRNGKey(0), (2, 3, 16, 16), jnp.float32)
    fwd = jax.jit(encoder_forward)
    out = fwd(params, x)
    jax.block_until_ready(out)
    assert out.shape == (2, 6, 8, 8), out.shape
    assert bool(jnp.all(jnp.isfinite(out)))
    print("KERNEL_OK")
</pallas_src>

<mosaic_0001>
module attributes {stable_mosaic.version = 11 : i64} {
  func.func @_gemm_kernel(%arg0: i32, %arg1: i32, %arg2: i32, %arg3: memref<16x128xbf16, #tpu.memory_space<vmem>>, %arg4: memref<128x512xf32, #tpu.memory_space<vmem>>, %arg5: memref<16x1xf32, #tpu.memory_space<vmem>>, %arg6: memref<16x512xf32, #tpu.memory_space<vmem>>, %arg7: memref<16x512xf32, #tpu.memory_space<vmem>>) attributes {dimension_semantics = [#tpu.dimension_semantics<parallel>, #tpu.dimension_semantics<parallel>, #tpu.dimension_semantics<arbitrary>], iteration_bounds = array<i64: 1, 1, 1>, scalar_prefetch = 0 : i64, scratch_operands = 1 : i64, tpu.core_type = #tpu.core_type<tc>, window_params = [{transform_indices = @transform_0, window_bounds = array<i64: 16, 128>}, {transform_indices = @transform_1, window_bounds = array<i64: 128, 512>}, {transform_indices = @transform_2, window_bounds = array<i64: 16, 1>}, {transform_indices = @transform_3, window_bounds = array<i64: 16, 512>}]} {
    %c0_i32 = arith.constant 0 : i32
    %0 = arith.cmpi eq, %arg2, %c0_i32 : i32
    %1 = arith.extui %0 : i1 to i32
    %c0_i32_0 = arith.constant 0 : i32
    %2 = arith.cmpi ne, %1, %c0_i32_0 : i32
    scf.if %2 {
      %cst_10 = arith.constant 0.000000e+00 : f32
      %13 = vector.broadcast %cst_10 : f32 to vector<16x512xf32>
      %c0_11 = arith.constant 0 : index
      %c0_12 = arith.constant 0 : index
      %14 = vector.load %arg7[%c0_11, %c0_12] : memref<16x512xf32, #tpu.memory_space<vmem>>, vector<16x512xf32>
      tpu.vector_store %arg7[%c0_11, %c0_12], %13 {strides = array<i32>} : memref<16x512xf32, #tpu.memory_space<vmem>>, vector<16x512xf32>,
    } else {
    }
    %c0 = arith.constant 0 : index
    %c0_1 = arith.constant 0 : index
    %3 = vector.load %arg7[%c0, %c0_1] : memref<16x512xf32, #tpu.memory_space<vmem>>, vector<16x512xf32>
    %c0_2 = arith.constant 0 : index
    %c0_3 = arith.constant 0 : index
    %4 = vector.load %arg3[%c0_2, %c0_3] : memref<16x128xbf16, #tpu.memory_space<vmem>>, vector<16x128xbf16>
    %c0_4 = arith.constant 0 : index
    %c0_5 = arith.constant 0 : index
    %5 = vector.load %arg4[%c0_4, %c0_5] : memref<128x512xf32, #tpu.memory_space<vmem>>, vector<128x512xf32>
    %6 = arith.truncf %5 : vector<128x512xf32> to vector<128x512xbf16>
    %cst = arith.constant dense<0.000000e+00> : vector<16x512xf32>
    %7 = tpu.matmul %4, %6, %cst {dimension_numbers = #tpu.dot_dimension_numbers<[1], [0], [0], [1], [0, 0, 1, 1], [], []>} : vector<16x128xbf16>, vector<128x512xbf16>, vector<16x512xf32> -> vector<16x512xf32>
    %8 = arith.addf %3, %7 : vector<16x512xf32>
    %c0_6 = arith.constant 0 : index
    %c0_7 = arith.constant 0 : index
    %9 = vector.load %arg7[%c0_6, %c0_7] : memref<16x512xf32, #tpu.memory_space<vmem>>, vector<16x512xf32>
    tpu.vector_store %arg7[%c0_6, %c0_7], %8 {strides = array<i32>} : memref<16x512xf32, #tpu.memory_space<vmem>>, vector<16x512xf32>,
    %c0_i32_8 = arith.constant 0 : i32
    %10 = arith.cmpi eq, %arg2, %c0_i32_8 : i32
    %11 = arith.extui %10 : i1 to i32
    %c0_i32_9 = arith.constant 0 : i32
    %12 = arith.cmpi ne, %11, %c0_i32_9 : i32
    scf.if %12 {
      %c0_10 = arith.constant 0 : index
      %c0_11 = arith.constant 0 : index
      %13 = vector.load %arg7[%c0_10, %c0_11] : memref<16x512xf32, #tpu.memory_space<vmem>>, vector<16x512xf32>
      %c0_12 = arith.constant 0 : index
      %c0_13 = arith.constant 0 : index
      %14 = vector.load %arg5[%c0_12, %c0_13] : memref<16x1xf32, #tpu.memory_space<vmem>>, vector<16x1xf32>
      %15 = vector.broadcast %14 : vector<16x1xf32> to vector<16x512xf32>
      %16 = arith.addf %13, %15 : vector<16x512xf32>
      %c0_14 = arith.constant 0 : index
      %c0_15 = arith.constant 0 : index
      %17 = vector.load %arg6[%c0_14, %c0_15] : memref<16x512xf32, #tpu.memory_space<vmem>>, vector<16x512xf32>
      tpu.vector_store %arg6[%c0_14, %c0_15], %16 {strides = array<i32>} : memref<16x512xf32, #tpu.memory_space<vmem>>, vector<16x512xf32>,
    } else {
    }
    return
  }
  func.func @transform_0(%arg0: i32, %arg1: i32, %arg2: i32) -> (i32, i32) {
    %c0_i32 = arith.constant 0 : i32
    return %arg0, %arg2 : i32, i32
  }
  func.func @transform_1(%arg0: i32, %arg1: i32, %arg2: i32) -> (i32, i32) {
    %c0_i32 = arith.constant 0 : i32
    return %arg2, %arg1 : i32, i32
  }
  func.func @transform_2(%arg0: i32, %arg1: i32, %arg2: i32) -> (i32, i32) {
    %c0_i32 = arith.constant 0 : i32
    %c0_i32_0 = arith.constant 0 : i32
    return %arg0, %c0_i32 : i32, i32
  }
  func.func @transform_3(%arg0: i32, %arg1: i32, %arg2: i32) -> (i32, i32) {
    %c0_i32 = arith.constant 0 : i32
    return %arg0, %arg1 : i32, i32
  }
}

module attributes {stable_mosaic.version = 11 : i64} {
  func.func @_gn_kernel(%arg0: i32, %arg1: memref<1x2x2x256xf32, #tpu.memory_space<vmem>>, %arg2: memref<1x2x1x1xf32, #tpu.memory_space<vmem>>, %arg3: memref<1x2x1x1xf32, #tpu.memory_space<vmem>>, %arg4: memref<1x2x2x256xf32, #tpu.memory_space<vmem>>) attributes {dimension_semantics = [#tpu.dimension_semantics<parallel>], iteration_bounds = array<i64: 8>, scalar_prefetch = 0 : i64, scratch_operands = 0 : i64, tpu.core_type = #tpu.core_type<tc>, window_params = [{transform_indices = @transform_0, window_bounds = array<i64: 1, 2, 2, 256>}, {transform_indices = @transform_1, window_bounds = array<i64: 1, 2, 1, 1>}, {transform_indices = @transform_2, window_bounds = array<i64: 1, 2, 1, 1>}, {transform_indices = @transform_3, window_bounds = array<i64: 1, 2, 2, 256>}]} {
    %c0 = arith.constant 0 : index
    %c0_0 = arith.constant 0 : index
    %c0_1 = arith.constant 0 : index
    %c0_2 = arith.constant 0 : index
    %0 = vector.load %arg1[%c0, %c0_0, %c0_1, %c0_2] : memref<1x2x2x256xf32, #tpu.memory_space<vmem>>, vector<1x2x2x256xf32>
    %1 = vector.shape_cast %0 : vector<1x2x2x256xf32> to vector<2x2x256xf32>
    %cst = arith.constant dense<0.000000e+00> : vector<2x2xf32>
    %2 = vector.multi_reduction <add>, %1, %cst [2] : vector<2x2x256xf32> to vector<2x2xf32>
    %3 = vector.shape_cast %2 : vector<2x2xf32> to vector<2x2x1xf32>
    %cst_3 = arith.constant dense<0.000000e+00> : vector<2x1xf32>
    %4 = vector.multi_reduction <add>, %3, %cst_3 [0] : vector<2x2x1xf32> to vector<2x1xf32>
    %5 = vector.shape_cast %4 : vector<2x1xf32> to vector<1x2x1xf32>
    %cst_4 = arith.constant 0.001953125 : f32
    %6 = vector.broadcast %cst_4 : f32 to vector<1x2x1xf32>
    %7 = arith.mulf %5, %6 : vector<1x2x1xf32>
    %8 = vector.broadcast %7 : vector<1x2x1xf32> to vector<2x2x256xf32>
    %9 = arith.subf %1, %8 : vector<2x2x256xf32>
    %10 = arith.mulf %9, %9 : vector<2x2x256xf32>
    %cst_5 = arith.constant dense<0.000000e+00> : vector<2x2xf32>
    %11 = vector.multi_reduction <add>, %10, %cst_5 [2] : vector<2x2x256xf32> to vector<2x2xf32>
    %12 = vector.shape_cast %11 : vector<2x2xf32> to vector<2x2x1xf32>
    %cst_6 = arith.constant dense<0.000000e+00> : vector<2x1xf32>
    %13 = vector.multi_reduction <add>, %12, %cst_6 [0] : vector<2x2x1xf32> to vector<2x1xf32>
    %14 = vector.shape_cast %13 : vector<2x1xf32> to vector<1x2x1xf32>
    %cst_7 = arith.constant 0.001953125 : f32
    %15 = vector.broadcast %cst_7 : f32 to vector<1x2x1xf32>
    %16 = arith.mulf %14, %15 : vector<1x2x1xf32>
    %cst_8 = arith.constant 9.99999997E-7 : f32
    %17 = vector.broadcast %cst_8 : f32 to vector<1x2x1xf32>
    %18 = arith.addf %16, %17 : vector<1x2x1xf32>
    %19 = math.rsqrt %18 : vector<1x2x1xf32>
    %20 = vector.broadcast %19 : vector<1x2x1xf32> to vector<2x2x256xf32>
    %21 = arith.mulf %9, %20 : vector<2x2x256xf32>
    %c0_9 = arith.constant 0 : index
    %c0_10 = arith.constant 0 : index
    %c0_11 = arith.constant 0 : index
    %c0_12 = arith.constant 0 : index
    %22 = vector.load %arg2[%c0_9, %c0_10, %c0_11, %c0_12] : memref<1x2x1x1xf32, #tpu.memory_space<vmem>>, vector<1x2x1x1xf32>
    %23 = vector.shape_cast %22 : vector<1x2x1x1xf32> to vector<2x1x1xf32>
    %24 = vector.broadcast %23 : vector<2x1x1xf32> to vector<2x2x256xf32>
    %25 = arith.mulf %21, %24 : vector<2x2x256xf32>
    %c0_13 = arith.constant 0 : index
    %c0_14 = arith.constant 0 : index
    %c0_15 = arith.constant 0 : index
    %c0_16 = arith.constant 0 : index
    %26 = vector.load %arg3[%c0_13, %c0_14, %c0_15, %c0_16] : memref<1x2x1x1xf32, #tpu.memory_space<vmem>>, vector<1x2x1x1xf32>
    %27 = vector.shape_cast %26 : vector<1x2x1x1xf32> to vector<2x1x1xf32>
    %28 = vector.broadcast %27 : vector<2x1x1xf32> to vector<2x2x256xf32>
    %29 = arith.addf %25, %28 : vector<2x2x256xf32>
    %30 = arith.negf %29 : vector<2x2x256xf32>
    %31 = math.exp %30 : vector<2x2x256xf32>
    %cst_17 = arith.constant 1.000000e+00 : f32
    %32 = vector.broadcast %cst_17 : f32 to vector<2x2x256xf32>
    %33 = arith.addf %32, %31 : vector<2x2x256xf32>
    %34 = arith.divf %32, %33 : vector<2x2x256xf32>
    %35 = arith.mulf %29, %34 : vector<2x2x256xf32>
    %c0_18 = arith.constant 0 : index
    %c0_19 = arith.constant 0 : index
    %c0_20 = arith.constant 0 : index
    %c0_21 = arith.constant 0 : index
    %36 = vector.load %arg4[%c0_18, %c0_19, %c0_20, %c0_21] : memref<1x2x2x256xf32, #tpu.memory_space<vmem>>, vector<1x2x2x256xf32>
    %37 = vector.shape_cast %36 : vector<1x2x2x256xf32> to vector<2x2x256xf32>
    %38 = vector.shape_cast %35 : vector<2x2x256xf32> to vector<1x2x2x256xf32>
    tpu.vector_store %arg4[%c0_18, %c0_19, %c0_20, %c0_21], %38 {strides = array<i32>} : memref<1x2x2x256xf32, #tpu.memory_space<vmem>>, vector<1x2x2x256xf32>,
    return
  }
  func.func @transform_0(%arg0: i32) -> (i32, i32, i32, i32) {
    %c0_i32 = arith.constant 0 : i32
    %c0_i32_0 = arith.constant 0 : i32
    %c0_i32_1 = arith.constant 0 : i32
    %c0_i32_2 = arith.constant 0 : i32
    return %arg0, %c0_i32, %c0_i32_0, %c0_i32_1 : i32, i32, i32, i32
  }
  func.func @transform_1(%arg0: i32) -> (i32, i32, i32, i32) {
    %c0_i32 = arith.constant 0 : i32
    %c0_i32_0 = arith.constant 0 : i32
    %c0_i32_1 = arith.constant 0 : i32
    %c0_i32_2 = arith.constant 0 : i32
    return %arg0, %c0_i32, %c0_i32_0, %c0_i32_1 : i32, i32, i32, i32
  }
  func.func @transform_2(%arg0: i32) -> (i32, i32, i32, i32) {
    %c0_i32 = arith.constant 0 : i32
    %c0_i32_0 = arith.constant 0 : i32
    %c0_i32_1 = arith.constant 0 : i32
    %c0_i32_2 = arith.constant 0 : i32
    return %arg0, %c0_i32, %c0_i32_0, %c0_i32_1 : i32, i32, i32, i32
  }
  func.func @transform_3(%arg0: i32) -> (i32, i32, i32, i32) {
    %c0_i32 = arith.constant 0 : i32
    %c0_i32_0 = arith.constant 0 : i32
    %c0_i32_1 = arith.constant 0 : i32
    %c0_i32_2 = arith.constant 0 : i32
    return %arg0, %c0_i32, %c0_i32_0, %c0_i32_1 : i32, i32, i32, i32
  }
}

module attributes {stable_mosaic.version = 11 : i64} {
  func.func @_gemm_kernel(%arg0: i32, %arg1: i32, %arg2: i32, %arg3: memref<16x256xbf16, #tpu.memory_space<vmem>>, %arg4: memref<256x512xf32, #tpu.memory_space<vmem>>, %arg5: memref<16x1xf32, #tpu.memory_space<vmem>>, %arg6: memref<16x512xf32, #tpu.memory_space<vmem>>, %arg7: memref<16x512xf32, #tpu.memory_space<vmem>>) attributes {dimension_semantics = [#tpu.dimension_semantics<parallel>, #tpu.dimension_semantics<parallel>, #tpu.dimension_semantics<arbitrary>], iteration_bounds = array<i64: 1, 1, 1>, scalar_prefetch = 0 : i64, scratch_operands = 1 : i64, tpu.core_type = #tpu.core_type<tc>, window_params = [{transform_indices = @transform_0, window_bounds = array<i64: 16, 256>}, {transform_indices = @transform_1, window_bounds = array<i64: 256, 512>}, {transform_indices = @transform_2, window_bounds = array<i64: 16, 1>}, {transform_indices = @transform_3, window_bounds = array<i64: 16, 512>}]} {
    %c0_i32 = arith.constant 0 : i32
    %0 = arith.cmpi eq, %arg2, %c0_i32 : i32
    %1 = arith.extui %0 : i1 to i32
    %c0_i32_0 = arith.constant 0 : i32
    %2 = arith.cmpi ne, %1, %c0_i32_0 : i32
    scf.if %2 {
      %cst_10 = arith.constant 0.000000e+00 : f32
      %13 = vector.broadcast %cst_10 : f32 to vector<16x512xf32>
      %c0_11 = arith.constant 0 : index
      %c0_12 = arith.constant 0 : index
      %14 = vector.load %arg7[%c0_11, %c0_12] : memref<16x512xf32, #tpu.memory_space<vmem>>, vector<16x512xf32>
      tpu.vector_store %arg7[%c0_11, %c0_12], %13 {strides = array<i32>} : memref<16x512xf32, #tpu.memory_space<vmem>>, vector<16x512xf32>,
    } else {
    }
    %c0 = arith.constant 0 : index
    %c0_1 = arith.constant 0 : index
    %3 = vector.load %arg7[%c0, %c0_1] : memref<16x512xf32, #tpu.memory_space<vmem>>, vector<16x512xf32>
    %c0_2 = arith.constant 0 : index
    %c0_3 = arith.constant 0 : index
    %4 = vector.load %arg3[%c0_2, %c0_3] : memref<16x256xbf16, #tpu.memory_space<vmem>>, vector<16x256xbf16>
    %c0_4 = arith.constant 0 : index
    %c0_5 = arith.constant 0 : index
    %5 = vector.load %arg4[%c0_4, %c0_5] : memref<256x512xf32, #tpu.memory_space<vmem>>, vector<256x512xf32>
    %6 = arith.truncf %5 : vector<256x512xf32> to vector<256x512xbf16>
    %cst = arith.constant dense<0.000000e+00> : vector<16x512xf32>
    %7 = tpu.matmul %4, %6, %cst {dimension_numbers = #tpu.dot_dimension_numbers<[1], [0], [0], [1], [0, 0, 1, 1], [], []>} : vector<16x256xbf16>, vector<256x512xbf16>, vector<16x512xf32> -> vector<16x512xf32>
    %8 = arith.addf %3, %7 : vector<16x512xf32>
    %c0_6 = arith.constant 0 : index
    %c0_7 = arith.constant 0 : index
    %9 = vector.load %arg7[%c0_6, %c0_7] : memref<16x512xf32, #tpu.memory_space<vmem>>, vector<16x512xf32>
    tpu.vector_store %arg7[%c0_6, %c0_7], %8 {strides = array<i32>} : memref<16x512xf32, #tpu.memory_space<vmem>>, vector<16x512xf32>,
    %c0_i32_8 = arith.constant 0 : i32
    %10 = arith.cmpi eq, %arg2, %c0_i32_8 : i32
    %11 = arith.extui %10 : i1 to i32
    %c0_i32_9 = arith.constant 0 : i32
    %12 = arith.cmpi ne, %11, %c0_i32_9 : i32
    scf.if %12 {
      %c0_10 = arith.constant 0 : index
      %c0_11 = arith.constant 0 : index
      %13 = vector.load %arg7[%c0_10, %c0_11] : memref<16x512xf32, #tpu.memory_space<vmem>>, vector<16x512xf32>
      %c0_12 = arith.constant 0 : index
      %c0_13 = arith.constant 0 : index
      %14 = vector.load %arg5[%c0_12, %c0_13] : memref<16x1xf32, #tpu.memory_space<vmem>>, vector<16x1xf32>
      %15 = vector.broadcast %14 : vector<16x1xf32> to vector<16x512xf32>
      %16 = arith.addf %13, %15 : vector<16x512xf32>
      %c0_14 = arith.constant 0 : index
      %c0_15 = arith.constant 0 : index
      %17 = vector.load %arg6[%c0_14, %c0_15] : memref<16x512xf32, #tpu.memory_space<vmem>>, vector<16x512xf32>
      tpu.vector_store %arg6[%c0_14, %c0_15], %16 {strides = array<i32>} : memref<16x512xf32, #tpu.memory_space<vmem>>, vector<16x512xf32>,
    } else {
    }
    return
  }
  func.func @transform_0(%arg0: i32, %arg1: i32, %arg2: i32) -> (i32, i32) {
    %c0_i32 = arith.constant 0 : i32
    return %arg0, %arg2 : i32, i32
  }
  func.func @transform_1(%arg0: i32, %arg1: i32, %arg2: i32) -> (i32, i32) {
    %c0_i32 = arith.constant 0 : i32
    return %arg2, %arg1 : i32, i32
  }
  func.func @transform_2(%arg0: i32, %arg1: i32, %arg2: i32) -> (i32, i32) {
    %c0_i32 = arith.constant 0 : i32
    %c0_i32_0 = arith.constant 0 : i32
    return %arg0, %c0_i32 : i32, i32
  }
  func.func @transform_3(%arg0: i32, %arg1: i32, %arg2: i32) -> (i32, i32) {
    %c0_i32 = arith.constant 0 : i32
    return %arg0, %arg1 : i32, i32
  }
}

module attributes {stable_mosaic.version = 11 : i64} {
  func.func @_gemm_res_kernel(%arg0: i32, %arg1: i32, %arg2: i32, %arg3: memref<16x256xbf16, #tpu.memory_space<vmem>>, %arg4: memref<256x512xf32, #tpu.memory_space<vmem>>, %arg5: memref<16x1xf32, #tpu.memory_space<vmem>>, %arg6: memref<16x512xf32, #tpu.memory_space<vmem>>, %arg7: memref<16x512xf32, #tpu.memory_space<vmem>>, %arg8: memref<16x512xf32, #tpu.memory_space<vmem>>) attributes {dimension_semantics = [#tpu.dimension_semantics<parallel>, #tpu.dimension_semantics<parallel>, #tpu.dimension_semantics<arbitrary>], iteration_bounds = array<i64: 1, 1, 1>, scalar_prefetch = 0 : i64, scratch_operands = 1 : i64, tpu.core_type = #tpu.core_type<tc>, window_params = [{transform_indices = @transform_0, window_bounds = array<i64: 16, 256>}, {transform_indices = @transform_1, window_bounds = array<i64: 256, 512>}, {transform_indices = @transform_2, window_bounds = array<i64: 16, 1>}, {transform_indices = @transform_3, window_bounds = array<i64: 16, 512>}, {transform_indices = @transform_4, window_bounds = array<i64: 16, 512>}]} {
    %c0_i32 = arith.constant 0 : i32
    %0 = arith.cmpi eq, %arg2, %c0_i32 : i32
    %1 = arith.extui %0 : i1 to i32
    %c0_i32_0 = arith.constant 0 : i32
    %2 = arith.cmpi ne, %1, %c0_i32_0 : i32
    scf.if %2 {
      %cst_10 = arith.constant 0.000000e+00 : f32
      %13 = vector.broadcast %cst_10 : f32 to vector<16x512xf32>
      %c0_11 = arith.constant 0 : index
      %c0_12 = arith.constant 0 : index
      %14 = vector.load %arg8[%c0_11, %c0_12] : memref<16x512xf32, #tpu.memory_space<vmem>>, vector<16x512xf32>
      tpu.vector_store %arg8[%c0_11, %c0_12], %13 {strides = array<i32>} : memref<16x512xf32, #tpu.memory_space<vmem>>, vector<16x512xf32>,
    } else {
    }
    %c0 = arith.constant 0 : index
    %c0_1 = arith.constant 0 : index
    %3 = vector.load %arg8[%c0, %c0_1] : memref<16x512xf32, #tpu.memory_space<vmem>>, vector<16x512xf32>
    %c0_2 = arith.constant 0 : index
    %c0_3 = arith.constant 0 : index
    %4 = vector.load %arg3[%c0_2, %c0_3] : memref<16x256xbf16, #tpu.memory_space<vmem>>, vector<16x256xbf16>
    %c0_4 = arith.constant 0 : index
    %c0_5 = arith.constant 0 : index
    %5 = vector.load %arg4[%c0_4, %c0_5] : memref<256x512xf32, #tpu.memory_space<vmem>>, vector<256x512xf32>
    %6 = arith.truncf %5 : vector<256x512xf32> to vector<256x512xbf16>
    %cst = arith.constant dense<0.000000e+00> : vector<16x512xf32>
    %7 = tpu.matmul %4, %6, %cst {dimension_numbers = #tpu.dot_dimension_numbers<[1], [0], [0], [1], [0, 0, 1, 1], [], []>} : vector<16x256xbf16>, vector<256x512xbf16>, vector<16x512xf32> -> vector<16x512xf32>
    %8 = arith.addf %3, %7 : vector<16x512xf32>
    %c0_6 = arith.constant 0 : index
    %c0_7 = arith.constant 0 : index
    %9 = vector.load %arg8[%c0_6, %c0_7] : memref<16x512xf32, #tpu.memory_space<vmem>>, vector<16x512xf32>
    tpu.vector_store %arg8[%c0_6, %c0_7], %8 {strides = array<i32>} : memref<16x512xf32, #tpu.memory_space<vmem>>, vector<16x512xf32>,
    %c0_i32_8 = arith.constant 0 : i32
    %10 = arith.cmpi eq, %arg2, %c0_i32_8 : i32
    %11 = arith.extui %10 : i1 to i32
    %c0_i32_9 = arith.constant 0 : i32
    %12 = arith.cmpi ne, %11, %c0_i32_9 : i32
    scf.if %12 {
      %c0_10 = arith.constant 0 : index
      %c0_11 = arith.constant 0 : index
      %13 = vector.load %arg8[%c0_10, %c0_11] : memref<16x512xf32, #tpu.memory_space<vmem>>, vector<16x512xf32>
      %c0_12 = arith.constant 0 : index
      %c0_13 = arith.constant 0 : index
      %14 = vector.load %arg5[%c0_12, %c0_13] : memref<16x1xf32, #tpu.memory_space<vmem>>, vector<16x1xf32>
      %15 = vector.broadcast %14 : vector<16x1xf32> to vector<16x512xf32>
      %16 = arith.addf %13, %15 : vector<16x512xf32>
      %c0_14 = arith.constant 0 : index
      %c0_15 = arith.constant 0 : index
      %17 = vector.load %arg6[%c0_14, %c0_15] : memref<16x512xf32, #tpu.memory_space<vmem>>, vector<16x512xf32>
      %18 = arith.addf %16, %17 : vector<16x512xf32>
      %c0_16 = arith.constant 0 : index
      %c0_17 = arith.constant 0 : index
      %19 = vector.load %arg7[%c0_16, %c0_17] : memref<16x512xf32, #tpu.memory_space<vmem>>, vector<16x512xf32>
      tpu.vector_store %arg7[%c0_16, %c0_17], %18 {strides = array<i32>} : memref<16x512xf32, #tpu.memory_space<vmem>>, vector<16x512xf32>,
    } else {
    }
    return
  }
  func.func @transform_0(%arg0: i32, %arg1: i32, %arg2: i32) -> (i32, i32) {
    %c0_i32 = arith.constant 0 : i32
    return %arg0, %arg2 : i32, i32
  }
  func.func @transform_1(%arg0: i32, %arg1: i32, %arg2: i32) -> (i32, i32) {
    %c0_i32 = arith.constant 0 : i32
    return %arg2, %arg1 : i32, i32
  }
  func.func @transform_2(%arg0: i32, %arg1: i32, %arg2: i32) -> (i32, i32) {
    %c0_i32 = arith.constant 0 : i32
    %c0_i32_0 = arith.constant 0 : i32
    return %arg0, %c0_i32 : i32, i32
  }
  func.func @transform_3(%arg0: i32, %arg1: i32, %arg2: i32) -> (i32, i32) {
    %c0_i32 = arith.constant 0 : i32
    return %arg0, %arg1 : i32, i32
  }
  func.func @transform_4(%arg0: i32, %arg1: i32, %arg2: i32) -> (i32, i32) {
    %c0_i32 = arith.constant 0 : i32
    return %arg0, %arg1 : i32, i32
  }
}

module attributes {stable_mosaic.version = 11 : i64} {
  func.func @_gemm_kernel(%arg0: i32, %arg1: i32, %arg2: i32, %arg3: memref<16x256xbf16, #tpu.memory_space<vmem>>, %arg4: memref<256x128xf32, #tpu.memory_space<vmem>>, %arg5: memref<16x1xf32, #tpu.memory_space<vmem>>, %arg6: memref<16x128xf32, #tpu.memory_space<vmem>>, %arg7: memref<16x128xf32, #tpu.memory_space<vmem>>) attributes {dimension_semantics = [#tpu.dimension_semantics<parallel>, #tpu.dimension_semantics<parallel>, #tpu.dimension_semantics<arbitrary>], iteration_bounds = array<i64: 1, 1, 1>, scalar_prefetch = 0 : i64, scratch_operands = 1 : i64, tpu.core_type = #tpu.core_type<tc>, window_params = [{transform_indices = @transform_0, window_bounds = array<i64: 16, 256>}, {transform_indices = @transform_1, window_bounds = array<i64: 256, 128>}, {transform_indices = @transform_2, window_bounds = array<i64: 16, 1>}, {transform_indices = @transform_3, window_bounds = array<i64: 16, 128>}]} {
    %c0_i32 = arith.constant 0 : i32
    %0 = arith.cmpi eq, %arg2, %c0_i32 : i32
    %1 = arith.extui %0 : i1 to i32
    %c0_i32_0 = arith.constant 0 : i32
    %2 = arith.cmpi ne, %1, %c0_i32_0 : i32
    scf.if %2 {
      %cst_10 = arith.constant 0.000000e+00 : f32
      %13 = vector.broadcast %cst_10 : f32 to vector<16x128xf32>
      %c0_11 = arith.constant 0 : index
      %c0_12 = arith.constant 0 : index
      %14 = vector.load %arg7[%c0_11, %c0_12] : memref<16x128xf32, #tpu.memory_space<vmem>>, vector<16x128xf32>
      tpu.vector_store %arg7[%c0_11, %c0_12], %13 {strides = array<i32>} : memref<16x128xf32, #tpu.memory_space<vmem>>, vector<16x128xf32>,
    } else {
    }
    %c0 = arith.constant 0 : index
    %c0_1 = arith.constant 0 : index
    %3 = vector.load %arg7[%c0, %c0_1] : memref<16x128xf32, #tpu.memory_space<vmem>>, vector<16x128xf32>
    %c0_2 = arith.constant 0 : index
    %c0_3 = arith.constant 0 : index
    %4 = vector.load %arg3[%c0_2, %c0_3] : memref<16x256xbf16, #tpu.memory_space<vmem>>, vector<16x256xbf16>
    %c0_4 = arith.constant 0 : index
    %c0_5 = arith.constant 0 : index
    %5 = vector.load %arg4[%c0_4, %c0_5] : memref<256x128xf32, #tpu.memory_space<vmem>>, vector<256x128xf32>
    %6 = arith.truncf %5 : vector<256x128xf32> to vector<256x128xbf16>
    %cst = arith.constant dense<0.000000e+00> : vector<16x128xf32>
    %7 = tpu.matmul %4, %6, %cst {dimension_numbers = #tpu.dot_dimension_numbers<[1], [0], [0], [1], [0, 0, 1, 1], [], []>} : vector<16x256xbf16>, vector<256x128xbf16>, vector<16x128xf32> -> vector<16x128xf32>
    %8 = arith.addf %3, %7 : vector<16x128xf32>
    %c0_6 = arith.constant 0 : index
    %c0_7 = arith.constant 0 : index
    %9 = vector.load %arg7[%c0_6, %c0_7] : memref<16x128xf32, #tpu.memory_space<vmem>>, vector<16x128xf32>
    tpu.vector_store %arg7[%c0_6, %c0_7], %8 {strides = array<i32>} : memref<16x128xf32, #tpu.memory_space<vmem>>, vector<16x128xf32>,
    %c0_i32_8 = arith.constant 0 : i32
    %10 = arith.cmpi eq, %arg2, %c0_i32_8 : i32
    %11 = arith.extui %10 : i1 to i32
    %c0_i32_9 = arith.constant 0 : i32
    %12 = arith.cmpi ne, %11, %c0_i32_9 : i32
    scf.if %12 {
      %c0_10 = arith.constant 0 : index
      %c0_11 = arith.constant 0 : index
      %13 = vector.load %arg7[%c0_10, %c0_11] : memref<16x128xf32, #tpu.memory_space<vmem>>, vector<16x128xf32>
      %c0_12 = arith.constant 0 : index
      %c0_13 = arith.constant 0 : index
      %14 = vector.load %arg5[%c0_12, %c0_13] : memref<16x1xf32, #tpu.memory_space<vmem>>, vector<16x1xf32>
      %15 = vector.broadcast %14 : vector<16x1xf32> to vector<16x128xf32>
      %16 = arith.addf %13, %15 : vector<16x128xf32>
      %c0_14 = arith.constant 0 : index
      %c0_15 = arith.constant 0 : index
      %17 = vector.load %arg6[%c0_14, %c0_15] : memref<16x128xf32, #tpu.memory_space<vmem>>, vector<16x128xf32>
      tpu.vector_store %arg6[%c0_14, %c0_15], %16 {strides = array<i32>} : memref<16x128xf32, #tpu.memory_space<vmem>>, vector<16x128xf32>,
    } else {
    }
    return
  }
  func.func @transform_0(%arg0: i32, %arg1: i32, %arg2: i32) -> (i32, i32) {
    %c0_i32 = arith.constant 0 : i32
    return %arg0, %arg2 : i32, i32
  }
  func.func @transform_1(%arg0: i32, %arg1: i32, %arg2: i32) -> (i32, i32) {
    %c0_i32 = arith.constant 0 : i32
    return %arg2, %arg1 : i32, i32
  }
  func.func @transform_2(%arg0: i32, %arg1: i32, %arg2: i32) -> (i32, i32) {
    %c0_i32 = arith.constant 0 : i32
    %c0_i32_0 = arith.constant 0 : i32
    return %arg0, %c0_i32 : i32, i32
  }
  func.func @transform_3(%arg0: i32, %arg1: i32, %arg2: i32) -> (i32, i32) {
    %c0_i32 = arith.constant 0 : i32
    return %arg0, %arg1 : i32, i32
  }
}

module attributes {stable_mosaic.version = 11 : i64} {
  func.func @_gn_kernel(%arg0: i32, %arg1: memref<1x2x2x64xf32, #tpu.memory_space<vmem>>, %arg2: memref<1x2x1x1xf32, #tpu.memory_space<vmem>>, %arg3: memref<1x2x1x1xf32, #tpu.memory_space<vmem>>, %arg4: memref<1x2x2x64xf32, #tpu.memory_space<vmem>>) attributes {dimension_semantics = [#tpu.dimension_semantics<parallel>], iteration_bounds = array<i64: 8>, scalar_prefetch = 0 : i64, scratch_operands = 0 : i64, tpu.core_type = #tpu.core_type<tc>, window_params = [{transform_indices = @transform_0, window_bounds = array<i64: 1, 2, 2, 64>}, {transform_indices = @transform_1, window_bounds = array<i64: 1, 2, 1, 1>}, {transform_indices = @transform_2, window_bounds = array<i64: 1, 2, 1, 1>}, {transform_indices = @transform_3, window_bounds = array<i64: 1, 2, 2, 64>}]} {
    %c0 = arith.constant 0 : index
    %c0_0 = arith.constant 0 : index
    %c0_1 = arith.constant 0 : index
    %c0_2 = arith.constant 0 : index
    %0 = vector.load %arg1[%c0, %c0_0, %c0_1, %c0_2] : memref<1x2x2x64xf32, #tpu.memory_space<vmem>>, vector<1x2x2x64xf32>
    %1 = vector.shape_cast %0 : vector<1x2x2x64xf32> to vector<2x2x64xf32>
    %cst = arith.constant dense<0.000000e+00> : vector<2x2xf32>
    %2 = vector.multi_reduction <add>, %1, %cst [2] : vector<2x2x64xf32> to vector<2x2xf32>
    %3 = vector.shape_cast %2 : vector<2x2xf32> to vector<2x2x1xf32>
    %cst_3 = arith.constant dense<0.000000e+00> : vector<2x1xf32>
    %4 = vector.multi_reduction <add>, %3, %cst_3 [0] : vector<2x2x1xf32> to vector<2x1xf32>
    %5 = vector.shape_cast %4 : vector<2x1xf32> to vector<1x2x1xf32>
    %cst_4 = arith.constant 7.812500e-03 : f32
    %6 = vector.broadcast %cst_4 : f32 to vector<1x2x1xf32>
    %7 = arith.mulf %5, %6 : vector<1x2x1xf32>
    %8 = vector.broadcast %7 : vector<1x2x1xf32> to vector<2x2x64xf32>
    %9 = arith.subf %1, %8 : vector<2x2x64xf32>
    %10 = arith.mulf %9, %9 : vector<2x2x64xf32>
    %cst_5 = arith.constant dense<0.000000e+00> : vector<2x2xf32>
    %11 = vector.multi_reduction <add>, %10, %cst_5 [2] : vector<2x2x64xf32> to vector<2x2xf32>
    %12 = vector.shape_cast %11 : vector<2x2xf32> to vector<2x2x1xf32>
    %cst_6 = arith.constant dense<0.000000e+00> : vector<2x1xf32>
    %13 = vector.multi_reduction <add>, %12, %cst_6 [0] : vector<2x2x1xf32> to vector<2x1xf32>
    %14 = vector.shape_cast %13 : vector<2x1xf32> to vector<1x2x1xf32>
    %cst_7 = arith.constant 7.812500e-03 : f32
    %15 = vector.broadcast %cst_7 : f32 to vector<1x2x1xf32>
    %16 = arith.mulf %14, %15 : vector<1x2x1xf32>
    %cst_8 = arith.constant 9.99999997E-7 : f32
    %17 = vector.broadcast %cst_8 : f32 to vector<1x2x1xf32>
    %18 = arith.addf %16, %17 : vector<1x2x1xf32>
    %19 = math.rsqrt %18 : vector<1x2x1xf32>
    %20 = vector.broadcast %19 : vector<1x2x1xf32> to vector<2x2x64xf32>
    %21 = arith.mulf %9, %20 : vector<2x2x64xf32>
    %c0_9 = arith.constant 0 : index
    %c0_10 = arith.constant 0 : index
    %c0_11 = arith.constant 0 : index
    %c0_12 = arith.constant 0 : index
    %22 = vector.load %arg2[%c0_9, %c0_10, %c0_11, %c0_12] : memref<1x2x1x1xf32, #tpu.memory_space<vmem>>, vector<1x2x1x1xf32>
    %23 = vector.shape_cast %22 : vector<1x2x1x1xf32> to vector<2x1x1xf32>
    %24 = vector.broadcast %23 : vector<2x1x1xf32> to vector<2x2x64xf32>
    %25 = arith.mulf %21, %24 : vector<2x2x64xf32>
    %c0_13 = arith.constant 0 : index
    %c0_14 = arith.constant 0 : index
    %c0_15 = arith.constant 0 : index
    %c0_16 = arith.constant 0 : index
    %26 = vector.load %arg3[%c0_13, %c0_14, %c0_15, %c0_16] : memref<1x2x1x1xf32, #tpu.memory_space<vmem>>, vector<1x2x1x1xf32>
    %27 = vector.shape_cast %26 : vector<1x2x1x1xf32> to vector<2x1x1xf32>
    %28 = vector.broadcast %27 : vector<2x1x1xf32> to vector<2x2x64xf32>
    %29 = arith.addf %25, %28 : vector<2x2x64xf32>
    %30 = arith.negf %29 : vector<2x2x64xf32>
    %31 = math.exp %30 : vector<2x2x64xf32>
    %cst_17 = arith.constant 1.000000e+00 : f32
    %32 = vector.broadcast %cst_17 : f32 to vector<2x2x64xf32>
    %33 = arith.addf %32, %31 : vector<2x2x64xf32>
    %34 = arith.divf %32, %33 : vector<2x2x64xf32>
    %35 = arith.mulf %29, %34 : vector<2x2x64xf32>
    %c0_18 = arith.constant 0 : index
    %c0_19 = arith.constant 0 : index
    %c0_20 = arith.constant 0 : index
    %c0_21 = arith.constant 0 : index
    %36 = vector.load %arg4[%c0_18, %c0_19, %c0_20, %c0_21] : memref<1x2x2x64xf32, #tpu.memory_space<vmem>>, vector<1x2x2x64xf32>
    %37 = vector.shape_cast %36 : vector<1x2x2x64xf32> to vector<2x2x64xf32>
    %38 = vector.shape_cast %35 : vector<2x2x64xf32> to vector<1x2x2x64xf32>
    tpu.vector_store %arg4[%c0_18, %c0_19, %c0_20, %c0_21], %38 {strides = array<i32>} : memref<1x2x2x64xf32, #tpu.memory_space<vmem>>, vector<1x2x2x64xf32>,
    return
  }
  func.func @transform_0(%arg0: i32) -> (i32, i32, i32, i32) {
    %c0_i32 = arith.constant 0 : i32
    %c0_i32_0 = arith.constant 0 : i32
    %c0_i32_1 = arith.constant 0 : i32
    %c0_i32_2 = arith.constant 0 : i32
    return %arg0, %c0_i32, %c0_i32_0, %c0_i32_1 : i32, i32, i32, i32
  }
  func.func @transform_1(%arg0: i32) -> (i32, i32, i32, i32) {
    %c0_i32 = arith.constant 0 : i32
    %c0_i32_0 = arith.constant 0 : i32
    %c0_i32_1 = arith.constant 0 : i32
    %c0_i32_2 = arith.constant 0 : i32
    return %arg0, %c0_i32, %c0_i32_0, %c0_i32_1 : i32, i32, i32, i32
  }
  func.func @transform_2(%arg0: i32) -> (i32, i32, i32, i32) {
    %c0_i32 = arith.constant 0 : i32
    %c0_i32_0 = arith.constant 0 : i32
    %c0_i32_1 = arith.constant 0 : i32
    %c0_i32_2 = arith.constant 0 : i32
    return %arg0, %c0_i32, %c0_i32_0, %c0_i32_1 : i32, i32, i32, i32
  }
  func.func @transform_3(%arg0: i32) -> (i32, i32, i32, i32) {
    %c0_i32 = arith.constant 0 : i32
    %c0_i32_0 = arith.constant 0 : i32
    %c0_i32_1 = arith.constant 0 : i32
    %c0_i32_2 = arith.constant 0 : i32
    return %arg0, %c0_i32, %c0_i32_0, %c0_i32_1 : i32, i32, i32, i32
  }
}

module attributes {stable_mosaic.version = 11 : i64} {
  func.func @_gemm_kernel(%arg0: i32, %arg1: i32, %arg2: i32, %arg3: memref<32x256xbf16, #tpu.memory_space<vmem>>, %arg4: memref<256x128xf32, #tpu.memory_space<vmem>>, %arg5: memref<32x1xf32, #tpu.memory_space<vmem>>, %arg6: memref<32x128xf32, #tpu.memory_space<vmem>>, %arg7: memref<32x128xf32, #tpu.memory_space<vmem>>) attributes {dimension_semantics = [#tpu.dimension_semantics<parallel>, #tpu.dimension_semantics<parallel>, #tpu.dimension_semantics<arbitrary>], iteration_bounds = array<i64: 1, 1, 1>, scalar_prefetch = 0 : i64, scratch_operands = 1 : i64, tpu.core_type = #tpu.core_type<tc>, window_params = [{transform_indices = @transform_0, window_bounds = array<i64: 32, 256>}, {transform_indices = @transform_1, window_bounds = array<i64: 256, 128>}, {transform_indices = @transform_2, window_bounds = array<i64: 32, 1>}, {transform_indices = @transform_3, window_bounds = array<i64: 32, 128>}]} {
    %c0_i32 = arith.constant 0 : i32
    %0 = arith.cmpi eq, %arg2, %c0_i32 : i32
    %1 = arith.extui %0 : i1 to i32
    %c0_i32_0 = arith.constant 0 : i32
    %2 = arith.cmpi ne, %1, %c0_i32_0 : i32
    scf.if %2 {
      %cst_10 = arith.constant 0.000000e+00 : f32
      %13 = vector.broadcast %cst_10 : f32 to vector<32x128xf32>
      %c0_11 = arith.constant 0 : index
      %c0_12 = arith.constant 0 : index
      %14 = vector.load %arg7[%c0_11, %c0_12] : memref<32x128xf32, #tpu.memory_space<vmem>>, vector<32x128xf32>
      tpu.vector_store %arg7[%c0_11, %c0_12], %13 {strides = array<i32>} : memref<32x128xf32, #tpu.memory_space<vmem>>, vector<32x128xf32>,
    } else {
    }
    %c0 = arith.constant 0 : index
    %c0_1 = arith.constant 0 : index
    %3 = vector.load %arg7[%c0, %c0_1] : memref<32x128xf32, #tpu.memory_space<vmem>>, vector<32x128xf32>
    %c0_2 = arith.constant 0 : index
    %c0_3 = arith.constant 0 : index
    %4 = vector.load %arg3[%c0_2, %c0_3] : memref<32x256xbf16, #tpu.memory_space<vmem>>, vector<32x256xbf16>
    %c0_4 = arith.constant 0 : index
    %c0_5 = arith.constant 0 : index
    %5 = vector.load %arg4[%c0_4, %c0_5] : memref<256x128xf32, #tpu.memory_space<vmem>>, vector<256x128xf32>
    %6 = arith.truncf %5 : vector<256x128xf32> to vector<256x128xbf16>
    %cst = arith.constant dense<0.000000e+00> : vector<32x128xf32>
    %7 = tpu.matmul %4, %6, %cst {dimension_numbers = #tpu.dot_dimension_numbers<[1], [0], [0], [1], [0, 0, 1, 1], [], []>} : vector<32x256xbf16>, vector<256x128xbf16>, vector<32x128xf32> -> vector<32x128xf32>
    %8 = arith.addf %3, %7 : vector<32x128xf32>
    %c0_6 = arith.constant 0 : index
    %c0_7 = arith.constant 0 : index
    %9 = vector.load %arg7[%c0_6, %c0_7] : memref<32x128xf32, #tpu.memory_space<vmem>>, vector<32x128xf32>
    tpu.vector_store %arg7[%c0_6, %c0_7], %8 {strides = array<i32>} : memref<32x128xf32, #tpu.memory_space<vmem>>, vector<32x128xf32>,
    %c0_i32_8 = arith.constant 0 : i32
    %10 = arith.cmpi eq, %arg2, %c0_i32_8 : i32
    %11 = arith.extui %10 : i1 to i32
    %c0_i32_9 = arith.constant 0 : i32
    %12 = arith.cmpi ne, %11, %c0_i32_9 : i32
    scf.if %12 {
      %c0_10 = arith.constant 0 : index
      %c0_11 = arith.constant 0 : index
      %13 = vector.load %arg7[%c0_10, %c0_11] : memref<32x128xf32, #tpu.memory_space<vmem>>, vector<32x128xf32>
      %c0_12 = arith.constant 0 : index
      %c0_13 = arith.constant 0 : index
      %14 = vector.load %arg5[%c0_12, %c0_13] : memref<32x1xf32, #tpu.memory_space<vmem>>, vector<32x1xf32>
      %15 = vector.broadcast %14 : vector<32x1xf32> to vector<32x128xf32>
      %16 = arith.addf %13, %15 : vector<32x128xf32>
      %c0_14 = arith.constant 0 : index
      %c0_15 = arith.constant 0 : index
      %17 = vector.load %arg6[%c0_14, %c0_15] : memref<32x128xf32, #tpu.memory_space<vmem>>, vector<32x128xf32>
      tpu.vector_store %arg6[%c0_14, %c0_15], %16 {strides = array<i32>} : memref<32x128xf32, #tpu.memory_space<vmem>>, vector<32x128xf32>,
    } else {
    }
    return
  }
  func.func @transform_0(%arg0: i32, %arg1: i32, %arg2: i32) -> (i32, i32) {
    %c0_i32 = arith.constant 0 : i32
    return %arg0, %arg2 : i32, i32
  }
  func.func @transform_1(%arg0: i32, %arg1: i32, %arg2: i32) -> (i32, i32) {
    %c0_i32 = arith.constant 0 : i32
    return %arg2, %arg1 : i32, i32
  }
  func.func @transform_2(%arg0: i32, %arg1: i32, %arg2: i32) -> (i32, i32) {
    %c0_i32 = arith.constant 0 : i32
    %c0_i32_0 = arith.constant 0 : i32
    return %arg0, %c0_i32 : i32, i32
  }
  func.func @transform_3(%arg0: i32, %arg1: i32, %arg2: i32) -> (i32, i32) {
    %c0_i32 = arith.constant 0 : i32
    return %arg0, %arg1 : i32, i32
  }
}

module attributes {stable_mosaic.version = 11 : i64} {
  func.func @_gn_kernel(%arg0: i32, %arg1: memref<1x4x2x64xf32, #tpu.memory_space<vmem>>, %arg2: memref<1x4x1x1xf32, #tpu.memory_space<vmem>>, %arg3: memref<1x4x1x1xf32, #tpu.memory_space<vmem>>, %arg4: memref<1x4x2x64xf32, #tpu.memory_space<vmem>>) attributes {dimension_semantics = [#tpu.dimension_semantics<parallel>], iteration_bounds = array<i64: 8>, scalar_prefetch = 0 : i64, scratch_operands = 0 : i64, tpu.core_type = #tpu.core_type<tc>, window_params = [{transform_indices = @transform_0, window_bounds = array<i64: 1, 4, 2, 64>}, {transform_indices = @transform_1, window_bounds = array<i64: 1, 4, 1, 1>}, {transform_indices = @transform_2, window_bounds = array<i64: 1, 4, 1, 1>}, {transform_indices = @transform_3, window_bounds = array<i64: 1, 4, 2, 64>}]} {
    %c0 = arith.constant 0 : index
    %c0_0 = arith.constant 0 : index
    %c0_1 = arith.constant 0 : index
    %c0_2 = arith.constant 0 : index
    %0 = vector.load %arg1[%c0, %c0_0, %c0_1, %c0_2] : memref<1x4x2x64xf32, #tpu.memory_space<vmem>>, vector<1x4x2x64xf32>
    %1 = vector.shape_cast %0 : vector<1x4x2x64xf32> to vector<4x2x64xf32>
    %cst = arith.constant dense<0.000000e+00> : vector<4x2xf32>
    %2 = vector.multi_reduction <add>, %1, %cst [2] : vector<4x2x64xf32> to vector<4x2xf32>
    %3 = vector.shape_cast %2 : vector<4x2xf32> to vector<4x2x1xf32>
    %cst_3 = arith.constant dense<0.000000e+00> : vector<2x1xf32>
    %4 = vector.multi_reduction <add>, %3, %cst_3 [0] : vector<4x2x1xf32> to vector<2x1xf32>
    %5 = vector.shape_cast %4 : vector<2x1xf32> to vector<1x2x1xf32>
    %cst_4 = arith.constant 3.906250e-03 : f32
    %6 = vector.broadcast %cst_4 : f32 to vector<1x2x1xf32>
    %7 = arith.mulf %5, %6 : vector<1x2x1xf32>
    %8 = vector.broadcast %7 : vector<1x2x1xf32> to vector<4x2x64xf32>
    %9 = arith.subf %1, %8 : vector<4x2x64xf32>
    %10 = arith.mulf %9, %9 : vector<4x2x64xf32>
    %cst_5 = arith.constant dense<0.000000e+00> : vector<4x2xf32>
    %11 = vector.multi_reduction <add>, %10, %cst_5 [2] : vector<4x2x64xf32> to vector<4x2xf32>
    %12 = vector.shape_cast %11 : vector<4x2xf32> to vector<4x2x1xf32>
    %cst_6 = arith.constant dense<0.000000e+00> : vector<2x1xf32>
    %13 = vector.multi_reduction <add>, %12, %cst_6 [0] : vector<4x2x1xf32> to vector<2x1xf32>
    %14 = vector.shape_cast %13 : vector<2x1xf32> to vector<1x2x1xf32>
    %cst_7 = arith.constant 3.906250e-03 : f32
    %15 = vector.broadcast %cst_7 : f32 to vector<1x2x1xf32>
    %16 = arith.mulf %14, %15 : vector<1x2x1xf32>
    %cst_8 = arith.constant 9.99999997E-7 : f32
    %17 = vector.broadcast %cst_8 : f32 to vector<1x2x1xf32>
    %18 = arith.addf %16, %17 : vector<1x2x1xf32>
    %19 = math.rsqrt %18 : vector<1x2x1xf32>
    %20 = vector.broadcast %19 : vector<1x2x1xf32> to vector<4x2x64xf32>
    %21 = arith.mulf %9, %20 : vector<4x2x64xf32>
    %c0_9 = arith.constant 0 : index
    %c0_10 = arith.constant 0 : index
    %c0_11 = arith.constant 0 : index
    %c0_12 = arith.constant 0 : index
    %22 = vector.load %arg2[%c0_9, %c0_10, %c0_11, %c0_12] : memref<1x4x1x1xf32, #tpu.memory_space<vmem>>, vector<1x4x1x1xf32>
    %23 = vector.shape_cast %22 : vector<1x4x1x1xf32> to vector<4x1x1xf32>
    %24 = vector.broadcast %23 : vector<4x1x1xf32> to vector<4x2x64xf32>
    %25 = arith.mulf %21, %24 : vector<4x2x64xf32>
    %c0_13 = arith.constant 0 : index
    %c0_14 = arith.constant 0 : index
    %c0_15 = arith.constant 0 : index
    %c0_16 = arith.constant 0 : index
    %26 = vector.load %arg3[%c0_13, %c0_14, %c0_15, %c0_16] : memref<1x4x1x1xf32, #tpu.memory_space<vmem>>, vector<1x4x1x1xf32>
    %27 = vector.shape_cast %26 : vector<1x4x1x1xf32> to vector<4x1x1xf32>
    %28 = vector.broadcast %27 : vector<4x1x1xf32> to vector<4x2x64xf32>
    %29 = arith.addf %25, %28 : vector<4x2x64xf32>
    %30 = arith.negf %29 : vector<4x2x64xf32>
    %31 = math.exp %30 : vector<4x2x64xf32>
    %cst_17 = arith.constant 1.000000e+00 : f32
    %32 = vector.broadcast %cst_17 : f32 to vector<4x2x64xf32>
    %33 = arith.addf %32, %31 : vector<4x2x64xf32>
    %34 = arith.divf %32, %33 : vector<4x2x64xf32>
    %35 = arith.mulf %29, %34 : vector<4x2x64xf32>
    %c0_18 = arith.constant 0 : index
    %c0_19 = arith.constant 0 : index
    %c0_20 = arith.constant 0 : index
    %c0_21 = arith.constant 0 : index
    %36 = vector.load %arg4[%c0_18, %c0_19, %c0_20, %c0_21] : memref<1x4x2x64xf32, #tpu.memory_space<vmem>>, vector<1x4x2x64xf32>
    %37 = vector.shape_cast %36 : vector<1x4x2x64xf32> to vector<4x2x64xf32>
    %38 = vector.shape_cast %35 : vector<4x2x64xf32> to vector<1x4x2x64xf32>
    tpu.vector_store %arg4[%c0_18, %c0_19, %c0_20, %c0_21], %38 {strides = array<i32>} : memref<1x4x2x64xf32, #tpu.memory_space<vmem>>, vector<1x4x2x64xf32>,
    return
  }
  func.func @transform_0(%arg0: i32) -> (i32, i32, i32, i32) {
    %c0_i32 = arith.constant 0 : i32
    %c0_i32_0 = arith.constant 0 : i32
    %c0_i32_1 = arith.constant 0 : i32
    %c0_i32_2 = arith.constant 0 : i32
    return %arg0, %c0_i32, %c0_i32_0, %c0_i32_1 : i32, i32, i32, i32
  }
  func.func @transform_1(%arg0: i32) -> (i32, i32, i32, i32) {
    %c0_i32 = arith.constant 0 : i32
    %c0_i32_0 = arith.constant 0 : i32
    %c0_i32_1 = arith.constant 0 : i32
    %c0_i32_2 = arith.constant 0 : i32
    return %arg0, %c0_i32, %c0_i32_0, %c0_i32_1 : i32, i32, i32, i32
  }
  func.func @transform_2(%arg0: i32) -> (i32, i32, i32, i32) {
    %c0_i32 = arith.constant 0 : i32
    %c0_i32_0 = arith.constant 0 : i32
    %c0_i32_1 = arith.constant 0 : i32
    %c0_i32_2 = arith.constant 0 : i32
    return %arg0, %c0_i32, %c0_i32_0, %c0_i32_1 : i32, i32, i32, i32
  }
  func.func @transform_3(%arg0: i32) -> (i32, i32, i32, i32) {
    %c0_i32 = arith.constant 0 : i32
    %c0_i32_0 = arith.constant 0 : i32
    %c0_i32_1 = arith.constant 0 : i32
    %c0_i32_2 = arith.constant 0 : i32
    return %arg0, %c0_i32, %c0_i32_0, %c0_i32_1 : i32, i32, i32, i32
  }
}

module attributes {stable_mosaic.version = 11 : i64} {
  func.func @_gemm_res_kernel(%arg0: i32, %arg1: i32, %arg2: i32, %arg3: memref<32x384xbf16, #tpu.memory_space<vmem>>, %arg4: memref<384x128xf32, #tpu.memory_space<vmem>>, %arg5: memref<32x1xf32, #tpu.memory_space<vmem>>, %arg6: memref<32x128xf32, #tpu.memory_space<vmem>>, %arg7: memref<32x128xf32, #tpu.memory_space<vmem>>, %arg8: memref<32x128xf32, #tpu.memory_space<vmem>>) attributes {dimension_semantics = [#tpu.dimension_semantics<parallel>, #tpu.dimension_semantics<parallel>, #tpu.dimension_semantics<arbitrary>], iteration_bounds = array<i64: 1, 1, 1>, scalar_prefetch = 0 : i64, scratch_operands = 1 : i64, tpu.core_type = #tpu.core_type<tc>, window_params = [{transform_indices = @transform_0, window_bounds = array<i64: 32, 384>}, {transform_indices = @transform_1, window_bounds = array<i64: 384, 128>}, {transform_indices = @transform_2, window_bounds = array<i64: 32, 1>}, {transform_indices = @transform_3, window_bounds = array<i64: 32, 128>}, {transform_indices = @transform_4, window_bounds = array<i64: 32, 128>}]} {
    %c0_i32 = arith.constant 0 : i32
    %0 = arith.cmpi eq, %arg2, %c0_i32 : i32
    %1 = arith.extui %0 : i1 to i32
    %c0_i32_0 = arith.constant 0 : i32
    %2 = arith.cmpi ne, %1, %c0_i32_0 : i32
    scf.if %2 {
      %cst_10 = arith.constant 0.000000e+00 : f32
      %13 = vector.broadcast %cst_10 : f32 to vector<32x128xf32>
      %c0_11 = arith.constant 0 : index
      %c0_12 = arith.constant 0 : index
      %14 = vector.load %arg8[%c0_11, %c0_12] : memref<32x128xf32, #tpu.memory_space<vmem>>, vector<32x128xf32>
      tpu.vector_store %arg8[%c0_11, %c0_12], %13 {strides = array<i32>} : memref<32x128xf32, #tpu.memory_space<vmem>>, vector<32x128xf32>,
    } else {
    }
    %c0 = arith.constant 0 : index
    %c0_1 = arith.constant 0 : index
    %3 = vector.load %arg8[%c0, %c0_1] : memref<32x128xf32, #tpu.memory_space<vmem>>, vector<32x128xf32>
    %c0_2 = arith.constant 0 : index
    %c0_3 = arith.constant 0 : index
    %4 = vector.load %arg3[%c0_2, %c0_3] : memref<32x384xbf16, #tpu.memory_space<vmem>>, vector<32x384xbf16>
    %c0_4 = arith.constant 0 : index
    %c0_5 = arith.constant 0 : index
    %5 = vector.load %arg4[%c0_4, %c0_5] : memref<384x128xf32, #tpu.memory_space<vmem>>, vector<384x128xf32>
    %6 = arith.truncf %5 : vector<384x128xf32> to vector<384x128xbf16>
    %cst = arith.constant dense<0.000000e+00> : vector<32x128xf32>
    %7 = tpu.matmul %4, %6, %cst {dimension_numbers = #tpu.dot_dimension_numbers<[1], [0], [0], [1], [0, 0, 1, 1], [], []>} : vector<32x384xbf16>, vector<384x128xbf16>, vector<32x128xf32> -> vector<32x128xf32>
    %8 = arith.addf %3, %7 : vector<32x128xf32>
    %c0_6 = arith.constant 0 : index
    %c0_7 = arith.constant 0 : index
    %9 = vector.load %arg8[%c0_6, %c0_7] : memref<32x128xf32, #tpu.memory_space<vmem>>, vector<32x128xf32>
    tpu.vector_store %arg8[%c0_6, %c0_7], %8 {strides = array<i32>} : memref<32x128xf32, #tpu.memory_space<vmem>>, vector<32x128xf32>,
    %c0_i32_8 = arith.constant 0 : i32
    %10 = arith.cmpi eq, %arg2, %c0_i32_8 : i32
    %11 = arith.extui %10 : i1 to i32
    %c0_i32_9 = arith.constant 0 : i32
    %12 = arith.cmpi ne, %11, %c0_i32_9 : i32
    scf.if %12 {
      %c0_10 = arith.constant 0 : index
      %c0_11 = arith.constant 0 : index
      %13 = vector.load %arg8[%c0_10, %c0_11] : memref<32x128xf32, #tpu.memory_space<vmem>>, vector<32x128xf32>
      %c0_12 = arith.constant 0 : index
      %c0_13 = arith.constant 0 : index
      %14 = vector.load %arg5[%c0_12, %c0_13] : memref<32x1xf32, #tpu.memory_space<vmem>>, vector<32x1xf32>
      %15 = vector.broadcast %14 : vector<32x1xf32> to vector<32x128xf32>
      %16 = arith.addf %13, %15 : vector<32x128xf32>
      %c0_14 = arith.constant 0 : index
      %c0_15 = arith.constant 0 : index
      %17 = vector.load %arg6[%c0_14, %c0_15] : memref<32x128xf32, #tpu.memory_space<vmem>>, vector<32x128xf32>
      %18 = arith.addf %16, %17 : vector<32x128xf32>
      %c0_16 = arith.constant 0 : index
      %c0_17 = arith.constant 0 : index
      %19 = vector.load %arg7[%c0_16, %c0_17] : memref<32x128xf32, #tpu.memory_space<vmem>>, vector<32x128xf32>
      tpu.vector_store %arg7[%c0_16, %c0_17], %18 {strides = array<i32>} : memref<32x128xf32, #tpu.memory_space<vmem>>, vector<32x128xf32>,
    } else {
    }
    return
  }
  func.func @transform_0(%arg0: i32, %arg1: i32, %arg2: i32) -> (i32, i32) {
    %c0_i32 = arith.constant 0 : i32
    return %arg0, %arg2 : i32, i32
  }
  func.func @transform_1(%arg0: i32, %arg1: i32, %arg2: i32) -> (i32, i32) {
    %c0_i32 = arith.constant 0 : i32
    return %arg2, %arg1 : i32, i32
  }
  func.func @transform_2(%arg0: i32, %arg1: i32, %arg2: i32) -> (i32, i32) {
    %c0_i32 = arith.constant 0 : i32
    %c0_i32_0 = arith.constant 0 : i32
    return %arg0, %c0_i32 : i32, i32
  }
  func.func @transform_3(%arg0: i32, %arg1: i32, %arg2: i32) -> (i32, i32) {
    %c0_i32 = arith.constant 0 : i32
    return %arg0, %arg1 : i32, i32
  }
  func.func @transform_4(%arg0: i32, %arg1: i32, %arg2: i32) -> (i32, i32) {
    %c0_i32 = arith.constant 0 : i32
    return %arg0, %arg1 : i32, i32
  }
}

module attributes {stable_mosaic.version = 11 : i64} {
  func.func @_gn_kernel(%arg0: i32, %arg1: memref<1x4x2x64xf32, #tpu.memory_space<vmem>>, %arg2: memref<1x4x1x1xf32, #tpu.memory_space<vmem>>, %arg3: memref<1x4x1x1xf32, #tpu.memory_space<vmem>>, %arg4: memref<1x4x2x64xf32, #tpu.memory_space<vmem>>) attributes {dimension_semantics = [#tpu.dimension_semantics<parallel>], iteration_bounds = array<i64: 8>, scalar_prefetch = 0 : i64, scratch_operands = 0 : i64, tpu.core_type = #tpu.core_type<tc>, window_params = [{transform_indices = @transform_0, window_bounds = array<i64: 1, 4, 2, 64>}, {transform_indices = @transform_1, window_bounds = array<i64: 1, 4, 1, 1>}, {transform_indices = @transform_2, window_bounds = array<i64: 1, 4, 1, 1>}, {transform_indices = @transform_3, window_bounds = array<i64: 1, 4, 2, 64>}]} {
    %c0 = arith.constant 0 : index
    %c0_0 = arith.constant 0 : index
    %c0_1 = arith.constant 0 : index
    %c0_2 = arith.constant 0 : index
    %0 = vector.load %arg1[%c0, %c0_0, %c0_1, %c0_2] : memref<1x4x2x64xf32, #tpu.memory_space<vmem>>, vector<1x4x2x64xf32>
    %1 = vector.shape_cast %0 : vector<1x4x2x64xf32> to vector<4x2x64xf32>
    %cst = arith.constant dense<0.000000e+00> : vector<4x2xf32>
    %2 = vector.multi_reduction <add>, %1, %cst [2] : vector<4x2x64xf32> to vector<4x2xf32>
    %3 = vector.shape_cast %2 : vector<4x2xf32> to vector<4x2x1xf32>
    %cst_3 = arith.constant dense<0.000000e+00> : vector<2x1xf32>
    %4 = vector.multi_reduction <add>, %3, %cst_3 [0] : vector<4x2x1xf32> to vector<2x1xf32>
    %5 = vector.shape_cast %4 : vector<2x1xf32> to vector<1x2x1xf32>
    %cst_4 = arith.constant 3.906250e-03 : f32
    %6 = vector.broadcast %cst_4 : f32 to vector<1x2x1xf32>
    %7 = arith.mulf %5, %6 : vector<1x2x1xf32>
    %8 = vector.broadcast %7 : vector<1x2x1xf32> to vector<4x2x64xf32>
    %9 = arith.subf %1, %8 : vector<4x2x64xf32>
    %10 = arith.mulf %9, %9 : vector<4x2x64xf32>
    %cst_5 = arith.constant dense<0.000000e+00> : vector<4x2xf32>
    %11 = vector.multi_reduction <add>, %10, %cst_5 [2] : vector<4x2x64xf32> to vector<4x2xf32>
    %12 = vector.shape_cast %11 : vector<4x2xf32> to vector<4x2x1xf32>
    %cst_6 = arith.constant dense<0.000000e+00> : vector<2x1xf32>
    %13 = vector.multi_reduction <add>, %12, %cst_6 [0] : vector<4x2x1xf32> to vector<2x1xf32>
    %14 = vector.shape_cast %13 : vector<2x1xf32> to vector<1x2x1xf32>
    %cst_7 = arith.constant 3.906250e-03 : f32
    %15 = vector.broadcast %cst_7 : f32 to vector<1x2x1xf32>
    %16 = arith.mulf %14, %15 : vector<1x2x1xf32>
    %cst_8 = arith.constant 9.99999997E-7 : f32
    %17 = vector.broadcast %cst_8 : f32 to vector<1x2x1xf32>
    %18 = arith.addf %16, %17 : vector<1x2x1xf32>
    %19 = math.rsqrt %18 : vector<1x2x1xf32>
    %20 = vector.broadcast %19 : vector<1x2x1xf32> to vector<4x2x64xf32>
    %21 = arith.mulf %9, %20 : vector<4x2x64xf32>
    %c0_9 = arith.constant 0 : index
    %c0_10 = arith.constant 0 : index
    %c0_11 = arith.constant 0 : index
    %c0_12 = arith.constant 0 : index
    %22 = vector.load %arg2[%c0_9, %c0_10, %c0_11, %c0_12] : memref<1x4x1x1xf32, #tpu.memory_space<vmem>>, vector<1x4x1x1xf32>
    %23 = vector.shape_cast %22 : vector<1x4x1x1xf32> to vector<4x1x1xf32>
    %24 = vector.broadcast %23 : vector<4x1x1xf32> to vector<4x2x64xf32>
    %25 = arith.mulf %21, %24 : vector<4x2x64xf32>
    %c0_13 = arith.constant 0 : index
    %c0_14 = arith.constant 0 : index
    %c0_15 = arith.constant 0 : index
    %c0_16 = arith.constant 0 : index
    %26 = vector.load %arg3[%c0_13, %c0_14, %c0_15, %c0_16] : memref<1x4x1x1xf32, #tpu.memory_space<vmem>>, vector<1x4x1x1xf32>
    %27 = vector.shape_cast %26 : vector<1x4x1x1xf32> to vector<4x1x1xf32>
    %28 = vector.broadcast %27 : vector<4x1x1xf32> to vector<4x2x64xf32>
    %29 = arith.addf %25, %28 : vector<4x2x64xf32>
    %c0_17 = arith.constant 0 : index
    %c0_18 = arith.constant 0 : index
    %c0_19 = arith.constant 0 : index
    %c0_20 = arith.constant 0 : index
    %30 = vector.load %arg4[%c0_17, %c0_18, %c0_19, %c0_20] : memref<1x4x2x64xf32, #tpu.memory_space<vmem>>, vector<1x4x2x64xf32>
    %31 = vector.shape_cast %30 : vector<1x4x2x64xf32> to vector<4x2x64xf32>
    %32 = vector.shape_cast %29 : vector<4x2x64xf32> to vector<1x4x2x64xf32>
    tpu.vector_store %arg4[%c0_17, %c0_18, %c0_19, %c0_20], %32 {strides = array<i32>} : memref<1x4x2x64xf32, #tpu.memory_space<vmem>>, vector<1x4x2x64xf32>,
    return
  }
  func.func @transform_0(%arg0: i32) -> (i32, i32, i32, i32) {
    %c0_i32 = arith.constant 0 : i32
    %c0_i32_0 = arith.constant 0 : i32
    %c0_i32_1 = arith.constant 0 : i32
    %c0_i32_2 = arith.constant 0 : i32
    return %arg0, %c0_i32, %c0_i32_0, %c0_i32_1 : i32, i32, i32, i32
  }
  func.func @transform_1(%arg0: i32) -> (i32, i32, i32, i32) {
    %c0_i32 = arith.constant 0 : i32
    %c0_i32_0 = arith.constant 0 : i32
    %c0_i32_1 = arith.constant 0 : i32
    %c0_i32_2 = arith.constant 0 : i32
    return %arg0, %c0_i32, %c0_i32_0, %c0_i32_1 : i32, i32, i32, i32
  }
  func.func @transform_2(%arg0: i32) -> (i32, i32, i32, i32) {
    %c0_i32 = arith.constant 0 : i32
    %c0_i32_0 = arith.constant 0 : i32
    %c0_i32_1 = arith.constant 0 : i32
    %c0_i32_2 = arith.constant 0 : i32
    return %arg0, %c0_i32, %c0_i32_0, %c0_i32_1 : i32, i32, i32, i32
  }
  func.func @transform_3(%arg0: i32) -> (i32, i32, i32, i32) {
    %c0_i32 = arith.constant 0 : i32
    %c0_i32_0 = arith.constant 0 : i32
    %c0_i32_1 = arith.constant 0 : i32
    %c0_i32_2 = arith.constant 0 : i32
    return %arg0, %c0_i32, %c0_i32_0, %c0_i32_1 : i32, i32, i32, i32
  }
}

module attributes {stable_mosaic.version = 11 : i64} {
  func.func @_gemm_kernel(%arg0: i32, %arg1: i32, %arg2: i32, %arg3: memref<32x128xbf16, #tpu.memory_space<vmem>>, %arg4: memref<128x128xf32, #tpu.memory_space<vmem>>, %arg5: memref<32x1xf32, #tpu.memory_space<vmem>>, %arg6: memref<32x128xf32, #tpu.memory_space<vmem>>, %arg7: memref<32x128xf32, #tpu.memory_space<vmem>>) attributes {dimension_semantics = [#tpu.dimension_semantics<parallel>, #tpu.dimension_semantics<parallel>, #tpu.dimension_semantics<arbitrary>], iteration_bounds = array<i64: 1, 1, 1>, scalar_prefetch = 0 : i64, scratch_operands = 1 : i64, tpu.core_type = #tpu.core_type<tc>, window_params = [{transform_indices = @transform_0, window_bounds = array<i64: 32, 128>}, {transform_indices = @transform_1, window_bounds = array<i64: 128, 128>}, {transform_indices = @transform_2, window_bounds = array<i64: 32, 1>}, {transform_indices = @transform_3, window_bounds = array<i64: 32, 128>}]} {
    %c0_i32 = arith.constant 0 : i32
    %0 = arith.cmpi eq, %arg2, %c0_i32 : i32
    %1 = arith.extui %0 : i1 to i32
    %c0_i32_0 = arith.constant 0 : i32
    %2 = arith.cmpi ne, %1, %c0_i32_0 : i32
    scf.if %2 {
      %cst_10 = arith.constant 0.000000e+00 : f32
      %13 = vector.broadcast %cst_10 : f32 to vector<32x128xf32>
      %c0_11 = arith.constant 0 : index
      %c0_12 = arith.constant 0 : index
      %14 = vector.load %arg7[%c0_11, %c0_12] : memref<32x128xf32, #tpu.memory_space<vmem>>, vector<32x128xf32>
      tpu.vector_store %arg7[%c0_11, %c0_12], %13 {strides = array<i32>} : memref<32x128xf32, #tpu.memory_space<vmem>>, vector<32x128xf32>,
    } else {
    }
    %c0 = arith.constant 0 : index
    %c0_1 = arith.constant 0 : index
    %3 = vector.load %arg7[%c0, %c0_1] : memref<32x128xf32, #tpu.memory_space<vmem>>, vector<32x128xf32>
    %c0_2 = arith.constant 0 : index
    %c0_3 = arith.constant 0 : index
    %4 = vector.load %arg3[%c0_2, %c0_3] : memref<32x128xbf16, #tpu.memory_space<vmem>>, vector<32x128xbf16>
    %c0_4 = arith.constant 0 : index
    %c0_5 = arith.constant 0 : index
    %5 = vector.load %arg4[%c0_4, %c0_5] : memref<128x128xf32, #tpu.memory_space<vmem>>, vector<128x128xf32>
    %6 = arith.truncf %5 : vector<128x128xf32> to vector<128x128xbf16>
    %cst = arith.constant dense<0.000000e+00> : vector<32x128xf32>
    %7 = tpu.matmul %4, %6, %cst {dimension_numbers = #tpu.dot_dimension_numbers<[1], [0], [0], [1], [0, 0, 1, 1], [], []>} : vector<32x128xbf16>, vector<128x128xbf16>, vector<32x128xf32> -> vector<32x128xf32>
    %8 = arith.addf %3, %7 : vector<32x128xf32>
    %c0_6 = arith.constant 0 : index
    %c0_7 = arith.constant 0 : index
    %9 = vector.load %arg7[%c0_6, %c0_7] : memref<32x128xf32, #tpu.memory_space<vmem>>, vector<32x128xf32>
    tpu.vector_store %arg7[%c0_6, %c0_7], %8 {strides = array<i32>} : memref<32x128xf32, #tpu.memory_space<vmem>>, vector<32x128xf32>,
    %c0_i32_8 = arith.constant 0 : i32
    %10 = arith.cmpi eq, %arg2, %c0_i32_8 : i32
    %11 = arith.extui %10 : i1 to i32
    %c0_i32_9 = arith.constant 0 : i32
    %12 = arith.cmpi ne, %11, %c0_i32_9 : i32
    scf.if %12 {
      %c0_10 = arith.constant 0 : index
      %c0_11 = arith.constant 0 : index
      %13 = vector.load %arg7[%c0_10, %c0_11] : memref<32x128xf32, #tpu.memory_space<vmem>>, vector<32x128xf32>
      %c0_12 = arith.constant 0 : index
      %c0_13 = arith.constant 0 : index
      %14 = vector.load %arg5[%c0_12, %c0_13] : memref<32x1xf32, #tpu.memory_space<vmem>>, vector<32x1xf32>
      %15 = vector.broadcast %14 : vector<32x1xf32> to vector<32x128xf32>
      %16 = arith.addf %13, %15 : vector<32x128xf32>
      %c0_14 = arith.constant 0 : index
      %c0_15 = arith.constant 0 : index
      %17 = vector.load %arg6[%c0_14, %c0_15] : memref<32x128xf32, #tpu.memory_space<vmem>>, vector<32x128xf32>
      tpu.vector_store %arg6[%c0_14, %c0_15], %16 {strides = array<i32>} : memref<32x128xf32, #tpu.memory_space<vmem>>, vector<32x128xf32>,
    } else {
    }
    return
  }
  func.func @transform_0(%arg0: i32, %arg1: i32, %arg2: i32) -> (i32, i32) {
    %c0_i32 = arith.constant 0 : i32
    return %arg0, %arg2 : i32, i32
  }
  func.func @transform_1(%arg0: i32, %arg1: i32, %arg2: i32) -> (i32, i32) {
    %c0_i32 = arith.constant 0 : i32
    return %arg2, %arg1 : i32, i32
  }
  func.func @transform_2(%arg0: i32, %arg1: i32, %arg2: i32) -> (i32, i32) {
    %c0_i32 = arith.constant 0 : i32
    %c0_i32_0 = arith.constant 0 : i32
    return %arg0, %c0_i32 : i32, i32
  }
  func.func @transform_3(%arg0: i32, %arg1: i32, %arg2: i32) -> (i32, i32) {
    %c0_i32 = arith.constant 0 : i32
    return %arg0, %arg1 : i32, i32
  }
}

module attributes {stable_mosaic.version = 11 : i64} {
  func.func @_attn_kernel(%arg0: i32, %arg1: i32, %arg2: memref<1x64x32xf32, #tpu.memory_space<vmem>>, %arg3: memref<1x64x32xf32, #tpu.memory_space<vmem>>, %arg4: memref<1x64x32xf32, #tpu.memory_space<vmem>>, %arg5: memref<1x64x32xf32, #tpu.memory_space<vmem>>, %arg6: memref<64x1xf32, #tpu.memory_space<vmem>>, %arg7: memref<64x1xf32, #tpu.memory_space<vmem>>, %arg8: memref<64x32xf32, #tpu.memory_space<vmem>>) attributes {dimension_semantics = [#tpu.dimension_semantics<parallel>, #tpu.dimension_semantics<arbitrary>], iteration_bounds = array<i64: 2, 1>, scalar_prefetch = 0 : i64, scratch_operands = 3 : i64, tpu.core_type = #tpu.core_type<tc>, window_params = [{transform_indices = @transform_0, window_bounds = array<i64: 1, 64, 32>}, {transform_indices = @transform_1, window_bounds = array<i64: 1, 64, 32>}, {transform_indices = @transform_2, window_bounds = array<i64: 1, 64, 32>}, {transform_indices = @transform_3, window_bounds = array<i64: 1, 64, 32>}]} {
    %c0_i32 = arith.constant 0 : i32
    %0 = arith.cmpi eq, %arg1, %c0_i32 : i32
    %1 = arith.extui %0 : i1 to i32
    %c0_i32_0 = arith.constant 0 : i32
    %2 = arith.cmpi ne, %1, %c0_i32_0 : i32
    scf.if %2 {
      %cst_29 = arith.constant 0xFF800000 : f32
      %42 = vector.broadcast %cst_29 : f32 to vector<64x1xf32>
      %c0_30 = arith.constant 0 : index
      %c0_31 = arith.constant 0 : index
      %43 = vector.load %arg6[%c0_30, %c0_31] : memref<64x1xf32, #tpu.memory_space<vmem>>, vector<64x1xf32>
      tpu.vector_store %arg6[%c0_30, %c0_31], %42 {strides = array<i32>} : memref<64x1xf32, #tpu.memory_space<vmem>>, vector<64x1xf32>,
      %cst_32 = arith.constant 0.000000e+00 : f32
      %44 = vector.broadcast %cst_32 : f32 to vector<64x1xf32>
      %c0_33 = arith.constant 0 : index
      %c0_34 = arith.constant 0 : index
      %45 = vector.load %arg7[%c0_33, %c0_34] : memref<64x1xf32, #tpu.memory_space<vmem>>, vector<64x1xf32>
      tpu.vector_store %arg7[%c0_33, %c0_34], %44 {strides = array<i32>} : memref<64x1xf32, #tpu.memory_space<vmem>>, vector<64x1xf32>,
      %cst_35 = arith.constant 0.000000e+00 : f32
      %46 = vector.broadcast %cst_35 : f32 to vector<64x32xf32>
      %c0_36 = arith.constant 0 : index
      %c0_37 = arith.constant 0 : index
      %47 = vector.load %arg8[%c0_36, %c0_37] : memref<64x32xf32, #tpu.memory_space<vmem>>, vector<64x32xf32>
      tpu.vector_store %arg8[%c0_36, %c0_37], %46 {strides = array<i32>} : memref<64x32xf32, #tpu.memory_space<vmem>>, vector<64x32xf32>,
    } else {
    }
    %c0 = arith.constant 0 : index
    %c0_1 = arith.constant 0 : index
    %c0_2 = arith.constant 0 : index
    %3 = vector.load %arg2[%c0, %c0_1, %c0_2] : memref<1x64x32xf32, #tpu.memory_space<vmem>>, vector<1x64x32xf32>
    %4 = vector.shape_cast %3 : vector<1x64x32xf32> to vector<64x32xf32>
    %5 = arith.truncf %4 : vector<64x32xf32> to vector<64x32xbf16>
    %c0_3 = arith.constant 0 : index
    %c0_4 = arith.constant 0 : index
    %c0_5 = arith.constant 0 : index
    %6 = vector.load %arg3[%c0_3, %c0_4, %c0_5] : memref<1x64x32xf32, #tpu.memory_space<vmem>>, vector<1x64x32xf32>
    %7 = vector.shape_cast %6 : vector<1x64x32xf32> to vector<64x32xf32>
    %8 = arith.truncf %7 : vector<64x32xf32> to vector<64x32xbf16>
    %c0_6 = arith.constant 0 : index
    %c0_7 = arith.constant 0 : index
    %c0_8 = arith.constant 0 : index
    %9 = vector.load %arg4[%c0_6, %c0_7, %c0_8] : memref<1x64x32xf32, #tpu.memory_space<vmem>>, vector<1x64x32xf32>
    %10 = vector.shape_cast %9 : vector<1x64x32xf32> to vector<64x32xf32>
    %11 = arith.truncf %10 : vector<64x32xf32> to vector<64x32xbf16>
    %cst = arith.constant dense<0.000000e+00> : vector<64x64xf32>
    %12 = tpu.matmul %5, %8, %cst {dimension_numbers = #tpu.dot_dimension_numbers<[1], [1], [0], [0], [0, 0, 1, 0], [], []>} : vector<64x32xbf16>, vector<64x32xbf16>, vector<64x64xf32> -> vector<64x64xf32>
    %cst_9 = arith.constant 0.176776692 : f32
    %13 = vector.broadcast %cst_9 : f32 to vector<64x64xf32>
    %14 = arith.mulf %12, %13 : vector<64x64xf32>
    %cst_10 = arith.constant dense<0xFF800000> : vector<64xf32>
    %15 = vector.multi_reduction <maximumf>, %14, %cst_10 [1] : vector<64x64xf32> to vector<64xf32>
    %16 = vector.shape_cast %15 : vector<64xf32> to vector<64x1xf32>
    %c0_11 = arith.constant 0 : index
    %c0_12 = arith.constant 0 : index
    %17 = vector.load %arg6[%c0_11, %c0_12] : memref<64x1xf32, #tpu.memory_space<vmem>>, vector<64x1xf32>
    %18 = arith.maximumf %17, %16 : vector<64x1xf32>
    %c0_13 = arith.constant 0 : index
    %c0_14 = arith.constant 0 : index
    %19 = vector.load %arg6[%c0_13, %c0_14] : memref<64x1xf32, #tpu.memory_space<vmem>>, vector<64x1xf32>
    %20 = arith.subf %19, %18 : vector<64x1xf32>
    %21 = math.exp %20 : vector<64x1xf32>
    %22 = vector.broadcast %18 : vector<64x1xf32> to vector<64x64xf32>
    %23 = arith.subf %14, %22 : vector<64x64xf32>
    %24 = math.exp %23 : vector<64x64xf32>
    %c0_15 = arith.constant 0 : index
    %c0_16 = arith.constant 0 : index
    %25 = vector.load %arg7[%c0_15, %c0_16] : memref<64x1xf32, #tpu.memory_space<vmem>>, vector<64x1xf32>
    %26 = arith.mulf %21, %25 : vector<64x1xf32>
    %cst_17 = arith.constant dense<0.000000e+00> : vector<64xf32>
    %27 = vector.multi_reduction <add>, %24, %cst_17 [1] : vector<64x64xf32> to vector<64xf32>
    %28 = vector.shape_cast %27 : vector<64xf32> to vector<64x1xf32>
    %29 = arith.addf %26, %28 : vector<64x1xf32>
    %c0_18 = arith.constant 0 : index
    %c0_19 = arith.constant 0 : index
    %30 = vector.load %arg7[%c0_18, %c0_19] : memref<64x1xf32, #tpu.memory_space<vmem>>, vector<64x1xf32>
    tpu.vector_store %arg7[%c0_18, %c0_19], %29 {strides = array<i32>} : memref<64x1xf32, #tpu.memory_space<vmem>>, vector<64x1xf32>,
    %c0_20 = arith.constant 0 : index
    %c0_21 = arith.constant 0 : index
    %31 = vector.load %arg8[%c0_20, %c0_21] : memref<64x32xf32, #tpu.memory_space<vmem>>, vector<64x32xf32>
    %32 = vector.broadcast %21 : vector<64x1xf32> to vector<64x32xf32>
    %33 = arith.mulf %32, %31 : vector<64x32xf32>
    %34 = arith.truncf %24 : vector<64x64xf32> to vector<64x64xbf16>
    %cst_22 = arith.constant dense<0.000000e+00> : vector<64x32xf32>
    %35 = tpu.matmul %34, %11, %cst_22 {dimension_numbers = #tpu.dot_dimension_numbers<[1], [0], [0], [1], [0, 0, 1, 1], [], []>} : vector<64x64xbf16>, vector<64x32xbf16>, vector<64x32xf32> -> vector<64x32xf32>
    %36 = arith.addf %33, %35 : vector<64x32xf32>
    %c0_23 = arith.constant 0 : index
    %c0_24 = arith.constant 0 : index
    %37 = vector.load %arg8[%c0_23, %c0_24] : memref<64x32xf32, #tpu.memory_space<vmem>>, vector<64x32xf32>
    tpu.vector_store %arg8[%c0_23, %c0_24], %36 {strides = array<i32>} : memref<64x32xf32, #tpu.memory_space<vmem>>, vector<64x32xf32>,
    %c0_25 = arith.constant 0 : index
    %c0_26 = arith.constant 0 : index
    %38 = vector.load %arg6[%c0_25, %c0_26] : memref<64x1xf32, #tpu.memory_space<vmem>>, vector<64x1xf32>
    tpu.vector_store %arg6[%c0_25, %c0_26], %18 {strides = array<i32>} : memref<64x1xf32, #tpu.memory_space<vmem>>, vector<64x1xf32>,
    %c0_i32_27 = arith.constant 0 : i32
    %39 = arith.cmpi eq, %arg1, %c0_i32_27 : i32
    %40 = arith.extui %39 : i1 to i32
    %c0_i32_28 = arith.constant 0 : i32
    %41 = arith.cmpi ne, %40, %c0_i32_28 : i32
    scf.if %41 {
      %c0_29 = arith.constant 0 : index
      %c0_30 = arith.constant 0 : index
      %42 = vector.load %arg8[%c0_29, %c0_30] : memref<64x32xf32, #tpu.memory_space<vmem>>, vector<64x32xf32>
      %c0_31 = arith.constant 0 : index
      %c0_32 = arith.constant 0 : index
      %43 = vector.load %arg7[%c0_31, %c0_32] : memref<64x1xf32, #tpu.memory_space<vmem>>, vector<64x1xf32>
      %44 = tpu.reciprocal %43 {approx = true} : vector<64x1xf32> -> vector<64x1xf32>
      %45 = vector.broadcast %44 : vector<64x1xf32> to vector<64x32xf32>
      %46 = arith.mulf %42, %45 : vector<64x32xf32>
      %c0_33 = arith.constant 0 : index
      %c0_34 = arith.constant 0 : index
      %c0_35 = arith.constant 0 : index
      %47 = vector.load %arg5[%c0_33, %c0_34, %c0_35] : memref<1x64x32xf32, #tpu.memory_space<vmem>>, vector<1x64x32xf32>
      %48 = vector.shape_cast %47 : vector<1x64x32xf32> to vector<64x32xf32>
      %49 = vector.shape_cast %46 : vector<64x32xf32> to vector<1x64x32xf32>
      tpu.vector_store %arg5[%c0_33, %c0_34, %c0_35], %49 {strides = array<i32>} : memref<1x64x32xf32, #tpu.memory_space<vmem>>, vector<1x64x32xf32>,
    } else {
    }
    return
  }
  func.func @transform_0(%arg0: i32, %arg1: i32) -> (i32, i32, i32) {
    %c0_i32 = arith.constant 0 : i32
    %c0_i32_0 = arith.constant 0 : i32
    %c0_i32_1 = arith.constant 0 : i32
    return %arg0, %c0_i32, %c0_i32_0 : i32, i32, i32
  }
  func.func @transform_1(%arg0: i32, %arg1: i32) -> (i32, i32, i32) {
    %c0_i32 = arith.constant 0 : i32
    %c0_i32_0 = arith.constant 0 : i32
    return %arg0, %arg1, %c0_i32 : i32, i32, i32
  }
  func.func @transform_2(%arg0: i32, %arg1: i32) -> (i32, i32, i32) {
    %c0_i32 = arith.constant 0 : i32
    %c0_i32_0 = arith.constant 0 : i32
    return %arg0, %arg1, %c0_i32 : i32, i32, i32
  }
  func.func @transform_3(%arg0: i32, %arg1: i32) -> (i32, i32, i32) {
    %c0_i32 = arith.constant 0 : i32
    %c0_i32_0 = arith.constant 0 : i32
    %c0_i32_1 = arith.constant 0 : i32
    return %arg0, %c0_i32, %c0_i32_0 : i32, i32, i32
  }
}

module attributes {stable_mosaic.version = 11 : i64} {
  func.func @_gemm_res_kernel(%arg0: i32, %arg1: i32, %arg2: i32, %arg3: memref<32x128xbf16, #tpu.memory_space<vmem>>, %arg4: memref<128x128xf32, #tpu.memory_space<vmem>>, %arg5: memref<32x1xf32, #tpu.memory_space<vmem>>, %arg6: memref<32x128xf32, #tpu.memory_space<vmem>>, %arg7: memref<32x128xf32, #tpu.memory_space<vmem>>, %arg8: memref<32x128xf32, #tpu.memory_space<vmem>>) attributes {dimension_semantics = [#tpu.dimension_semantics<parallel>, #tpu.dimension_semantics<parallel>, #tpu.dimension_semantics<arbitrary>], iteration_bounds = array<i64: 1, 1, 1>, scalar_prefetch = 0 : i64, scratch_operands = 1 : i64, tpu.core_type = #tpu.core_type<tc>, window_params = [{transform_indices = @transform_0, window_bounds = array<i64: 32, 128>}, {transform_indices = @transform_1, window_bounds = array<i64: 128, 128>}, {transform_indices = @transform_2, window_bounds = array<i64: 32, 1>}, {transform_indices = @transform_3, window_bounds = array<i64: 32, 128>}, {transform_indices = @transform_4, window_bounds = array<i64: 32, 128>}]} {
    %c0_i32 = arith.constant 0 : i32
    %0 = arith.cmpi eq, %arg2, %c0_i32 : i32
    %1 = arith.extui %0 : i1 to i32
    %c0_i32_0 = arith.constant 0 : i32
    %2 = arith.cmpi ne, %1, %c0_i32_0 : i32
    scf.if %2 {
      %cst_10 = arith.constant 0.000000e+00 : f32
      %13 = vector.broadcast %cst_10 : f32 to vector<32x128xf32>
      %c0_11 = arith.constant 0 : index
      %c0_12 = arith.constant 0 : index
      %14 = vector.load %arg8[%c0_11, %c0_12] : memref<32x128xf32, #tpu.memory_space<vmem>>, vector<32x128xf32>
      tpu.vector_store %arg8[%c0_11, %c0_12], %13 {strides = array<i32>} : memref<32x128xf32, #tpu.memory_space<vmem>>, vector<32x128xf32>,
    } else {
    }
    %c0 = arith.constant 0 : index
    %c0_1 = arith.constant 0 : index
    %3 = vector.load %arg8[%c0, %c0_1] : memref<32x128xf32, #tpu.memory_space<vmem>>, vector<32x128xf32>
    %c0_2 = arith.constant 0 : index
    %c0_3 = arith.constant 0 : index
    %4 = vector.load %arg3[%c0_2, %c0_3] : memref<32x128xbf16, #tpu.memory_space<vmem>>, vector<32x128xbf16>
    %c0_4 = arith.constant 0 : index
    %c0_5 = arith.constant 0 : index
    %5 = vector.load %arg4[%c0_4, %c0_5] : memref<128x128xf32, #tpu.memory_space<vmem>>, vector<128x128xf32>
    %6 = arith.truncf %5 : vector<128x128xf32> to vector<128x128xbf16>
    %cst = arith.constant dense<0.000000e+00> : vector<32x128xf32>
    %7 = tpu.matmul %4, %6, %cst {dimension_numbers = #tpu.dot_dimension_numbers<[1], [0], [0], [1], [0, 0, 1, 1], [], []>} : vector<32x128xbf16>, vector<128x128xbf16>, vector<32x128xf32> -> vector<32x128xf32>
    %8 = arith.addf %3, %7 : vector<32x128xf32>
    %c0_6 = arith.constant 0 : index
    %c0_7 = arith.constant 0 : index
    %9 = vector.load %arg8[%c0_6, %c0_7] : memref<32x128xf32, #tpu.memory_space<vmem>>, vector<32x128xf32>
    tpu.vector_store %arg8[%c0_6, %c0_7], %8 {strides = array<i32>} : memref<32x128xf32, #tpu.memory_space<vmem>>, vector<32x128xf32>,
    %c0_i32_8 = arith.constant 0 : i32
    %10 = arith.cmpi eq, %arg2, %c0_i32_8 : i32
    %11 = arith.extui %10 : i1 to i32
    %c0_i32_9 = arith.constant 0 : i32
    %12 = arith.cmpi ne, %11, %c0_i32_9 : i32
    scf.if %12 {
      %c0_10 = arith.constant 0 : index
      %c0_11 = arith.constant 0 : index
      %13 = vector.load %arg8[%c0_10, %c0_11] : memref<32x128xf32, #tpu.memory_space<vmem>>, vector<32x128xf32>
      %c0_12 = arith.constant 0 : index
      %c0_13 = arith.constant 0 : index
      %14 = vector.load %arg5[%c0_12, %c0_13] : memref<32x1xf32, #tpu.memory_space<vmem>>, vector<32x1xf32>
      %15 = vector.broadcast %14 : vector<32x1xf32> to vector<32x128xf32>
      %16 = arith.addf %13, %15 : vector<32x128xf32>
      %c0_14 = arith.constant 0 : index
      %c0_15 = arith.constant 0 : index
      %17 = vector.load %arg6[%c0_14, %c0_15] : memref<32x128xf32, #tpu.memory_space<vmem>>, vector<32x128xf32>
      %18 = arith.addf %16, %17 : vector<32x128xf32>
      %c0_16 = arith.constant 0 : index
      %c0_17 = arith.constant 0 : index
      %19 = vector.load %arg7[%c0_16, %c0_17] : memref<32x128xf32, #tpu.memory_space<vmem>>, vector<32x128xf32>
      tpu.vector_store %arg7[%c0_16, %c0_17], %18 {strides = array<i32>} : memref<32x128xf32, #tpu.memory_space<vmem>>, vector<32x128xf32>,
    } else {
    }
    return
  }
  func.func @transform_0(%arg0: i32, %arg1: i32, %arg2: i32) -> (i32, i32) {
    %c0_i32 = arith.constant 0 : i32
    return %arg0, %arg2 : i32, i32
  }
  func.func @transform_1(%arg0: i32, %arg1: i32, %arg2: i32) -> (i32, i32) {
    %c0_i32 = arith.constant 0 : i32
    return %arg2, %arg1 : i32, i32
  }
  func.func @transform_2(%arg0: i32, %arg1: i32, %arg2: i32) -> (i32, i32) {
    %c0_i32 = arith.constant 0 : i32
    %c0_i32_0 = arith.constant 0 : i32
    return %arg0, %c0_i32 : i32, i32
  }
  func.func @transform_3(%arg0: i32, %arg1: i32, %arg2: i32) -> (i32, i32) {
    %c0_i32 = arith.constant 0 : i32
    return %arg0, %arg1 : i32, i32
  }
  func.func @transform_4(%arg0: i32, %arg1: i32, %arg2: i32) -> (i32, i32) {
    %c0_i32 = arith.constant 0 : i32
    return %arg0, %arg1 : i32, i32
  }
}

module attributes {stable_mosaic.version = 11 : i64} {
  func.func @_gemm_kernel(%arg0: i32, %arg1: i32, %arg2: i32, %arg3: memref<32x384xbf16, #tpu.memory_space<vmem>>, %arg4: memref<384x128xf32, #tpu.memory_space<vmem>>, %arg5: memref<32x1xf32, #tpu.memory_space<vmem>>, %arg6: memref<32x128xf32, #tpu.memory_space<vmem>>, %arg7: memref<32x128xf32, #tpu.memory_space<vmem>>) attributes {dimension_semantics = [#tpu.dimension_semantics<parallel>, #tpu.dimension_semantics<parallel>, #tpu.dimension_semantics<arbitrary>], iteration_bounds = array<i64: 1, 1, 1>, scalar_prefetch = 0 : i64, scratch_operands = 1 : i64, tpu.core_type = #tpu.core_type<tc>, window_params = [{transform_indices = @transform_0, window_bounds = array<i64: 32, 384>}, {transform_indices = @transform_1, window_bounds = array<i64: 384, 128>}, {transform_indices = @transform_2, window_bounds = array<i64: 32, 1>}, {transform_indices = @transform_3, window_bounds = array<i64: 32, 128>}]} {
    %c0_i32 = arith.constant 0 : i32
    %0 = arith.cmpi eq, %arg2, %c0_i32 : i32
    %1 = arith.extui %0 : i1 to i32
    %c0_i32_0 = arith.constant 0 : i32
    %2 = arith.cmpi ne, %1, %c0_i32_0 : i32
    scf.if %2 {
      %cst_10 = arith.constant 0.000000e+00 : f32
      %13 = vector.broadcast %cst_10 : f32 to vector<32x128xf32>
      %c0_11 = arith.constant 0 : index
      %c0_12 = arith.constant 0 : index
      %14 = vector.load %arg7[%c0_11, %c0_12] : memref<32x128xf32, #tpu.memory_space<vmem>>, vector<32x128xf32>
      tpu.vector_store %arg7[%c0_11, %c0_12], %13 {strides = array<i32>} : memref<32x128xf32, #tpu.memory_space<vmem>>, vector<32x128xf32>,
    } else {
    }
    %c0 = arith.constant 0 : index
    %c0_1 = arith.constant 0 : index
    %3 = vector.load %arg7[%c0, %c0_1] : memref<32x128xf32, #tpu.memory_space<vmem>>, vector<32x128xf32>
    %c0_2 = arith.constant 0 : index
    %c0_3 = arith.constant 0 : index
    %4 = vector.load %arg3[%c0_2, %c0_3] : memref<32x384xbf16, #tpu.memory_space<vmem>>, vector<32x384xbf16>
    %c0_4 = arith.constant 0 : index
    %c0_5 = arith.constant 0 : index
    %5 = vector.load %arg4[%c0_4, %c0_5] : memref<384x128xf32, #tpu.memory_space<vmem>>, vector<384x128xf32>
    %6 = arith.truncf %5 : vector<384x128xf32> to vector<384x128xbf16>
    %cst = arith.constant dense<0.000000e+00> : vector<32x128xf32>
    %7 = tpu.matmul %4, %6, %cst {dimension_numbers = #tpu.dot_dimension_numbers<[1], [0], [0], [1], [0, 0, 1, 1], [], []>} : vector<32x384xbf16>, vector<384x128xbf16>, vector<32x128xf32> -> vector<32x128xf32>
    %8 = arith.addf %3, %7 : vector<32x128xf32>
    %c0_6 = arith.constant 0 : index
    %c0_7 = arith.constant 0 : index
    %9 = vector.load %arg7[%c0_6, %c0_7] : memref<32x128xf32, #tpu.memory_space<vmem>>, vector<32x128xf32>
    tpu.vector_store %arg7[%c0_6, %c0_7], %8 {strides = array<i32>} : memref<32x128xf32, #tpu.memory_space<vmem>>, vector<32x128xf32>,
    %c0_i32_8 = arith.constant 0 : i32
    %10 = arith.cmpi eq, %arg2, %c0_i32_8 : i32
    %11 = arith.extui %10 : i1 to i32
    %c0_i32_9 = arith.constant 0 : i32
    %12 = arith.cmpi ne, %11, %c0_i32_9 : i32
    scf.if %12 {
      %c0_10 = arith.constant 0 : index
      %c0_11 = arith.constant 0 : index
      %13 = vector.load %arg7[%c0_10, %c0_11] : memref<32x128xf32, #tpu.memory_space<vmem>>, vector<32x128xf32>
      %c0_12 = arith.constant 0 : index
      %c0_13 = arith.constant 0 : index
      %14 = vector.load %arg5[%c0_12, %c0_13] : memref<32x1xf32, #tpu.memory_space<vmem>>, vector<32x1xf32>
      %15 = vector.broadcast %14 : vector<32x1xf32> to vector<32x128xf32>
      %16 = arith.addf %13, %15 : vector<32x128xf32>
      %c0_14 = arith.constant 0 : index
      %c0_15 = arith.constant 0 : index
      %17 = vector.load %arg6[%c0_14, %c0_15] : memref<32x128xf32, #tpu.memory_space<vmem>>, vector<32x128xf32>
      tpu.vector_store %arg6[%c0_14, %c0_15], %16 {strides = array<i32>} : memref<32x128xf32, #tpu.memory_space<vmem>>, vector<32x128xf32>,
    } else {
    }
    return
  }
  func.func @transform_0(%arg0: i32, %arg1: i32, %arg2: i32) -> (i32, i32) {
    %c0_i32 = arith.constant 0 : i32
    return %arg0, %arg2 : i32, i32
  }
  func.func @transform_1(%arg0: i32, %arg1: i32, %arg2: i32) -> (i32, i32) {
    %c0_i32 = arith.constant 0 : i32
    return %arg2, %arg1 : i32, i32
  }
  func.func @transform_2(%arg0: i32, %arg1: i32, %arg2: i32) -> (i32, i32) {
    %c0_i32 = arith.constant 0 : i32
    %c0_i32_0 = arith.constant 0 : i32
    return %arg0, %c0_i32 : i32, i32
  }
  func.func @transform_3(%arg0: i32, %arg1: i32, %arg2: i32) -> (i32, i32) {
    %c0_i32 = arith.constant 0 : i32
    return %arg0, %arg1 : i32, i32
  }
}

module attributes {stable_mosaic.version = 11 : i64} {
  func.func @_gemm_kernel(%arg0: i32, %arg1: i32, %arg2: i32, %arg3: memref<8x384xbf16, #tpu.memory_space<vmem>>, %arg4: memref<384x128xf32, #tpu.memory_space<vmem>>, %arg5: memref<8x1xf32, #tpu.memory_space<vmem>>, %arg6: memref<8x128xf32, #tpu.memory_space<vmem>>, %arg7: memref<8x128xf32, #tpu.memory_space<vmem>>) attributes {dimension_semantics = [#tpu.dimension_semantics<parallel>, #tpu.dimension_semantics<parallel>, #tpu.dimension_semantics<arbitrary>], iteration_bounds = array<i64: 1, 1, 1>, scalar_prefetch = 0 : i64, scratch_operands = 1 : i64, tpu.core_type = #tpu.core_type<tc>, window_params = [{transform_indices = @transform_0, window_bounds = array<i64: 8, 384>}, {transform_indices = @transform_1, window_bounds = array<i64: 384, 128>}, {transform_indices = @transform_2, window_bounds = array<i64: 8, 1>}, {transform_indices = @transform_3, window_bounds = array<i64: 8, 128>}]} {
    %c0_i32 = arith.constant 0 : i32
    %0 = arith.cmpi eq, %arg2, %c0_i32 : i32
    %1 = arith.extui %0 : i1 to i32
    %c0_i32_0 = arith.constant 0 : i32
    %2 = arith.cmpi ne, %1, %c0_i32_0 : i32
    scf.if %2 {
      %cst_10 = arith.constant 0.000000e+00 : f32
      %13 = vector.broadcast %cst_10 : f32 to vector<8x128xf32>
      %c0_11 = arith.constant 0 : index
      %c0_12 = arith.constant 0 : index
      %14 = vector.load %arg7[%c0_11, %c0_12] : memref<8x128xf32, #tpu.memory_space<vmem>>, vector<8x128xf32>
      tpu.vector_store %arg7[%c0_11, %c0_12], %13 {strides = array<i32>} : memref<8x128xf32, #tpu.memory_space<vmem>>, vector<8x128xf32>,
    } else {
    }
    %c0 = arith.constant 0 : index
    %c0_1 = arith.constant 0 : index
    %3 = vector.load %arg7[%c0, %c0_1] : memref<8x128xf32, #tpu.memory_space<vmem>>, vector<8x128xf32>
    %c0_2 = arith.constant 0 : index
    %c0_3 = arith.constant 0 : index
    %4 = vector.load %arg3[%c0_2, %c0_3] : memref<8x384xbf16, #tpu.memory_space<vmem>>, vector<8x384xbf16>
    %c0_4 = arith.constant 0 : index
    %c0_5 = arith.constant 0 : index
    %5 = vector.load %arg4[%c0_4, %c0_5] : memref<384x128xf32, #tpu.memory_space<vmem>>, vector<384x128xf32>
    %6 = arith.truncf %5 : vector<384x128xf32> to vector<384x128xbf16>
    %cst = arith.constant dense<0.000000e+00> : vector<8x128xf32>
    %7 = tpu.matmul %4, %6, %cst {dimension_numbers = #tpu.dot_dimension_numbers<[1], [0], [0], [1], [0, 0, 1, 1], [], []>} : vector<8x384xbf16>, vector<384x128xbf16>, vector<8x128xf32> -> vector<8x128xf32>
    %8 = arith.addf %3, %7 : vector<8x128xf32>
    %c0_6 = arith.constant 0 : index
    %c0_7 = arith.constant 0 : index
    %9 = vector.load %arg7[%c0_6, %c0_7] : memref<8x128xf32, #tpu.memory_space<vmem>>, vector<8x128xf32>
    tpu.vector_store %arg7[%c0_6, %c0_7], %8 {strides = array<i32>} : memref<8x128xf32, #tpu.memory_space<vmem>>, vector<8x128xf32>,
    %c0_i32_8 = arith.constant 0 : i32
    %10 = arith.cmpi eq, %arg2, %c0_i32_8 : i32
    %11 = arith.extui %10 : i1 to i32
    %c0_i32_9 = arith.constant 0 : i32
    %12 = arith.cmpi ne, %11, %c0_i32_9 : i32
    scf.if %12 {
      %c0_10 = arith.constant 0 : index
      %c0_11 = arith.constant 0 : index
      %13 = vector.load %arg7[%c0_10, %c0_11] : memref<8x128xf32, #tpu.memory_space<vmem>>, vector<8x128xf32>
      %c0_12 = arith.constant 0 : index
      %c0_13 = arith.constant 0 : index
      %14 = vector.load %arg5[%c0_12, %c0_13] : memref<8x1xf32, #tpu.memory_space<vmem>>, vector<8x1xf32>
      %15 = vector.broadcast %14 : vector<8x1xf32> to vector<8x128xf32>
      %16 = arith.addf %13, %15 : vector<8x128xf32>
      %c0_14 = arith.constant 0 : index
      %c0_15 = arith.constant 0 : index
      %17 = vector.load %arg6[%c0_14, %c0_15] : memref<8x128xf32, #tpu.memory_space<vmem>>, vector<8x128xf32>
      tpu.vector_store %arg6[%c0_14, %c0_15], %16 {strides = array<i32>} : memref<8x128xf32, #tpu.memory_space<vmem>>, vector<8x128xf32>,
    } else {
    }
    return
  }
  func.func @transform_0(%arg0: i32, %arg1: i32, %arg2: i32) -> (i32, i32) {
    %c0_i32 = arith.constant 0 : i32
    return %arg0, %arg2 : i32, i32
  }
  func.func @transform_1(%arg0: i32, %arg1: i32, %arg2: i32) -> (i32, i32) {
    %c0_i32 = arith.constant 0 : i32
    return %arg2, %arg1 : i32, i32
  }
  func.func @transform_2(%arg0: i32, %arg1: i32, %arg2: i32) -> (i32, i32) {
    %c0_i32 = arith.constant 0 : i32
    %c0_i32_0 = arith.constant 0 : i32
    return %arg0, %c0_i32 : i32, i32
  }
  func.func @transform_3(%arg0: i32, %arg1: i32, %arg2: i32) -> (i32, i32) {
    %c0_i32 = arith.constant 0 : i32
    return %arg0, %arg1 : i32, i32
  }
}

</mosaic_0001>

<bundles_post_ra>
// kernel: encoder_forward.34
= control target key start
LH: loop header
LB: loop body
LE: loop exit
PB: predicated region body
PF: predicated region fallthrough
CT: control target
= control target key end

     0   :  { %s520_s12 = smov 0   ;;  %s567_s0 = inlined_call_operand.vmem [shape: f32[8,2,2,256], index: 0, kind: input, shape index: {}]   ;;  %s568_s1 = inlined_call_operand.vmem [shape: f32[8,2,1,1], index: 1, kind: input, shape index: {}]   ;;  %s569_s2 = inlined_call_operand.vmem [shape: f32[8,2,1,1], index: 2, kind: input, shape index: {}]   ;;  %s570_s3 = inlined_call_operand.vmem [shape: f32[8,2,2,256], index: 3, kind: output, shape index: {}]  }
   0x1 LB: > { %s445_s13 = sadd.s32 4294967295, %s495_s12   ;;  %p449_p0 = scmp.ge.s32.totalorder %s495_s12, 1  ;;  %s495_s12 = sphi %s520_s12, %s13_s12  }
   0x2   : > { %p155_p1 = scmp.lt.s32.totalorder %s495_s12, 9 }
   0x4   : > { %p156_p2 = pnand %p449_p0, %p155_p1 }
   0x5   : > { %p187_p3 = scmp.lt.s32.totalorder (!%p156_p2), %s445_s13, 7  ;;  %v212_v0 = vlaneseq (!%p156_p2)  ;;  %v497_v1 = vmov (!%p156_p2), 1983009808   ;;  %v498_v3 = vmov (!%p156_p2), 0   ;;  %vm229_vm0 = vcmask (!%p156_p2), 1041408  }
   0x6   : > { %159 = sbr.rel (%p156_p2) target bundleno = 390 (0x186), region = 32  ;;  %v210_v2 = vunpack.c.l.s4 (!%p156_p2), %v497_v1  ;;  %478 = vset.pattern.permute.xlu1 (!%p156_p2), %v498_v3  ;;  %477 = vset.pattern.permute.xlu0 (!%p156_p2), %v498_v3  ;;  %v499_v22 = vmov (!%p156_p2), 269488144  }
   0x7   : > { %v213_v4 = vshrl.u32 (!%p156_p2), %v212_v0, 7  ;;  %v246_v23 = vunpack.c.l.s4 (!%p156_p2), %v499_v22 }
   0x8   : > { %v211_v5 = vunpack.c.0.s8 (!%p156_p2), %v210_v2 }
   0x9   : > { %v247_v25 = vunpack.c.0.s8 (!%p156_p2), %v246_v23 }
   0xa   : > { %v214_v6 = vsub.s32 (!%p156_p2), %v211_v5, %v213_v4 }
   0xb   : > { %v250_v29 = vsub.s32 (!%p156_p2), %v247_v25, %v213_v4 }
   0xd   : > { %s572_s13 = smov (!%p187_p3, %s445_s13), 7 }
   0xe   : > { %s464_s14 = sshll.u32 %s572_s13, 3  ;;  %s452_s15 = sshll.u32 %s572_s13, 1 }
   0xf   : > { %s191_s18 = scalar_lea.vmem %s567_s0, %s464_s14  ;;  %s195_s21 = scalar_lea.vmem %s568_s1, %s452_s15 }
  0x10   : > { %v205_v7 = vld [vmem:[%s191_s18] sm:$0xf]  ;;  %v206_v8 = vld [vmem:[%s191_s18 + $0x4] sm:$0xf]  ;;  %s543_s24 = scalar_lea.vmem %s569_s2, %s452_s15  ;;  %s204_s27 = scalar_lea.vmem %s570_s3, %s464_s14 }
  0x11   : > { %v457_v9 = vld [vmem:[%s195_s21 + $0x1] ss:$0 sm:$0xff]  ;;  %v215_v10 = vrot.slane %v205_v7, %v214_v6  ;;  %v223_v11 = vrot.slane %v206_v8, %v214_v6  ;;  %v458_v12 = vld [vmem:[%s543_s24] ss:$0 sm:$0xff] }
  0x12   : > { %323 = vperm.xlu1 %478, %v457_v9   ;;  %v456_v21 = vld [vmem:[%s195_s21] ss:$0 sm:$0xff]  ;;  %v459_v47 = vld [vmem:[%s543_s24 + $0x1] ss:$0 sm:$0xff] }
  0x13   : > { %v216_v13 = vcombine.high %v215_v10, %v215_v10  ;;  %v230_v14 = vsel %vm229_vm0, %v215_v10, 0.0  ;;  %v224_v15 = vcombine.high %v223_v11, %v223_v11  ;;  %v235_v17 = vsel %vm229_vm0, %v223_v11, 0.0 }
  0x15   : > { %v231_v16 = vsel %vm229_vm0, %v216_v13, 0.0  ;;  %v236_v18 = vsel %vm229_vm0, %v224_v15, 0.0 }
  0x16   : > { %341 = vperm.xlu1 %478, %v458_v12   ;;  %v232_v19 = vadd.f32 %v231_v16, %v230_v14  ;;  %v237_v20 = vadd.f32 %v236_v18, %v235_v17 }
  0x18   : > { %233 = vadd.xlane.f32.xlu0 %v232_v19 }
  0x1c   : > { %238 = vadd.xlane.f32.xlu0 %v237_v20 }
  0x32   : > { %319 = vperm.xlu0 %477, %v456_v21  }
  0x91   : > { %v324_v48 = vpop.permute.xlu1 %323 }
  0x95   : > { %v342_v49 = vpop.permute.xlu1 %341 }
  0xa5   : > { %v234_v24 = vpop.xlane.xlu0 %233 }
  0xa6   : > { %v240_v27 = vsel %vm229_vm0, %v234_v24, 0.0 }
  0xa9   : > { %v239_v26 = vpop.xlane.xlu0 %238 }
  0xaa   : > { %v241_v28 = vsel %vm229_vm0, %v239_v26, 0.0 }
  0xab   : > { %v242_v30 = vadd.f32 %v241_v28, %v240_v27 }
  0xad   : > { %v243_v31 = vmul.f32 0.001953125, %v242_v30 }
  0xaf   : > { %v251_v32 = vrot.slane %v243_v31, %v250_v29 }
  0xb1   : > { %v253_v33 = vsub.f32 %v205_v7, %v251_v32  ;;  %v254_v34 = vsub.f32 %v206_v8, %v251_v32  ;;  %v320_v59 = vpop.permute.xlu0 %319 }
  0xb3   : > { %v255_v35 = vmul.f32 %v253_v33, %v253_v33  ;;  %v256_v36 = vmul.f32 %v254_v34, %v254_v34 }
  0xb5   : > { %v265_v37 = vrot.slane %v255_v35, %v214_v6  ;;  %v273_v38 = vrot.slane %v256_v36, %v214_v6 }
  0xb7   : > { %v266_v39 = vcombine.high %v265_v37, %v265_v37  ;;  %v274_v40 = vcombine.high %v273_v38, %v273_v38  ;;  %v279_v41 = vsel %vm229_vm0, %v265_v37, 0.0  ;;  %v284_v45 = vsel %vm229_vm0, %v273_v38, 0.0 }
  0xb9   : > { %v280_v42 = vsel %vm229_vm0, %v266_v39, 0.0  ;;  %v285_v44 = vsel %vm229_vm0, %v274_v40, 0.0 }
  0xba   : > { %v281_v43 = vadd.f32 %v280_v42, %v279_v41  ;;  %v286_v46 = vadd.f32 %v285_v44, %v284_v45 }
  0xbc   : > { %282 = vadd.xlane.f32.xlu1 %v281_v43 }
  0xc0   : > { %287 = vadd.xlane.f32.xlu1 %v286_v46 }
  0xd1   : > { %345 = vperm.xlu1 %478, %v459_v47  }
 0x149   : > { %v283_v50 = vpop.xlane.xlu1 %282 }
 0x14a   : > { %v289_v52 = vsel %vm229_vm0, %v283_v50, 0.0 }
 0x14d   : > { %v288_v51 = vpop.xlane.xlu1 %287 }
 0x14e   : > { %v290_v53 = vsel %vm229_vm0, %v288_v51, 0.0 }
 0x14f   : > { %v291_v54 = vadd.f32 %v290_v53, %v289_v52 }
 0x151   : > { %v292_v55 = vmul.f32 0.001953125, %v291_v54  ;;  %v346_v0 = vpop.permute.xlu1 %345 }
 0x153   : > { %v293_v56 = vadd.f32 1e-06, %v292_v55 }
 0x155   : > { %479 = vrsqrt.f32 %v293_v56 }
 0x15f   : > { %v480_v57 = vpop.eup %479 }
 0x160   : > { %v302_v58 = vrot.slane %v480_v57, %v250_v29 }
 0x162   : > { %v305_v60 = vmul.f32 %v302_v58, %v254_v34  ;;  %v304_v61 = vmul.f32 %v302_v58, %v253_v33 }
 0x164   : > { %v327_v62 = vmul.f32 %v324_v48, %v305_v60  ;;  %v326_v63 = vmul.f32 %v320_v59, %v304_v61 }
 0x166   : > { %v349_v1 = vadd.f32 %v346_v0, %v327_v62  ;;  %v348_v2 = vadd.f32 %v342_v49, %v326_v63 }
 0x168   : > { %v461_v3 = vmul.f32 -1.442695, %v349_v1  ;;  %v460_v4 = vmul.f32 -1.442695, %v348_v2 }
 0x16a   : > { %481 = vpow2.f32 %v461_v3 }
 0x16b   : > { %483 = vpow2.f32 %v460_v4 }
 0x174   : > { %v482_v5 = vpop.eup %481 }
 0x175   : > { %v484_v6 = vpop.eup %483  ;;  %v357_v7 = vadd.f32 1.0, %v482_v5 }
 0x176   : > { %v356_v8 = vadd.f32 1.0, %v484_v6 }
 0x177   : > { %485 = vrcp.f32 %v357_v7 }
 0x178   : > { %487 = vrcp.f32 %v356_v8 }
 0x181   : > { %v486_v9 = vpop.eup %485 }
 0x182   : > { %v488_v10 = vpop.eup %487  ;;  %v363_v11 = vmul.f32 %v486_v9, %v349_v1 }
 0x183   : > { %v362_v12 = vmul.f32 %v488_v10, %v348_v2 }
 0x184   : > { %365 = vst [vmem:[%s204_s27 + $0x4] sm:$0xf] %v363_v11 }
 0x185   : > { %364 = vst [vmem:[%s204_s27] sm:$0xf] %v362_v12 }
 0x186 PF: > { %s13_s12 = sadd.s32 1, %s495_s12  }
 0x187   : > { %p10_p4 = scmp.ge.s32.totalorder %s13_s12, 10  }
 0x189   :  { %12 = sbr.rel (!%p10_p4) target bundleno = 1 (0x1), region = 68 }

// kernel: encoder_forward.33
= control target key start
LH: loop header
LB: loop body
LE: loop exit
PB: predicated region body
PF: predicated region fallthrough
CT: control target
= control target key end

     0   :  { %v288_v3 = vmov 0   ;;  %s534_s1 = inlined_call_operand.vmem [shape: f32[128,512], index: 1, kind: input, shape index: {}]   ;;  %s535_s2 = inlined_call_operand.vmem [shape: f32[16,1], index: 2, kind: input, shape index: {}]   ;;  %s536_s0 = inlined_call_operand.vmem [shape: bf16[16,128], index: 0, kind: input, shape index: {}]   ;;  %s537_s3 = inlined_call_operand.vmem [shape: f32[16,512], index: 3, kind: output, shape index: {}]  }
   0x1   :  { %v38_v0 = vld [vmem:[%s534_s1 + $0x8] sm:$0xff]  ;;  %v40_v2 = vld [vmem:[%s534_s1 + $0x18] sm:$0xff]  ;;  %171 = vmatprep.mubr.bf16.mxu0 %v288_v3  ;;  %214 = vmatprep.mubr.bf16.mxu1 %v288_v3  ;;  %v37_v6 = vld [vmem:[%s534_s1] sm:$0xff] }
   0x2   :  { %v42_v1 = vld [vmem:[%s534_s1 + $0x28] sm:$0xff]  ;;  %v44_v5 = vld [vmem:[%s534_s1 + $0x38] sm:$0xff]  ;;  %v41_v7 = vld [vmem:[%s534_s1 + $0x20] sm:$0xff]  ;;  %286 = vset.pattern.permute.xlu0 %v288_v3 }
   0x3   :  { %v102_v4 = vpack.c.bf16 %v42_v1, %v38_v0  ;;  %v104_v8 = vpack.c.bf16 %v44_v5, %v40_v2  ;;  %v101_v9 = vpack.c.bf16 %v41_v7, %v37_v6  ;;  %v39_v10 = vld [vmem:[%s534_s1 + $0x10] sm:$0xff]  ;;  %v46_v12 = vld [vmem:[%s534_s1 + $0x48] sm:$0xff]  ;;  %v48_v15 = vld [vmem:[%s534_s1 + $0x58] sm:$0xff] }
   0x4   :  { %v43_v11 = vld [vmem:[%s534_s1 + $0x30] sm:$0xff]  ;;  %v50_v14 = vld [vmem:[%s534_s1 + $0x68] sm:$0xff]  ;;  %v52_v16 = vld [vmem:[%s534_s1 + $0x78] sm:$0xff] }
   0x5   :  { %139 = vmatprep.subr.bf16.mxu0 %v102_v4  ;;  %v103_v13 = vpack.c.bf16 %v43_v11, %v39_v10  ;;  %182 = vmatprep.subr.bf16.mxu1 %v104_v8  ;;  %v106_v17 = vpack.c.bf16 %v50_v14, %v46_v12  ;;  %v108_v18 = vpack.c.bf16 %v52_v16, %v48_v15  ;;  %v45_v19 = vld [vmem:[%s534_s1 + $0x40] sm:$0xff]  ;;  %v47_v21 = vld [vmem:[%s534_s1 + $0x50] sm:$0xff]  ;;  %v54_v24 = vld [vmem:[%s534_s1 + $0x88] sm:$0xff] }
   0x6   :  { %140 = vmatpush1.bf16.msra.mxu0 %v101_v9  ;;  %v49_v20 = vld [vmem:[%s534_s1 + $0x60] sm:$0xff]  ;;  %v51_v23 = vld [vmem:[%s534_s1 + $0x70] sm:$0xff]  ;;  %v58_v25 = vld [vmem:[%s534_s1 + $0xa8] sm:$0xff] }
   0x7   :  { %183 = vmatpush1.bf16.msra.mxu1 %v103_v13  ;;  %v105_v22 = vpack.c.bf16 %v49_v20, %v45_v19  ;;  %141 = vmatprep.subr.bf16.mxu0 %v106_v17  ;;  %v107_v26 = vpack.c.bf16 %v51_v23, %v47_v21  ;;  %v110_v27 = vpack.c.bf16 %v58_v25, %v54_v24  ;;  %v56_v28 = vld [vmem:[%s534_s1 + $0x98] sm:$0xff]  ;;  %v53_v30 = vld [vmem:[%s534_s1 + $0x80] sm:$0xff]  ;;  %v55_v33 = vld [vmem:[%s534_s1 + $0x90] sm:$0xff] }
   0x8   :  { %184 = vmatprep.subr.bf16.mxu1 %v108_v18  ;;  %v60_v29 = vld [vmem:[%s534_s1 + $0xb8] sm:$0xff]  ;;  %v57_v32 = vld [vmem:[%s534_s1 + $0xa0] sm:$0xff]  ;;  %v59_v34 = vld [vmem:[%s534_s1 + $0xb0] sm:$0xff] }
   0x9   :  { %v112_v31 = vpack.c.bf16 %v60_v29, %v56_v28  ;;  %v109_v35 = vpack.c.bf16 %v57_v32, %v53_v30  ;;  %v62_v36 = vld [vmem:[%s534_s1 + $0xc8] sm:$0xff]  ;;  %v64_v38 = vld [vmem:[%s534_s1 + $0xd8] sm:$0xff]  ;;  %v111_v39 = vpack.c.bf16 %v59_v34, %v55_v33  ;;  %v61_v42 = vld [vmem:[%s534_s1 + $0xc0] sm:$0xff] }
   0xa   :  { %142 = vmatpush1.bf16.msra.mxu0 %v105_v22  ;;  %v66_v37 = vld [vmem:[%s534_s1 + $0xe8] sm:$0xff]  ;;  %v68_v41 = vld [vmem:[%s534_s1 + $0xf8] sm:$0xff]  ;;  %v65_v43 = vld [vmem:[%s534_s1 + $0xe0] sm:$0xff] }
   0xb   :  { %185 = vmatpush1.bf16.msra.mxu1 %v107_v26  ;;  %143 = vmatprep.subr.bf16.mxu0 %v110_v27  ;;  %v114_v40 = vpack.c.bf16 %v66_v37, %v62_v36  ;;  %v116_v44 = vpack.c.bf16 %v68_v41, %v64_v38  ;;  %v63_v45 = vld [vmem:[%s534_s1 + $0xd0] sm:$0xff]  ;;  %v70_v47 = vld [vmem:[%s534_s1 + $0x108] sm:$0xff]  ;;  %v72_v49 = vld [vmem:[%s534_s1 + $0x118] sm:$0xff]  ;;  %v113_v51 = vpack.c.bf16 %v65_v43, %v61_v42 }
   0xc   :  { %186 = vmatprep.subr.bf16.mxu1 %v112_v31  ;;  %v67_v46 = vld [vmem:[%s534_s1 + $0xf0] sm:$0xff]  ;;  %v74_v48 = vld [vmem:[%s534_s1 + $0x128] sm:$0xff]  ;;  %v76_v50 = vld [vmem:[%s534_s1 + $0x138] sm:$0xff] }
   0xd   :  { %v115_v52 = vpack.c.bf16 %v67_v46, %v63_v45  ;;  %v118_v53 = vpack.c.bf16 %v74_v48, %v70_v47  ;;  %v69_v54 = vld [vmem:[%s534_s1 + $0x100] sm:$0xff]  ;;  %v71_v56 = vld [vmem:[%s534_s1 + $0x110] sm:$0xff]  ;;  %v120_v57 = vpack.c.bf16 %v76_v50, %v72_v49  ;;  %v78_v59 = vld [vmem:[%s534_s1 + $0x148] sm:$0xff] }
   0xe   :  { %144 = vmatpush1.bf16.msra.mxu0 %v109_v35  ;;  %v73_v55 = vld [vmem:[%s534_s1 + $0x120] sm:$0xff]  ;;  %v75_v58 = vld [vmem:[%s534_s1 + $0x130] sm:$0xff]  ;;  %v82_v60 = vld [vmem:[%s534_s1 + $0x168] sm:$0xff] }
   0xf   :  { %187 = vmatpush1.bf16.msra.mxu1 %v111_v39  ;;  %145 = vmatprep.subr.bf16.mxu0 %v114_v40  ;;  %v80_v61 = vld [vmem:[%s534_s1 + $0x158] sm:$0xff]  ;;  %v117_v63 = vpack.c.bf16 %v73_v55, %v69_v54  ;;  %v119_v0 = vpack.c.bf16 %v75_v58, %v71_v56  ;;  %v122_v1 = vpack.c.bf16 %v82_v60, %v78_v59  ;;  %v77_v2 = vld [vmem:[%s534_s1 + $0x140] sm:$0xff]  ;;  %v79_v4 = vld [vmem:[%s534_s1 + $0x150] sm:$0xff] }
  0x10   :  { %188 = vmatprep.subr.bf16.mxu1 %v116_v44  ;;  %v84_v62 = vld [vmem:[%s534_s1 + $0x178] sm:$0xff]  ;;  %v81_v3 = vld [vmem:[%s534_s1 + $0x160] sm:$0xff]  ;;  %v83_v6 = vld [vmem:[%s534_s1 + $0x170] sm:$0xff] }
  0x11   :  { %v124_v5 = vpack.c.bf16 %v84_v62, %v80_v61  ;;  %v86_v7 = vld [vmem:[%s534_s1 + $0x188] sm:$0xff]  ;;  %v88_v9 = vld [vmem:[%s534_s1 + $0x198] sm:$0xff]  ;;  %v121_v11 = vpack.c.bf16 %v81_v3, %v77_v2  ;;  %v85_v12 = vld [vmem:[%s534_s1 + $0x180] sm:$0xff]  ;;  %v123_v15 = vpack.c.bf16 %v83_v6, %v79_v4 }
  0x12   :  { %146 = vmatpush1.bf16.msra.mxu0 %v113_v51  ;;  %v90_v8 = vld [vmem:[%s534_s1 + $0x1a8] sm:$0xff]  ;;  %v92_v10 = vld [vmem:[%s534_s1 + $0x1b8] sm:$0xff]  ;;  %v89_v13 = vld [vmem:[%s534_s1 + $0x1a0] sm:$0xff] }
  0x13   :  { %189 = vmatpush1.bf16.msra.mxu1 %v115_v52  ;;  %147 = vmatprep.subr.bf16.mxu0 %v118_v53  ;;  %v87_v14 = vld [vmem:[%s534_s1 + $0x190] sm:$0xff]  ;;  %v126_v16 = vpack.c.bf16 %v90_v8, %v86_v7  ;;  %v128_v18 = vpack.c.bf16 %v92_v10, %v88_v9  ;;  %v94_v19 = vld [vmem:[%s534_s1 + $0x1c8] sm:$0xff]  ;;  %v252_v21 = vld [vmem:[%s535_s2] sm:$0xff]  ;;  %v125_v24 = vpack.c.bf16 %v89_v13, %v85_v12 }
  0x14   :  { %190 = vmatprep.subr.bf16.mxu1 %v120_v57  ;;  %v91_v17 = vld [vmem:[%s534_s1 + $0x1b0] sm:$0xff]  ;;  %v98_v20 = vld [vmem:[%s534_s1 + $0x1e8] sm:$0xff]  ;;  %v96_v22 = vld [vmem:[%s534_s1 + $0x1d8] sm:$0xff]  ;;  %256 = vperm.xlu0 %286, %v252_v21  }
  0x15   :  { %v100_v23 = vld [vmem:[%s534_s1 + $0x1f8] sm:$0xff]  ;;  %v253_v25 = vld [vmem:[%s535_s2 + $0x8] sm:$0xff]  ;;  %v127_v26 = vpack.c.bf16 %v91_v17, %v87_v14  ;;  %v130_v27 = vpack.c.bf16 %v98_v20, %v94_v19  ;;  %v93_v28 = vld [vmem:[%s534_s1 + $0x1c0] sm:$0xff] }
  0x16   :  { %148 = vmatpush1.bf16.msra.mxu0 %v117_v63  ;;  %v97_v29 = vld [vmem:[%s534_s1 + $0x1e0] sm:$0xff]  ;;  %v132_v30 = vpack.c.bf16 %v100_v23, %v96_v22  ;;  %v95_v31 = vld [vmem:[%s534_s1 + $0x1d0] sm:$0xff] }
  0x17   :  { %191 = vmatpush1.bf16.msra.mxu1 %v119_v0  ;;  %149 = vmatprep.subr.bf16.mxu0 %v122_v1  ;;  %v99_v32 = vld [vmem:[%s534_s1 + $0x1f0] sm:$0xff]  ;;  %v129_v33 = vpack.c.bf16 %v97_v29, %v93_v28  ;;  %v287_v35 = vld [vmem:[%s536_s0] sm:$0xff]  }
  0x18   :  { %192 = vmatprep.subr.bf16.mxu1 %v124_v5  ;;  %261 = vperm.xlu0 %286, %v253_v25   ;;  %v131_v34 = vpack.c.bf16 %v99_v32, %v95_v31 }
  0x1a   :  { %150 = vmatpush1.bf16.msra.mxu0 %v121_v11 }
  0x1b   :  { %193 = vmatpush1.bf16.msra.mxu1 %v123_v15  ;;  %151 = vmatprep.subr.bf16.mxu0 %v126_v16 }
  0x1c   :  { %194 = vmatprep.subr.bf16.mxu1 %v128_v18 }
  0x1e   :  { %152 = vmatpush1.bf16.msra.mxu0 %v125_v24 }
  0x1f   :  { %195 = vmatpush1.bf16.msra.mxu1 %v127_v26  ;;  %153 = vmatprep.subr.bf16.mxu0 %v130_v27 }
  0x20   :  { %196 = vmatprep.subr.bf16.mxu1 %v132_v30 }
  0x22   :  { %154 = vmatpush1.bf16.msra.mxu0 %v129_v33 }
  0x23   :  { %197 = vmatpush1.bf16.msra.mxu1 %v131_v34 }
  0x25   :  { %172 = vmatmul.mubr.bf16.vlgmr.msra.gmra.mrb[0].mxu0 %v287_v35 }
  0x26   :  { %215 = vmatmul.mubr.bf16.vlgmr.msra.gmra.mrb[0].mxu1 %v287_v35 }
  0x93   :  { %v257_v36 = vpop.permute.xlu0 %256 }
  0x97   :  { %v262_v37 = vpop.permute.xlu0 %261 }
  0xf8   :  { %v173_v38 = vpop.f32.mrb[0].mxu0 }
  0xf9   :  { %v264_v39 = vadd.f32 %v257_v36, %v173_v38  ;;  %v216_v40 = vpop.f32.mrb[0].mxu1  ;;  %v175_v41 = vpop.f32.mrb[1].mxu0 }
  0xfa   :  { %v266_v42 = vadd.f32 %v257_v36, %v216_v40  ;;  %v265_v43 = vadd.f32 %v257_v36, %v175_v41  ;;  %v218_v44 = vpop.f32.mrb[1].mxu1  ;;  %v177_v45 = vpop.f32.mrb[2].mxu0 }
  0xfb   :  { %272 = vst [vmem:[%s537_s3] sm:$0xff] %v264_v39  ;;  %v267_v46 = vadd.f32 %v257_v36, %v218_v44  ;;  %v268_v47 = vadd.f32 %v262_v37, %v177_v45  ;;  %v220_v48 = vpop.f32.mrb[2].mxu1  ;;  %v179_v49 = vpop.f32.mrb[3].mxu0 }
  0xfc   :  { %274 = vst [vmem:[%s537_s3 + $0x10] sm:$0xff] %v266_v42  ;;  %273 = vst [vmem:[%s537_s3 + $0x8] sm:$0xff] %v265_v43  ;;  %v270_v50 = vadd.f32 %v262_v37, %v220_v48  ;;  %v269_v51 = vadd.f32 %v262_v37, %v179_v49  ;;  %v222_v52 = vpop.f32.mrb[3].mxu1 }
  0xfd   :  { %275 = vst [vmem:[%s537_s3 + $0x18] sm:$0xff] %v267_v46  ;;  %276 = vst [vmem:[%s537_s3 + $0x20] sm:$0xff] %v268_v47  ;;  %v271_v53 = vadd.f32 %v262_v37, %v222_v52 }
  0xfe   :  { %278 = vst [vmem:[%s537_s3 + $0x30] sm:$0xff] %v270_v50  ;;  %277 = vst [vmem:[%s537_s3 + $0x28] sm:$0xff] %v269_v51 }
  0xff   :  { %279 = vst [vmem:[%s537_s3 + $0x38] sm:$0xff] %v271_v53 }

// kernel: encoder_forward.35
= control target key start
LH: loop header
LB: loop body
LE: loop exit
PB: predicated region body
PF: predicated region fallthrough
CT: control target
= control target key end

     0   :  { %v390_v3 = vmov 0   ;;  %s831_s1 = inlined_call_operand.vmem [shape: f32[256,512], index: 1, kind: input, shape index: {}]   ;;  %s832_s0 = inlined_call_operand.vmem [shape: bf16[16,256], index: 0, kind: input, shape index: {}]   ;;  %s833_s2 = inlined_call_operand.vmem [shape: f32[16,1], index: 2, kind: input, shape index: {}]   ;;  %s834_s3 = inlined_call_operand.vmem [shape: f32[16,512], index: 3, kind: output, shape index: {}]  }
   0x1   :  { %v37_v0 = vld [vmem:[%s831_s1 + $0x8] sm:$0xff]  ;;  %v39_v2 = vld [vmem:[%s831_s1 + $0x18] sm:$0xff]  ;;  %386 = vset.pattern.permute.xlu0 %v390_v3  ;;  %v36_v6 = vld [vmem:[%s831_s1] sm:$0xff] }
   0x2   :  { %v41_v1 = vld [vmem:[%s831_s1 + $0x28] sm:$0xff]  ;;  %v43_v5 = vld [vmem:[%s831_s1 + $0x38] sm:$0xff]  ;;  %v40_v7 = vld [vmem:[%s831_s1 + $0x20] sm:$0xff] }
   0x3   :  { %v165_v4 = vpack.c.bf16 %v41_v1, %v37_v0  ;;  %v167_v8 = vpack.c.bf16 %v43_v5, %v39_v2  ;;  %v164_v9 = vpack.c.bf16 %v40_v7, %v36_v6  ;;  %v38_v10 = vld [vmem:[%s831_s1 + $0x10] sm:$0xff]  ;;  %v45_v12 = vld [vmem:[%s831_s1 + $0x48] sm:$0xff]  ;;  %v47_v15 = vld [vmem:[%s831_s1 + $0x58] sm:$0xff] }
   0x4   :  { %v42_v11 = vld [vmem:[%s831_s1 + $0x30] sm:$0xff]  ;;  %v49_v14 = vld [vmem:[%s831_s1 + $0x68] sm:$0xff]  ;;  %v51_v16 = vld [vmem:[%s831_s1 + $0x78] sm:$0xff] }
   0x5   :  { %238 = vmatprep.subr.bf16.mxu0 %v165_v4  ;;  %v166_v13 = vpack.c.bf16 %v42_v11, %v38_v10  ;;  %281 = vmatprep.subr.bf16.mxu1 %v167_v8  ;;  %v169_v17 = vpack.c.bf16 %v49_v14, %v45_v12  ;;  %v171_v18 = vpack.c.bf16 %v51_v16, %v47_v15  ;;  %v44_v19 = vld [vmem:[%s831_s1 + $0x40] sm:$0xff]  ;;  %v46_v21 = vld [vmem:[%s831_s1 + $0x50] sm:$0xff]  ;;  %v53_v24 = vld [vmem:[%s831_s1 + $0x88] sm:$0xff] }
   0x6   :  { %239 = vmatpush1.bf16.msra.mxu0 %v164_v9  ;;  %v48_v20 = vld [vmem:[%s831_s1 + $0x60] sm:$0xff]  ;;  %v50_v23 = vld [vmem:[%s831_s1 + $0x70] sm:$0xff]  ;;  %v57_v25 = vld [vmem:[%s831_s1 + $0xa8] sm:$0xff] }
   0x7   :  { %282 = vmatpush1.bf16.msra.mxu1 %v166_v13  ;;  %v168_v22 = vpack.c.bf16 %v48_v20, %v44_v19  ;;  %240 = vmatprep.subr.bf16.mxu0 %v169_v17  ;;  %v170_v26 = vpack.c.bf16 %v50_v23, %v46_v21  ;;  %v173_v27 = vpack.c.bf16 %v57_v25, %v53_v24  ;;  %v55_v28 = vld [vmem:[%s831_s1 + $0x98] sm:$0xff]  ;;  %v52_v30 = vld [vmem:[%s831_s1 + $0x80] sm:$0xff]  ;;  %v54_v33 = vld [vmem:[%s831_s1 + $0x90] sm:$0xff] }
   0x8   :  { %283 = vmatprep.subr.bf16.mxu1 %v171_v18  ;;  %v59_v29 = vld [vmem:[%s831_s1 + $0xb8] sm:$0xff]  ;;  %v56_v32 = vld [vmem:[%s831_s1 + $0xa0] sm:$0xff]  ;;  %v58_v34 = vld [vmem:[%s831_s1 + $0xb0] sm:$0xff] }
   0x9   :  { %v175_v31 = vpack.c.bf16 %v59_v29, %v55_v28  ;;  %v172_v35 = vpack.c.bf16 %v56_v32, %v52_v30  ;;  %v61_v36 = vld [vmem:[%s831_s1 + $0xc8] sm:$0xff]  ;;  %v63_v38 = vld [vmem:[%s831_s1 + $0xd8] sm:$0xff]  ;;  %v174_v39 = vpack.c.bf16 %v58_v34, %v54_v33  ;;  %v60_v42 = vld [vmem:[%s831_s1 + $0xc0] sm:$0xff] }
   0xa   :  { %241 = vmatpush1.bf16.msra.mxu0 %v168_v22  ;;  %v65_v37 = vld [vmem:[%s831_s1 + $0xe8] sm:$0xff]  ;;  %v67_v41 = vld [vmem:[%s831_s1 + $0xf8] sm:$0xff]  ;;  %v64_v43 = vld [vmem:[%s831_s1 + $0xe0] sm:$0xff] }
   0xb   :  { %284 = vmatpush1.bf16.msra.mxu1 %v170_v26  ;;  %242 = vmatprep.subr.bf16.mxu0 %v173_v27  ;;  %v177_v40 = vpack.c.bf16 %v65_v37, %v61_v36  ;;  %v179_v44 = vpack.c.bf16 %v67_v41, %v63_v38  ;;  %v62_v45 = vld [vmem:[%s831_s1 + $0xd0] sm:$0xff]  ;;  %v69_v47 = vld [vmem:[%s831_s1 + $0x108] sm:$0xff]  ;;  %v71_v49 = vld [vmem:[%s831_s1 + $0x118] sm:$0xff]  ;;  %v176_v51 = vpack.c.bf16 %v64_v43, %v60_v42 }
   0xc   :  { %285 = vmatprep.subr.bf16.mxu1 %v175_v31  ;;  %v66_v46 = vld [vmem:[%s831_s1 + $0xf0] sm:$0xff]  ;;  %v73_v48 = vld [vmem:[%s831_s1 + $0x128] sm:$0xff]  ;;  %v75_v50 = vld [vmem:[%s831_s1 + $0x138] sm:$0xff] }
   0xd   :  { %v178_v52 = vpack.c.bf16 %v66_v46, %v62_v45  ;;  %v181_v53 = vpack.c.bf16 %v73_v48, %v69_v47  ;;  %v68_v54 = vld [vmem:[%s831_s1 + $0x100] sm:$0xff]  ;;  %v70_v56 = vld [vmem:[%s831_s1 + $0x110] sm:$0xff]  ;;  %v183_v57 = vpack.c.bf16 %v75_v50, %v71_v49  ;;  %v77_v59 = vld [vmem:[%s831_s1 + $0x148] sm:$0xff] }
   0xe   :  { %243 = vmatpush1.bf16.msra.mxu0 %v172_v35  ;;  %v72_v55 = vld [vmem:[%s831_s1 + $0x120] sm:$0xff]  ;;  %v74_v58 = vld [vmem:[%s831_s1 + $0x130] sm:$0xff]  ;;  %v81_v60 = vld [vmem:[%s831_s1 + $0x168] sm:$0xff] }
   0xf   :  { %286 = vmatpush1.bf16.msra.mxu1 %v174_v39  ;;  %244 = vmatprep.subr.bf16.mxu0 %v177_v40  ;;  %v79_v61 = vld [vmem:[%s831_s1 + $0x158] sm:$0xff]  ;;  %v180_v63 = vpack.c.bf16 %v72_v55, %v68_v54  ;;  %v182_v0 = vpack.c.bf16 %v74_v58, %v70_v56  ;;  %v185_v1 = vpack.c.bf16 %v81_v60, %v77_v59  ;;  %v76_v2 = vld [vmem:[%s831_s1 + $0x140] sm:$0xff]  ;;  %v78_v4 = vld [vmem:[%s831_s1 + $0x150] sm:$0xff] }
  0x10   :  { %287 = vmatprep.subr.bf16.mxu1 %v179_v44  ;;  %v83_v62 = vld [vmem:[%s831_s1 + $0x178] sm:$0xff]  ;;  %v80_v3 = vld [vmem:[%s831_s1 + $0x160] sm:$0xff]  ;;  %v82_v6 = vld [vmem:[%s831_s1 + $0x170] sm:$0xff] }
  0x11   :  { %v187_v5 = vpack.c.bf16 %v83_v62, %v79_v61  ;;  %v85_v7 = vld [vmem:[%s831_s1 + $0x188] sm:$0xff]  ;;  %v87_v9 = vld [vmem:[%s831_s1 + $0x198] sm:$0xff]  ;;  %v184_v11 = vpack.c.bf16 %v80_v3, %v76_v2  ;;  %v186_v12 = vpack.c.bf16 %v82_v6, %v78_v4  ;;  %v84_v14 = vld [vmem:[%s831_s1 + $0x180] sm:$0xff] }
  0x12   :  { %245 = vmatpush1.bf16.msra.mxu0 %v176_v51  ;;  %v89_v8 = vld [vmem:[%s831_s1 + $0x1a8] sm:$0xff]  ;;  %v91_v10 = vld [vmem:[%s831_s1 + $0x1b8] sm:$0xff]  ;;  %v88_v15 = vld [vmem:[%s831_s1 + $0x1a0] sm:$0xff] }
  0x13   :  { %288 = vmatpush1.bf16.msra.mxu1 %v178_v52  ;;  %246 = vmatprep.subr.bf16.mxu0 %v181_v53  ;;  %v189_v13 = vpack.c.bf16 %v89_v8, %v85_v7  ;;  %v86_v16 = vld [vmem:[%s831_s1 + $0x190] sm:$0xff]  ;;  %v191_v17 = vpack.c.bf16 %v91_v10, %v87_v9  ;;  %v93_v19 = vld [vmem:[%s831_s1 + $0x1c8] sm:$0xff]  ;;  %v95_v21 = vld [vmem:[%s831_s1 + $0x1d8] sm:$0xff]  ;;  %v188_v23 = vpack.c.bf16 %v88_v15, %v84_v14 }
  0x14   :  { %289 = vmatprep.subr.bf16.mxu1 %v183_v57  ;;  %v90_v18 = vld [vmem:[%s831_s1 + $0x1b0] sm:$0xff]  ;;  %v97_v20 = vld [vmem:[%s831_s1 + $0x1e8] sm:$0xff]  ;;  %v99_v22 = vld [vmem:[%s831_s1 + $0x1f8] sm:$0xff] }
  0x15   :  { %v190_v24 = vpack.c.bf16 %v90_v18, %v86_v16  ;;  %v193_v25 = vpack.c.bf16 %v97_v20, %v93_v19  ;;  %v92_v26 = vld [vmem:[%s831_s1 + $0x1c0] sm:$0xff]  ;;  %v94_v28 = vld [vmem:[%s831_s1 + $0x1d0] sm:$0xff]  ;;  %v195_v29 = vpack.c.bf16 %v99_v22, %v95_v21  ;;  %v101_v31 = vld [vmem:[%s831_s1 + $0x208] sm:$0xff] }
  0x16   :  { %247 = vmatpush1.bf16.msra.mxu0 %v180_v63  ;;  %v96_v27 = vld [vmem:[%s831_s1 + $0x1e0] sm:$0xff]  ;;  %v98_v30 = vld [vmem:[%s831_s1 + $0x1f0] sm:$0xff]  ;;  %v105_v32 = vld [vmem:[%s831_s1 + $0x228] sm:$0xff] }
  0x17   :  { %290 = vmatpush1.bf16.msra.mxu1 %v182_v0  ;;  %248 = vmatprep.subr.bf16.mxu0 %v185_v1  ;;  %v103_v33 = vld [vmem:[%s831_s1 + $0x218] sm:$0xff]  ;;  %v192_v35 = vpack.c.bf16 %v96_v27, %v92_v26  ;;  %v194_v36 = vpack.c.bf16 %v98_v30, %v94_v28  ;;  %v197_v37 = vpack.c.bf16 %v105_v32, %v101_v31  ;;  %v100_v38 = vld [vmem:[%s831_s1 + $0x200] sm:$0xff]  ;;  %v102_v40 = vld [vmem:[%s831_s1 + $0x210] sm:$0xff] }
  0x18   :  { %291 = vmatprep.subr.bf16.mxu1 %v187_v5  ;;  %v107_v34 = vld [vmem:[%s831_s1 + $0x238] sm:$0xff]  ;;  %v104_v39 = vld [vmem:[%s831_s1 + $0x220] sm:$0xff]  ;;  %v106_v42 = vld [vmem:[%s831_s1 + $0x230] sm:$0xff] }
  0x19   :  { %v199_v41 = vpack.c.bf16 %v107_v34, %v103_v33  ;;  %v109_v43 = vld [vmem:[%s831_s1 + $0x248] sm:$0xff]  ;;  %v111_v45 = vld [vmem:[%s831_s1 + $0x258] sm:$0xff]  ;;  %v196_v47 = vpack.c.bf16 %v104_v39, %v100_v38  ;;  %v198_v48 = vpack.c.bf16 %v106_v42, %v102_v40  ;;  %v108_v50 = vld [vmem:[%s831_s1 + $0x240] sm:$0xff] }
  0x1a   :  { %249 = vmatpush1.bf16.msra.mxu0 %v184_v11  ;;  %v113_v44 = vld [vmem:[%s831_s1 + $0x268] sm:$0xff]  ;;  %v115_v46 = vld [vmem:[%s831_s1 + $0x278] sm:$0xff]  ;;  %v112_v51 = vld [vmem:[%s831_s1 + $0x260] sm:$0xff] }
  0x1b   :  { %292 = vmatpush1.bf16.msra.mxu1 %v186_v12  ;;  %250 = vmatprep.subr.bf16.mxu0 %v189_v13  ;;  %v201_v49 = vpack.c.bf16 %v113_v44, %v109_v43  ;;  %v110_v52 = vld [vmem:[%s831_s1 + $0x250] sm:$0xff]  ;;  %v203_v53 = vpack.c.bf16 %v115_v46, %v111_v45  ;;  %v117_v55 = vld [vmem:[%s831_s1 + $0x288] sm:$0xff]  ;;  %v119_v57 = vld [vmem:[%s831_s1 + $0x298] sm:$0xff]  ;;  %v200_v59 = vpack.c.bf16 %v112_v51, %v108_v50 }
  0x1c   :  { %293 = vmatprep.subr.bf16.mxu1 %v191_v17  ;;  %v114_v54 = vld [vmem:[%s831_s1 + $0x270] sm:$0xff]  ;;  %v121_v56 = vld [vmem:[%s831_s1 + $0x2a8] sm:$0xff]  ;;  %v123_v58 = vld [vmem:[%s831_s1 + $0x2b8] sm:$0xff] }
  0x1d   :  { %v202_v60 = vpack.c.bf16 %v114_v54, %v110_v52  ;;  %v205_v61 = vpack.c.bf16 %v121_v56, %v117_v55  ;;  %v116_v62 = vld [vmem:[%s831_s1 + $0x280] sm:$0xff]  ;;  %v118_v0 = vld [vmem:[%s831_s1 + $0x290] sm:$0xff]  ;;  %v207_v1 = vpack.c.bf16 %v123_v58, %v119_v57  ;;  %v125_v3 = vld [vmem:[%s831_s1 + $0x2c8] sm:$0xff] }
  0x1e   :  { %251 = vmatpush1.bf16.msra.mxu0 %v188_v23  ;;  %v120_v63 = vld [vmem:[%s831_s1 + $0x2a0] sm:$0xff]  ;;  %v122_v2 = vld [vmem:[%s831_s1 + $0x2b0] sm:$0xff]  ;;  %v129_v4 = vld [vmem:[%s831_s1 + $0x2e8] sm:$0xff] }
  0x1f   :  { %294 = vmatpush1.bf16.msra.mxu1 %v190_v24  ;;  %252 = vmatprep.subr.bf16.mxu0 %v193_v25  ;;  %v127_v5 = vld [vmem:[%s831_s1 + $0x2d8] sm:$0xff]  ;;  %v204_v7 = vpack.c.bf16 %v120_v63, %v116_v62  ;;  %v124_v8 = vld [vmem:[%s831_s1 + $0x2c0] sm:$0xff]  ;;  %v206_v10 = vpack.c.bf16 %v122_v2, %v118_v0  ;;  %v209_v11 = vpack.c.bf16 %v129_v4, %v125_v3  ;;  %v126_v12 = vld [vmem:[%s831_s1 + $0x2d0] sm:$0xff] }
  0x20   :  { %295 = vmatprep.subr.bf16.mxu1 %v195_v29  ;;  %v131_v6 = vld [vmem:[%s831_s1 + $0x2f8] sm:$0xff]  ;;  %v128_v9 = vld [vmem:[%s831_s1 + $0x2e0] sm:$0xff]  ;;  %v130_v13 = vld [vmem:[%s831_s1 + $0x2f0] sm:$0xff] }
  0x21   :  { %v133_v14 = vld [vmem:[%s831_s1 + $0x308] sm:$0xff]  ;;  %v211_v15 = vpack.c.bf16 %v131_v6, %v127_v5  ;;  %v135_v17 = vld [vmem:[%s831_s1 + $0x318] sm:$0xff]  ;;  %v208_v20 = vpack.c.bf16 %v128_v9, %v124_v8  ;;  %v351_v21 = vld [vmem:[%s833_s2] sm:$0xff]  ;;  %v210_v22 = vpack.c.bf16 %v130_v13, %v126_v12 }
  0x22   :  { %253 = vmatpush1.bf16.msra.mxu0 %v192_v35  ;;  %v137_v16 = vld [vmem:[%s831_s1 + $0x328] sm:$0xff]  ;;  %v139_v18 = vld [vmem:[%s831_s1 + $0x338] sm:$0xff]  ;;  %v132_v24 = vld [vmem:[%s831_s1 + $0x300] sm:$0xff]  ;;  %355 = vperm.xlu0 %386, %v351_v21  }
  0x23   :  { %296 = vmatpush1.bf16.msra.mxu1 %v194_v36  ;;  %254 = vmatprep.subr.bf16.mxu0 %v197_v37  ;;  %v389_v19 = vld [vmem:[%s832_s0 + $0x4] ss:$8 sps:$4 sm:$0xff]   ;;  %v213_v23 = vpack.c.bf16 %v137_v16, %v133_v14  ;;  %v134_v26 = vld [vmem:[%s831_s1 + $0x310] sm:$0xff]  ;;  %v215_v27 = vpack.c.bf16 %v139_v18, %v135_v17  ;;  %v143_v31 = vld [vmem:[%s831_s1 + $0x358] sm:$0xff] }
  0x24   :  { %297 = vmatprep.subr.bf16.mxu1 %v199_v41  ;;  %v136_v25 = vld [vmem:[%s831_s1 + $0x320] sm:$0xff]  ;;  %v138_v28 = vld [vmem:[%s831_s1 + $0x330] sm:$0xff]  ;;  %v141_v29 = vld [vmem:[%s831_s1 + $0x348] sm:$0xff]  ;;  %270 = vmatprep.mubr.bf16.mxu0 %v389_v19 }
  0x25   :  { %v145_v30 = vld [vmem:[%s831_s1 + $0x368] sm:$0xff]  ;;  %v147_v32 = vld [vmem:[%s831_s1 + $0x378] sm:$0xff]  ;;  %313 = vmatprep.mubr.bf16.mxu1 %v389_v19  ;;  %v212_v33 = vpack.c.bf16 %v136_v25, %v132_v24  ;;  %v214_v35 = vpack.c.bf16 %v138_v28, %v134_v26  ;;  %v140_v37 = vld [vmem:[%s831_s1 + $0x340] sm:$0xff] }
  0x26   :  { %255 = vmatpush1.bf16.msra.mxu0 %v196_v47  ;;  %v352_v34 = vld [vmem:[%s833_s2 + $0x8] sm:$0xff]  ;;  %v217_v36 = vpack.c.bf16 %v145_v30, %v141_v29  ;;  %v144_v38 = vld [vmem:[%s831_s1 + $0x360] sm:$0xff]  ;;  %v142_v39 = vld [vmem:[%s831_s1 + $0x350] sm:$0xff]  ;;  %v219_v40 = vpack.c.bf16 %v147_v32, %v143_v31 }
  0x27   :  { %298 = vmatpush1.bf16.msra.mxu1 %v198_v48  ;;  %256 = vmatprep.subr.bf16.mxu0 %v201_v49  ;;  %v146_v41 = vld [vmem:[%s831_s1 + $0x370] sm:$0xff]  ;;  %v149_v42 = vld [vmem:[%s831_s1 + $0x388] sm:$0xff]  ;;  %v151_v44 = vld [vmem:[%s831_s1 + $0x398] sm:$0xff]  ;;  %v216_v46 = vpack.c.bf16 %v144_v38, %v140_v37 }
  0x28   :  { %299 = vmatprep.subr.bf16.mxu1 %v203_v53  ;;  %v153_v43 = vld [vmem:[%s831_s1 + $0x3a8] sm:$0xff]  ;;  %v155_v45 = vld [vmem:[%s831_s1 + $0x3b8] sm:$0xff]  ;;  %360 = vperm.xlu0 %386, %v352_v34   ;;  %v218_v47 = vpack.c.bf16 %v146_v41, %v142_v39  ;;  %v148_v49 = vld [vmem:[%s831_s1 + $0x380] sm:$0xff] }
  0x29   :  { %v221_v48 = vpack.c.bf16 %v153_v43, %v149_v42  ;;  %v152_v50 = vld [vmem:[%s831_s1 + $0x3a0] sm:$0xff]  ;;  %v150_v51 = vld [vmem:[%s831_s1 + $0x390] sm:$0xff]  ;;  %v223_v52 = vpack.c.bf16 %v155_v45, %v151_v44  ;;  %v157_v54 = vld [vmem:[%s831_s1 + $0x3c8] sm:$0xff] }
  0x2a   :  { %257 = vmatpush1.bf16.msra.mxu0 %v200_v59  ;;  %v154_v53 = vld [vmem:[%s831_s1 + $0x3b0] sm:$0xff]  ;;  %v161_v55 = vld [vmem:[%s831_s1 + $0x3e8] sm:$0xff]  ;;  %v159_v56 = vld [vmem:[%s831_s1 + $0x3d8] sm:$0xff]  ;;  %v220_v58 = vpack.c.bf16 %v152_v50, %v148_v49 }
  0x2b   :  { %300 = vmatpush1.bf16.msra.mxu1 %v202_v60  ;;  %258 = vmatprep.subr.bf16.mxu0 %v205_v61  ;;  %v163_v57 = vld [vmem:[%s831_s1 + $0x3f8] sm:$0xff]  ;;  %v222_v59 = vpack.c.bf16 %v154_v53, %v150_v51  ;;  %v225_v60 = vpack.c.bf16 %v161_v55, %v157_v54  ;;  %v156_v61 = vld [vmem:[%s831_s1 + $0x3c0] sm:$0xff]  ;;  %v158_v0 = vld [vmem:[%s831_s1 + $0x3d0] sm:$0xff] }
  0x2c   :  { %301 = vmatprep.subr.bf16.mxu1 %v207_v1  ;;  %v160_v62 = vld [vmem:[%s831_s1 + $0x3e0] sm:$0xff]  ;;  %v227_v63 = vpack.c.bf16 %v163_v57, %v159_v56  ;;  %v162_v1 = vld [vmem:[%s831_s1 + $0x3f0] sm:$0xff] }
  0x2d   :  { %v224_v2 = vpack.c.bf16 %v160_v62, %v156_v61  ;;  %v226_v3 = vpack.c.bf16 %v162_v1, %v158_v0  ;;  %v387_v4 = vld [vmem:[%s832_s0] ss:$8 sps:$4 sm:$0xff]  }
  0x2e   :  { %259 = vmatpush1.bf16.msra.mxu0 %v204_v7 }
  0x2f   :  { %302 = vmatpush1.bf16.msra.mxu1 %v206_v10  ;;  %260 = vmatprep.subr.bf16.mxu0 %v209_v11 }
  0x30   :  { %303 = vmatprep.subr.bf16.mxu1 %v211_v15 }
  0x32   :  { %261 = vmatpush1.bf16.msra.mxu0 %v208_v20 }
  0x33   :  { %304 = vmatpush1.bf16.msra.mxu1 %v210_v22  ;;  %262 = vmatprep.subr.bf16.mxu0 %v213_v23 }
  0x34   :  { %305 = vmatprep.subr.bf16.mxu1 %v215_v27 }
  0x36   :  { %263 = vmatpush1.bf16.msra.mxu0 %v212_v33 }
  0x37   :  { %306 = vmatpush1.bf16.msra.mxu1 %v214_v35  ;;  %264 = vmatprep.subr.bf16.mxu0 %v217_v36 }
  0x38   :  { %307 = vmatprep.subr.bf16.mxu1 %v219_v40 }
  0x3a   :  { %265 = vmatpush1.bf16.msra.mxu0 %v216_v46 }
  0x3b   :  { %308 = vmatpush1.bf16.msra.mxu1 %v218_v47  ;;  %266 = vmatprep.subr.bf16.mxu0 %v221_v48 }
  0x3c   :  { %309 = vmatprep.subr.bf16.mxu1 %v223_v52 }
  0x3e   :  { %267 = vmatpush1.bf16.msra.mxu0 %v220_v58 }
  0x3f   :  { %310 = vmatpush1.bf16.msra.mxu1 %v222_v59  ;;  %268 = vmatprep.subr.bf16.mxu0 %v225_v60 }
  0x40   :  { %311 = vmatprep.subr.bf16.mxu1 %v227_v63 }
  0x42   :  { %269 = vmatpush1.bf16.msra.mxu0 %v224_v2 }
  0x43   :  { %312 = vmatpush1.bf16.msra.mxu1 %v226_v3 }
  0x45   :  { %271 = vmatmul.mubr.bf16.vlgmr.msra.gmra.mrb[0].mxu0 %v387_v4 }
  0x46   :  { %314 = vmatmul.mubr.bf16.vlgmr.msra.gmra.mrb[0].mxu1 %v387_v4 }
  0xa1   :  { %v356_v5 = vpop.permute.xlu0 %355 }
  0xa7   :  { %v361_v6 = vpop.permute.xlu0 %360 }
 0x118   :  { %v272_v7 = vpop.f32.mrb[0].mxu0 }
 0x119   :  { %v363_v8 = vadd.f32 %v356_v5, %v272_v7  ;;  %v315_v9 = vpop.f32.mrb[0].mxu1  ;;  %v274_v10 = vpop.f32.mrb[1].mxu0 }
 0x11a   :  { %v365_v11 = vadd.f32 %v356_v5, %v315_v9  ;;  %v364_v12 = vadd.f32 %v356_v5, %v274_v10  ;;  %v317_v13 = vpop.f32.mrb[1].mxu1  ;;  %v276_v14 = vpop.f32.mrb[2].mxu0 }
 0x11b   :  { %371 = vst [vmem:[%s834_s3] sm:$0xff] %v363_v8  ;;  %v366_v15 = vadd.f32 %v356_v5, %v317_v13  ;;  %v367_v16 = vadd.f32 %v361_v6, %v276_v14  ;;  %v319_v17 = vpop.f32.mrb[2].mxu1  ;;  %v278_v18 = vpop.f32.mrb[3].mxu0 }
 0x11c   :  { %373 = vst [vmem:[%s834_s3 + $0x10] sm:$0xff] %v365_v11  ;;  %372 = vst [vmem:[%s834_s3 + $0x8] sm:$0xff] %v364_v12  ;;  %v369_v19 = vadd.f32 %v361_v6, %v319_v17  ;;  %v368_v20 = vadd.f32 %v361_v6, %v278_v18  ;;  %v321_v21 = vpop.f32.mrb[3].mxu1 }
 0x11d   :  { %374 = vst [vmem:[%s834_s3 + $0x18] sm:$0xff] %v366_v15  ;;  %375 = vst [vmem:[%s834_s3 + $0x20] sm:$0xff] %v367_v16  ;;  %v370_v22 = vadd.f32 %v361_v6, %v321_v21 }
 0x11e   :  { %377 = vst [vmem:[%s834_s3 + $0x30] sm:$0xff] %v369_v19  ;;  %376 = vst [vmem:[%s834_s3 + $0x28] sm:$0xff] %v368_v20 }
 0x11f   :  { %378 = vst [vmem:[%s834_s3 + $0x38] sm:$0xff] %v370_v22 }

// kernel: encoder_forward.37
= control target key start
LH: loop header
LB: loop body
LE: loop exit
PB: predicated region body
PF: predicated region fallthrough
CT: control target
= control target key end

     0   :  { %v409_v3 = vmov 0   ;;  %s879_s1 = inlined_call_operand.vmem [shape: f32[256,512], index: 1, kind: input, shape index: {}]   ;;  %s880_s0 = inlined_call_operand.vmem [shape: bf16[16,256], index: 0, kind: input, shape index: {}]   ;;  %s881_s2 = inlined_call_operand.vmem [shape: f32[16,1], index: 2, kind: input, shape index: {}]   ;;  %s882_s3 = inlined_call_operand.vmem [shape: f32[16,512], index: 3, kind: input, shape index: {}]   ;;  %s883_s4 = inlined_call_operand.vmem [shape: f32[16,512], index: 4, kind: output, shape index: {}]  }
   0x1   :  { %v40_v0 = vld [vmem:[%s879_s1 + $0x8] sm:$0xff]  ;;  %v42_v2 = vld [vmem:[%s879_s1 + $0x18] sm:$0xff]  ;;  %405 = vset.pattern.permute.xlu0 %v409_v3  ;;  %v39_v6 = vld [vmem:[%s879_s1] sm:$0xff] }
   0x2   :  { %v44_v1 = vld [vmem:[%s879_s1 + $0x28] sm:$0xff]  ;;  %v46_v5 = vld [vmem:[%s879_s1 + $0x38] sm:$0xff]  ;;  %v43_v7 = vld [vmem:[%s879_s1 + $0x20] sm:$0xff] }
   0x3   :  { %v168_v4 = vpack.c.bf16 %v44_v1, %v40_v0  ;;  %v170_v8 = vpack.c.bf16 %v46_v5, %v42_v2  ;;  %v167_v9 = vpack.c.bf16 %v43_v7, %v39_v6  ;;  %v41_v10 = vld [vmem:[%s879_s1 + $0x10] sm:$0xff]  ;;  %v48_v12 = vld [vmem:[%s879_s1 + $0x48] sm:$0xff]  ;;  %v50_v15 = vld [vmem:[%s879_s1 + $0x58] sm:$0xff] }
   0x4   :  { %v45_v11 = vld [vmem:[%s879_s1 + $0x30] sm:$0xff]  ;;  %v52_v14 = vld [vmem:[%s879_s1 + $0x68] sm:$0xff]  ;;  %v54_v16 = vld [vmem:[%s879_s1 + $0x78] sm:$0xff] }
   0x5   :  { %241 = vmatprep.subr.bf16.mxu0 %v168_v4  ;;  %v169_v13 = vpack.c.bf16 %v45_v11, %v41_v10  ;;  %284 = vmatprep.subr.bf16.mxu1 %v170_v8  ;;  %v172_v17 = vpack.c.bf16 %v52_v14, %v48_v12  ;;  %v174_v18 = vpack.c.bf16 %v54_v16, %v50_v15  ;;  %v47_v19 = vld [vmem:[%s879_s1 + $0x40] sm:$0xff]  ;;  %v49_v21 = vld [vmem:[%s879_s1 + $0x50] sm:$0xff]  ;;  %v56_v24 = vld [vmem:[%s879_s1 + $0x88] sm:$0xff] }
   0x6   :  { %242 = vmatpush1.bf16.msra.mxu0 %v167_v9  ;;  %v51_v20 = vld [vmem:[%s879_s1 + $0x60] sm:$0xff]  ;;  %v53_v23 = vld [vmem:[%s879_s1 + $0x70] sm:$0xff]  ;;  %v60_v25 = vld [vmem:[%s879_s1 + $0xa8] sm:$0xff] }
   0x7   :  { %285 = vmatpush1.bf16.msra.mxu1 %v169_v13  ;;  %v171_v22 = vpack.c.bf16 %v51_v20, %v47_v19  ;;  %243 = vmatprep.subr.bf16.mxu0 %v172_v17  ;;  %v173_v26 = vpack.c.bf16 %v53_v23, %v49_v21  ;;  %v176_v27 = vpack.c.bf16 %v60_v25, %v56_v24  ;;  %v58_v28 = vld [vmem:[%s879_s1 + $0x98] sm:$0xff]  ;;  %v55_v30 = vld [vmem:[%s879_s1 + $0x80] sm:$0xff]  ;;  %v57_v33 = vld [vmem:[%s879_s1 + $0x90] sm:$0xff] }
   0x8   :  { %286 = vmatprep.subr.bf16.mxu1 %v174_v18  ;;  %v62_v29 = vld [vmem:[%s879_s1 + $0xb8] sm:$0xff]  ;;  %v59_v32 = vld [vmem:[%s879_s1 + $0xa0] sm:$0xff]  ;;  %v61_v34 = vld [vmem:[%s879_s1 + $0xb0] sm:$0xff] }
   0x9   :  { %v178_v31 = vpack.c.bf16 %v62_v29, %v58_v28  ;;  %v175_v35 = vpack.c.bf16 %v59_v32, %v55_v30  ;;  %v64_v36 = vld [vmem:[%s879_s1 + $0xc8] sm:$0xff]  ;;  %v66_v38 = vld [vmem:[%s879_s1 + $0xd8] sm:$0xff]  ;;  %v177_v39 = vpack.c.bf16 %v61_v34, %v57_v33  ;;  %v63_v42 = vld [vmem:[%s879_s1 + $0xc0] sm:$0xff] }
   0xa   :  { %244 = vmatpush1.bf16.msra.mxu0 %v171_v22  ;;  %v68_v37 = vld [vmem:[%s879_s1 + $0xe8] sm:$0xff]  ;;  %v70_v41 = vld [vmem:[%s879_s1 + $0xf8] sm:$0xff]  ;;  %v67_v43 = vld [vmem:[%s879_s1 + $0xe0] sm:$0xff] }
   0xb   :  { %287 = vmatpush1.bf16.msra.mxu1 %v173_v26  ;;  %245 = vmatprep.subr.bf16.mxu0 %v176_v27  ;;  %v180_v40 = vpack.c.bf16 %v68_v37, %v64_v36  ;;  %v182_v44 = vpack.c.bf16 %v70_v41, %v66_v38  ;;  %v65_v45 = vld [vmem:[%s879_s1 + $0xd0] sm:$0xff]  ;;  %v72_v47 = vld [vmem:[%s879_s1 + $0x108] sm:$0xff]  ;;  %v74_v49 = vld [vmem:[%s879_s1 + $0x118] sm:$0xff]  ;;  %v179_v51 = vpack.c.bf16 %v67_v43, %v63_v42 }
   0xc   :  { %288 = vmatprep.subr.bf16.mxu1 %v178_v31  ;;  %v69_v46 = vld [vmem:[%s879_s1 + $0xf0] sm:$0xff]  ;;  %v76_v48 = vld [vmem:[%s879_s1 + $0x128] sm:$0xff]  ;;  %v78_v50 = vld [vmem:[%s879_s1 + $0x138] sm:$0xff] }
   0xd   :  { %v181_v52 = vpack.c.bf16 %v69_v46, %v65_v45  ;;  %v184_v53 = vpack.c.bf16 %v76_v48, %v72_v47  ;;  %v71_v54 = vld [vmem:[%s879_s1 + $0x100] sm:$0xff]  ;;  %v73_v56 = vld [vmem:[%s879_s1 + $0x110] sm:$0xff]  ;;  %v186_v57 = vpack.c.bf16 %v78_v50, %v74_v49  ;;  %v80_v59 = vld [vmem:[%s879_s1 + $0x148] sm:$0xff] }
   0xe   :  { %246 = vmatpush1.bf16.msra.mxu0 %v175_v35  ;;  %v75_v55 = vld [vmem:[%s879_s1 + $0x120] sm:$0xff]  ;;  %v77_v58 = vld [vmem:[%s879_s1 + $0x130] sm:$0xff]  ;;  %v84_v60 = vld [vmem:[%s879_s1 + $0x168] sm:$0xff] }
   0xf   :  { %289 = vmatpush1.bf16.msra.mxu1 %v177_v39  ;;  %247 = vmatprep.subr.bf16.mxu0 %v180_v40  ;;  %v82_v61 = vld [vmem:[%s879_s1 + $0x158] sm:$0xff]  ;;  %v183_v63 = vpack.c.bf16 %v75_v55, %v71_v54  ;;  %v185_v0 = vpack.c.bf16 %v77_v58, %v73_v56  ;;  %v188_v1 = vpack.c.bf16 %v84_v60, %v80_v59  ;;  %v79_v2 = vld [vmem:[%s879_s1 + $0x140] sm:$0xff]  ;;  %v81_v4 = vld [vmem:[%s879_s1 + $0x150] sm:$0xff] }
  0x10   :  { %290 = vmatprep.subr.bf16.mxu1 %v182_v44  ;;  %v86_v62 = vld [vmem:[%s879_s1 + $0x178] sm:$0xff]  ;;  %v83_v3 = vld [vmem:[%s879_s1 + $0x160] sm:$0xff]  ;;  %v85_v6 = vld [vmem:[%s879_s1 + $0x170] sm:$0xff] }
  0x11   :  { %v190_v5 = vpack.c.bf16 %v86_v62, %v82_v61  ;;  %v88_v7 = vld [vmem:[%s879_s1 + $0x188] sm:$0xff]  ;;  %v90_v9 = vld [vmem:[%s879_s1 + $0x198] sm:$0xff]  ;;  %v187_v11 = vpack.c.bf16 %v83_v3, %v79_v2  ;;  %v189_v12 = vpack.c.bf16 %v85_v6, %v81_v4  ;;  %v87_v14 = vld [vmem:[%s879_s1 + $0x180] sm:$0xff] }
  0x12   :  { %248 = vmatpush1.bf16.msra.mxu0 %v179_v51  ;;  %v92_v8 = vld [vmem:[%s879_s1 + $0x1a8] sm:$0xff]  ;;  %v94_v10 = vld [vmem:[%s879_s1 + $0x1b8] sm:$0xff]  ;;  %v91_v15 = vld [vmem:[%s879_s1 + $0x1a0] sm:$0xff] }
  0x13   :  { %291 = vmatpush1.bf16.msra.mxu1 %v181_v52  ;;  %249 = vmatprep.subr.bf16.mxu0 %v184_v53  ;;  %v192_v13 = vpack.c.bf16 %v92_v8, %v88_v7  ;;  %v89_v16 = vld [vmem:[%s879_s1 + $0x190] sm:$0xff]  ;;  %v194_v17 = vpack.c.bf16 %v94_v10, %v90_v9  ;;  %v96_v19 = vld [vmem:[%s879_s1 + $0x1c8] sm:$0xff]  ;;  %v98_v21 = vld [vmem:[%s879_s1 + $0x1d8] sm:$0xff]  ;;  %v191_v23 = vpack.c.bf16 %v91_v15, %v87_v14 }
  0x14   :  { %292 = vmatprep.subr.bf16.mxu1 %v186_v57  ;;  %v93_v18 = vld [vmem:[%s879_s1 + $0x1b0] sm:$0xff]  ;;  %v100_v20 = vld [vmem:[%s879_s1 + $0x1e8] sm:$0xff]  ;;  %v102_v22 = vld [vmem:[%s879_s1 + $0x1f8] sm:$0xff] }
  0x15   :  { %v193_v24 = vpack.c.bf16 %v93_v18, %v89_v16  ;;  %v196_v25 = vpack.c.bf16 %v100_v20, %v96_v19  ;;  %v95_v26 = vld [vmem:[%s879_s1 + $0x1c0] sm:$0xff]  ;;  %v97_v28 = vld [vmem:[%s879_s1 + $0x1d0] sm:$0xff]  ;;  %v198_v29 = vpack.c.bf16 %v102_v22, %v98_v21  ;;  %v104_v31 = vld [vmem:[%s879_s1 + $0x208] sm:$0xff] }
  0x16   :  { %250 = vmatpush1.bf16.msra.mxu0 %v183_v63  ;;  %v99_v27 = vld [vmem:[%s879_s1 + $0x1e0] sm:$0xff]  ;;  %v101_v30 = vld [vmem:[%s879_s1 + $0x1f0] sm:$0xff]  ;;  %v108_v32 = vld [vmem:[%s879_s1 + $0x228] sm:$0xff] }
  0x17   :  { %293 = vmatpush1.bf16.msra.mxu1 %v185_v0  ;;  %251 = vmatprep.subr.bf16.mxu0 %v188_v1  ;;  %v106_v33 = vld [vmem:[%s879_s1 + $0x218] sm:$0xff]  ;;  %v195_v35 = vpack.c.bf16 %v99_v27, %v95_v26  ;;  %v197_v36 = vpack.c.bf16 %v101_v30, %v97_v28  ;;  %v200_v37 = vpack.c.bf16 %v108_v32, %v104_v31  ;;  %v103_v38 = vld [vmem:[%s879_s1 + $0x200] sm:$0xff]  ;;  %v105_v40 = vld [vmem:[%s879_s1 + $0x210] sm:$0xff] }
  0x18   :  { %294 = vmatprep.subr.bf16.mxu1 %v190_v5  ;;  %v110_v34 = vld [vmem:[%s879_s1 + $0x238] sm:$0xff]  ;;  %v107_v39 = vld [vmem:[%s879_s1 + $0x220] sm:$0xff]  ;;  %v109_v42 = vld [vmem:[%s879_s1 + $0x230] sm:$0xff] }
  0x19   :  { %v202_v41 = vpack.c.bf16 %v110_v34, %v106_v33  ;;  %v112_v43 = vld [vmem:[%s879_s1 + $0x248] sm:$0xff]  ;;  %v114_v45 = vld [vmem:[%s879_s1 + $0x258] sm:$0xff]  ;;  %v199_v47 = vpack.c.bf16 %v107_v39, %v103_v38  ;;  %v201_v48 = vpack.c.bf16 %v109_v42, %v105_v40  ;;  %v111_v50 = vld [vmem:[%s879_s1 + $0x240] sm:$0xff] }
  0x1a   :  { %252 = vmatpush1.bf16.msra.mxu0 %v187_v11  ;;  %v116_v44 = vld [vmem:[%s879_s1 + $0x268] sm:$0xff]  ;;  %v118_v46 = vld [vmem:[%s879_s1 + $0x278] sm:$0xff]  ;;  %v115_v51 = vld [vmem:[%s879_s1 + $0x260] sm:$0xff] }
  0x1b   :  { %295 = vmatpush1.bf16.msra.mxu1 %v189_v12  ;;  %253 = vmatprep.subr.bf16.mxu0 %v192_v13  ;;  %v204_v49 = vpack.c.bf16 %v116_v44, %v112_v43  ;;  %v113_v52 = vld [vmem:[%s879_s1 + $0x250] sm:$0xff]  ;;  %v206_v53 = vpack.c.bf16 %v118_v46, %v114_v45  ;;  %v120_v55 = vld [vmem:[%s879_s1 + $0x288] sm:$0xff]  ;;  %v122_v57 = vld [vmem:[%s879_s1 + $0x298] sm:$0xff]  ;;  %v203_v59 = vpack.c.bf16 %v115_v51, %v111_v50 }
  0x1c   :  { %296 = vmatprep.subr.bf16.mxu1 %v194_v17  ;;  %v117_v54 = vld [vmem:[%s879_s1 + $0x270] sm:$0xff]  ;;  %v124_v56 = vld [vmem:[%s879_s1 + $0x2a8] sm:$0xff]  ;;  %v126_v58 = vld [vmem:[%s879_s1 + $0x2b8] sm:$0xff] }
  0x1d   :  { %v205_v60 = vpack.c.bf16 %v117_v54, %v113_v52  ;;  %v208_v61 = vpack.c.bf16 %v124_v56, %v120_v55  ;;  %v119_v62 = vld [vmem:[%s879_s1 + $0x280] sm:$0xff]  ;;  %v121_v0 = vld [vmem:[%s879_s1 + $0x290] sm:$0xff]  ;;  %v210_v1 = vpack.c.bf16 %v126_v58, %v122_v57  ;;  %v128_v3 = vld [vmem:[%s879_s1 + $0x2c8] sm:$0xff] }
  0x1e   :  { %254 = vmatpush1.bf16.msra.mxu0 %v191_v23  ;;  %v123_v63 = vld [vmem:[%s879_s1 + $0x2a0] sm:$0xff]  ;;  %v125_v2 = vld [vmem:[%s879_s1 + $0x2b0] sm:$0xff]  ;;  %v132_v4 = vld [vmem:[%s879_s1 + $0x2e8] sm:$0xff] }
  0x1f   :  { %297 = vmatpush1.bf16.msra.mxu1 %v193_v24  ;;  %255 = vmatprep.subr.bf16.mxu0 %v196_v25  ;;  %v130_v5 = vld [vmem:[%s879_s1 + $0x2d8] sm:$0xff]  ;;  %v207_v7 = vpack.c.bf16 %v123_v63, %v119_v62  ;;  %v127_v8 = vld [vmem:[%s879_s1 + $0x2c0] sm:$0xff]  ;;  %v209_v10 = vpack.c.bf16 %v125_v2, %v121_v0  ;;  %v212_v11 = vpack.c.bf16 %v132_v4, %v128_v3  ;;  %v129_v12 = vld [vmem:[%s879_s1 + $0x2d0] sm:$0xff] }
  0x20   :  { %298 = vmatprep.subr.bf16.mxu1 %v198_v29  ;;  %v134_v6 = vld [vmem:[%s879_s1 + $0x2f8] sm:$0xff]  ;;  %v131_v9 = vld [vmem:[%s879_s1 + $0x2e0] sm:$0xff]  ;;  %v133_v13 = vld [vmem:[%s879_s1 + $0x2f0] sm:$0xff] }
  0x21   :  { %v136_v14 = vld [vmem:[%s879_s1 + $0x308] sm:$0xff]  ;;  %v214_v15 = vpack.c.bf16 %v134_v6, %v130_v5  ;;  %v138_v17 = vld [vmem:[%s879_s1 + $0x318] sm:$0xff]  ;;  %v211_v20 = vpack.c.bf16 %v131_v9, %v127_v8  ;;  %v354_v21 = vld [vmem:[%s881_s2] sm:$0xff]  ;;  %v213_v22 = vpack.c.bf16 %v133_v13, %v129_v12 }
  0x22   :  { %256 = vmatpush1.bf16.msra.mxu0 %v195_v35  ;;  %v140_v16 = vld [vmem:[%s879_s1 + $0x328] sm:$0xff]  ;;  %v142_v18 = vld [vmem:[%s879_s1 + $0x338] sm:$0xff]  ;;  %v135_v24 = vld [vmem:[%s879_s1 + $0x300] sm:$0xff]  ;;  %358 = vperm.xlu0 %405, %v354_v21  }
  0x23   :  { %299 = vmatpush1.bf16.msra.mxu1 %v197_v36  ;;  %257 = vmatprep.subr.bf16.mxu0 %v200_v37  ;;  %v408_v19 = vld [vmem:[%s880_s0 + $0x4] ss:$8 sps:$4 sm:$0xff]   ;;  %v216_v23 = vpack.c.bf16 %v140_v16, %v136_v14  ;;  %v137_v26 = vld [vmem:[%s879_s1 + $0x310] sm:$0xff]  ;;  %v218_v27 = vpack.c.bf16 %v142_v18, %v138_v17  ;;  %v146_v31 = vld [vmem:[%s879_s1 + $0x358] sm:$0xff] }
  0x24   :  { %300 = vmatprep.subr.bf16.mxu1 %v202_v41  ;;  %v139_v25 = vld [vmem:[%s879_s1 + $0x320] sm:$0xff]  ;;  %v141_v28 = vld [vmem:[%s879_s1 + $0x330] sm:$0xff]  ;;  %v144_v29 = vld [vmem:[%s879_s1 + $0x348] sm:$0xff]  ;;  %273 = vmatprep.mubr.bf16.mxu0 %v408_v19 }
  0x25   :  { %v148_v30 = vld [vmem:[%s879_s1 + $0x368] sm:$0xff]  ;;  %v150_v32 = vld [vmem:[%s879_s1 + $0x378] sm:$0xff]  ;;  %316 = vmatprep.mubr.bf16.mxu1 %v408_v19  ;;  %v215_v33 = vpack.c.bf16 %v139_v25, %v135_v24  ;;  %v217_v35 = vpack.c.bf16 %v141_v28, %v137_v26  ;;  %v143_v37 = vld [vmem:[%s879_s1 + $0x340] sm:$0xff] }
  0x26   :  { %258 = vmatpush1.bf16.msra.mxu0 %v199_v47  ;;  %v355_v34 = vld [vmem:[%s881_s2 + $0x8] sm:$0xff]  ;;  %v220_v36 = vpack.c.bf16 %v148_v30, %v144_v29  ;;  %v147_v38 = vld [vmem:[%s879_s1 + $0x360] sm:$0xff]  ;;  %v145_v39 = vld [vmem:[%s879_s1 + $0x350] sm:$0xff]  ;;  %v222_v40 = vpack.c.bf16 %v150_v32, %v146_v31 }
  0x27   :  { %301 = vmatpush1.bf16.msra.mxu1 %v201_v48  ;;  %259 = vmatprep.subr.bf16.mxu0 %v204_v49  ;;  %v149_v41 = vld [vmem:[%s879_s1 + $0x370] sm:$0xff]  ;;  %v152_v42 = vld [vmem:[%s879_s1 + $0x388] sm:$0xff]  ;;  %v154_v44 = vld [vmem:[%s879_s1 + $0x398] sm:$0xff]  ;;  %v219_v46 = vpack.c.bf16 %v147_v38, %v143_v37 }
  0x28   :  { %302 = vmatprep.subr.bf16.mxu1 %v206_v53  ;;  %v156_v43 = vld [vmem:[%s879_s1 + $0x3a8] sm:$0xff]  ;;  %v158_v45 = vld [vmem:[%s879_s1 + $0x3b8] sm:$0xff]  ;;  %363 = vperm.xlu0 %405, %v355_v34   ;;  %v221_v47 = vpack.c.bf16 %v149_v41, %v145_v39  ;;  %v151_v49 = vld [vmem:[%s879_s1 + $0x380] sm:$0xff] }
  0x29   :  { %v224_v48 = vpack.c.bf16 %v156_v43, %v152_v42  ;;  %v155_v50 = vld [vmem:[%s879_s1 + $0x3a0] sm:$0xff]  ;;  %v153_v51 = vld [vmem:[%s879_s1 + $0x390] sm:$0xff]  ;;  %v226_v52 = vpack.c.bf16 %v158_v45, %v154_v44  ;;  %v160_v54 = vld [vmem:[%s879_s1 + $0x3c8] sm:$0xff] }
  0x2a   :  { %260 = vmatpush1.bf16.msra.mxu0 %v203_v59  ;;  %v157_v53 = vld [vmem:[%s879_s1 + $0x3b0] sm:$0xff]  ;;  %v164_v55 = vld [vmem:[%s879_s1 + $0x3e8] sm:$0xff]  ;;  %v162_v56 = vld [vmem:[%s879_s1 + $0x3d8] sm:$0xff]  ;;  %v223_v58 = vpack.c.bf16 %v155_v50, %v151_v49 }
  0x2b   :  { %303 = vmatpush1.bf16.msra.mxu1 %v205_v60  ;;  %261 = vmatprep.subr.bf16.mxu0 %v208_v61  ;;  %v166_v57 = vld [vmem:[%s879_s1 + $0x3f8] sm:$0xff]  ;;  %v225_v59 = vpack.c.bf16 %v157_v53, %v153_v51  ;;  %v228_v60 = vpack.c.bf16 %v164_v55, %v160_v54  ;;  %v159_v61 = vld [vmem:[%s879_s1 + $0x3c0] sm:$0xff]  ;;  %v161_v0 = vld [vmem:[%s879_s1 + $0x3d0] sm:$0xff] }
  0x2c   :  { %304 = vmatprep.subr.bf16.mxu1 %v210_v1  ;;  %v163_v62 = vld [vmem:[%s879_s1 + $0x3e0] sm:$0xff]  ;;  %v230_v63 = vpack.c.bf16 %v166_v57, %v162_v56  ;;  %v165_v1 = vld [vmem:[%s879_s1 + $0x3f0] sm:$0xff]  ;;  %v375_v13 = vld [vmem:[%s882_s3 + $0x8] sm:$0xff] }
  0x2d   :  { %v227_v2 = vpack.c.bf16 %v163_v62, %v159_v61  ;;  %v229_v3 = vpack.c.bf16 %v165_v1, %v161_v0  ;;  %v406_v4 = vld [vmem:[%s880_s0] ss:$8 sps:$4 sm:$0xff]   ;;  %v377_v17 = vld [vmem:[%s882_s3 + $0x18] sm:$0xff]  ;;  %v380_v24 = vld [vmem:[%s882_s3 + $0x30] sm:$0xff] }
  0x2e   :  { %262 = vmatpush1.bf16.msra.mxu0 %v207_v7  ;;  %v374_v8 = vld [vmem:[%s882_s3] sm:$0xff]  ;;  %v379_v26 = vld [vmem:[%s882_s3 + $0x28] sm:$0xff]  ;;  %v381_v32 = vld [vmem:[%s882_s3 + $0x38] sm:$0xff] }
  0x2f   :  { %305 = vmatpush1.bf16.msra.mxu1 %v209_v10  ;;  %263 = vmatprep.subr.bf16.mxu0 %v212_v11  ;;  %v376_v11 = vld [vmem:[%s882_s3 + $0x10] sm:$0xff]  ;;  %v378_v19 = vld [vmem:[%s882_s3 + $0x20] sm:$0xff] }
  0x30   :  { %306 = vmatprep.subr.bf16.mxu1 %v214_v15 }
  0x32   :  { %264 = vmatpush1.bf16.msra.mxu0 %v211_v20 }
  0x33   :  { %307 = vmatpush1.bf16.msra.mxu1 %v213_v22  ;;  %265 = vmatprep.subr.bf16.mxu0 %v216_v23 }
  0x34   :  { %308 = vmatprep.subr.bf16.mxu1 %v218_v27 }
  0x36   :  { %266 = vmatpush1.bf16.msra.mxu0 %v215_v33 }
  0x37   :  { %309 = vmatpush1.bf16.msra.mxu1 %v217_v35  ;;  %267 = vmatprep.subr.bf16.mxu0 %v220_v36 }
  0x38   :  { %310 = vmatprep.subr.bf16.mxu1 %v222_v40 }
  0x3a   :  { %268 = vmatpush1.bf16.msra.mxu0 %v219_v46 }
  0x3b   :  { %311 = vmatpush1.bf16.msra.mxu1 %v221_v47  ;;  %269 = vmatprep.subr.bf16.mxu0 %v224_v48 }
  0x3c   :  { %312 = vmatprep.subr.bf16.mxu1 %v226_v52 }
  0x3e   :  { %270 = vmatpush1.bf16.msra.mxu0 %v223_v58 }
  0x3f   :  { %313 = vmatpush1.bf16.msra.mxu1 %v225_v59  ;;  %271 = vmatprep.subr.bf16.mxu0 %v228_v60 }
  0x40   :  { %314 = vmatprep.subr.bf16.mxu1 %v230_v63 }
  0x42   :  { %272 = vmatpush1.bf16.msra.mxu0 %v227_v2 }
  0x43   :  { %315 = vmatpush1.bf16.msra.mxu1 %v229_v3 }
  0x45   :  { %274 = vmatmul.mubr.bf16.vlgmr.msra.gmra.mrb[0].mxu0 %v406_v4 }
  0x46   :  { %317 = vmatmul.mubr.bf16.vlgmr.msra.gmra.mrb[0].mxu1 %v406_v4 }
  0xa1   :  { %v359_v5 = vpop.permute.xlu0 %358 }
  0xa7   :  { %v364_v6 = vpop.permute.xlu0 %363 }
 0x118   :  { %v275_v7 = vpop.f32.mrb[0].mxu0 }
 0x119   :  { %v366_v9 = vadd.f32 %v359_v5, %v275_v7  ;;  %v318_v10 = vpop.f32.mrb[0].mxu1  ;;  %v277_v12 = vpop.f32.mrb[1].mxu0 }
 0x11a   :  { %v368_v14 = vadd.f32 %v359_v5, %v318_v10  ;;  %v367_v15 = vadd.f32 %v359_v5, %v277_v12  ;;  %v320_v16 = vpop.f32.mrb[1].mxu1  ;;  %v279_v18 = vpop.f32.mrb[2].mxu0 }
 0x11b   :  { %v382_v20 = vadd.f32 %v374_v8, %v366_v9  ;;  %v369_v21 = vadd.f32 %v359_v5, %v320_v16  ;;  %v370_v22 = vadd.f32 %v364_v6, %v279_v18  ;;  %v322_v23 = vpop.f32.mrb[2].mxu1  ;;  %v281_v25 = vpop.f32.mrb[3].mxu0 }
 0x11c   :  { %v384_v27 = vadd.f32 %v376_v11, %v368_v14  ;;  %v383_v28 = vadd.f32 %v375_v13, %v367_v15  ;;  %v372_v29 = vadd.f32 %v364_v6, %v322_v23  ;;  %v371_v30 = vadd.f32 %v364_v6, %v281_v25  ;;  %v324_v31 = vpop.f32.mrb[3].mxu1 }
 0x11d   :  { %390 = vst [vmem:[%s883_s4] sm:$0xff] %v382_v20  ;;  %v385_v33 = vadd.f32 %v377_v17, %v369_v21  ;;  %v386_v34 = vadd.f32 %v378_v19, %v370_v22  ;;  %v373_v35 = vadd.f32 %v364_v6, %v324_v31 }
 0x11e   :  { %392 = vst [vmem:[%s883_s4 + $0x10] sm:$0xff] %v384_v27  ;;  %391 = vst [vmem:[%s883_s4 + $0x8] sm:$0xff] %v383_v28  ;;  %v388_v36 = vadd.f32 %v380_v24, %v372_v29  ;;  %v387_v37 = vadd.f32 %v379_v26, %v371_v30 }
 0x11f   :  { %393 = vst [vmem:[%s883_s4 + $0x18] sm:$0xff] %v385_v33  ;;  %394 = vst [vmem:[%s883_s4 + $0x20] sm:$0xff] %v386_v34  ;;  %v389_v38 = vadd.f32 %v381_v32, %v373_v35 }
 0x120   :  { %396 = vst [vmem:[%s883_s4 + $0x30] sm:$0xff] %v388_v36  ;;  %395 = vst [vmem:[%s883_s4 + $0x28] sm:$0xff] %v387_v37 }
 0x121   :  { %397 = vst [vmem:[%s883_s4 + $0x38] sm:$0xff] %v389_v38 }

// kernel: encoder_forward.38
= control target key start
LH: loop header
LB: loop body
LE: loop exit
PB: predicated region body
PF: predicated region fallthrough
CT: control target
= control target key end

     0   :  { %v182_v3 = vmov 0   ;;  %s317_s1 = inlined_call_operand.vmem [shape: f32[256,128], index: 1, kind: input, shape index: {}]   ;;  %s318_s0 = inlined_call_operand.vmem [shape: bf16[16,256], index: 0, kind: input, shape index: {}]   ;;  %s319_s2 = inlined_call_operand.vmem [shape: f32[16,1], index: 2, kind: input, shape index: {}]   ;;  %s320_s3 = inlined_call_operand.vmem [shape: f32[16,128], index: 3, kind: output, shape index: {}]  }
   0x1   :  { %v41_v0 = vld [vmem:[%s317_s1 + $0x80] sm:$0xff]  ;;  %v42_v1 = vld [vmem:[%s317_s1 + $0x88] sm:$0xff]  ;;  %178 = vset.pattern.permute.xlu0 %v182_v3  ;;  %v43_v6 = vld [vmem:[%s317_s1 + $0x90] sm:$0xff] }
   0x2   :  { %v25_v2 = vld [vmem:[%s317_s1] sm:$0xff]  ;;  %v65_v4 = vpack.c.bf16 %v42_v1, %v41_v0  ;;  %v26_v5 = vld [vmem:[%s317_s1 + $0x8] sm:$0xff]  ;;  %v44_v7 = vld [vmem:[%s317_s1 + $0x98] sm:$0xff] }
   0x3   :  { %v57_v8 = vpack.c.bf16 %v26_v5, %v25_v2  ;;  %v66_v9 = vpack.c.bf16 %v44_v7, %v43_v6  ;;  %v27_v10 = vld [vmem:[%s317_s1 + $0x10] sm:$0xff]  ;;  %v28_v11 = vld [vmem:[%s317_s1 + $0x18] sm:$0xff]  ;;  %v45_v12 = vld [vmem:[%s317_s1 + $0xa0] sm:$0xff] }
   0x4   :  { %155 = vmatprep.subr.bf16.mxu0 %v65_v4  ;;  %v46_v13 = vld [vmem:[%s317_s1 + $0xa8] sm:$0xff]  ;;  %v58_v14 = vpack.c.bf16 %v28_v11, %v27_v10  ;;  %v29_v16 = vld [vmem:[%s317_s1 + $0x20] sm:$0xff]  ;;  %v47_v18 = vld [vmem:[%s317_s1 + $0xb0] sm:$0xff] }
   0x5   :  { %156 = vmatpush3.bf16.msra.mxu0 %v57_v8  ;;  %v67_v15 = vpack.c.bf16 %v46_v13, %v45_v12  ;;  %v30_v17 = vld [vmem:[%s317_s1 + $0x28] sm:$0xff]  ;;  %v48_v19 = vld [vmem:[%s317_s1 + $0xb8] sm:$0xff]  ;;  %v31_v22 = vld [vmem:[%s317_s1 + $0x30] sm:$0xff] }
   0x6   :  { %157 = vmatprep.subr.bf16.mxu0 %v66_v9  ;;  %v59_v20 = vpack.c.bf16 %v30_v17, %v29_v16  ;;  %v68_v21 = vpack.c.bf16 %v48_v19, %v47_v18  ;;  %v32_v23 = vld [vmem:[%s317_s1 + $0x38] sm:$0xff]  ;;  %v49_v24 = vld [vmem:[%s317_s1 + $0xc0] sm:$0xff]  ;;  %v50_v25 = vld [vmem:[%s317_s1 + $0xc8] sm:$0xff] }
   0x7   :  { %v181_v26 = vld [vmem:[%s318_s0 + $0x4] ss:$8 sps:$4 sm:$0xff]   ;;  %v60_v27 = vpack.c.bf16 %v32_v23, %v31_v22  ;;  %v69_v29 = vpack.c.bf16 %v50_v25, %v49_v24  ;;  %v51_v32 = vld [vmem:[%s317_s1 + $0xd0] sm:$0xff]  ;;  %v52_v33 = vld [vmem:[%s317_s1 + $0xd8] sm:$0xff] }
   0x8   :  { %v133_v28 = vld [vmem:[%s319_s2] sm:$0xff]  ;;  %v34_v31 = vld [vmem:[%s317_s1 + $0x48] sm:$0xff]  ;;  %115 = vmatprep.mubr.bf16.mxu0 %v181_v26  ;;  %v70_v36 = vpack.c.bf16 %v52_v33, %v51_v32  ;;  %v35_v37 = vld [vmem:[%s317_s1 + $0x50] sm:$0xff] }
   0x9   :  { %158 = vmatpush3.bf16.msra.mxu0 %v58_v14  ;;  %v33_v30 = vld [vmem:[%s317_s1 + $0x40] sm:$0xff]  ;;  %137 = vperm.xlu0 %178, %v133_v28   ;;  %v134_v34 = vld [vmem:[%s319_s2 + $0x8] sm:$0xff]  ;;  %v36_v38 = vld [vmem:[%s317_s1 + $0x58] sm:$0xff] }
   0xa   :  { %159 = vmatprep.subr.bf16.mxu0 %v67_v15  ;;  %v61_v35 = vpack.c.bf16 %v34_v31, %v33_v30  ;;  %v53_v39 = vld [vmem:[%s317_s1 + $0xe0] sm:$0xff]  ;;  %v54_v40 = vld [vmem:[%s317_s1 + $0xe8] sm:$0xff]  ;;  %v62_v41 = vpack.c.bf16 %v36_v38, %v35_v37  ;;  %v55_v45 = vld [vmem:[%s317_s1 + $0xf0] sm:$0xff] }
   0xb   :  { %v71_v42 = vpack.c.bf16 %v54_v40, %v53_v39  ;;  %v37_v43 = vld [vmem:[%s317_s1 + $0x60] sm:$0xff]  ;;  %v38_v44 = vld [vmem:[%s317_s1 + $0x68] sm:$0xff]  ;;  %v56_v46 = vld [vmem:[%s317_s1 + $0xf8] sm:$0xff] }
   0xc   :  { %v63_v47 = vpack.c.bf16 %v38_v44, %v37_v43  ;;  %v72_v48 = vpack.c.bf16 %v56_v46, %v55_v45  ;;  %v39_v49 = vld [vmem:[%s317_s1 + $0x70] sm:$0xff]  ;;  %v40_v50 = vld [vmem:[%s317_s1 + $0x78] sm:$0xff]  ;;  %v179_v52 = vld [vmem:[%s318_s0] ss:$8 sps:$4 sm:$0xff]  }
   0xd   :  { %160 = vmatpush3.bf16.msra.mxu0 %v59_v20  ;;  %142 = vperm.xlu0 %178, %v134_v34   ;;  %v64_v51 = vpack.c.bf16 %v40_v50, %v39_v49 }
   0xe   :  { %161 = vmatprep.subr.bf16.mxu0 %v68_v21 }
  0x11   :  { %162 = vmatpush3.bf16.msra.mxu0 %v60_v27 }
  0x12   :  { %163 = vmatprep.subr.bf16.mxu0 %v69_v29 }
  0x15   :  { %164 = vmatpush3.bf16.msra.mxu0 %v61_v35 }
  0x16   :  { %165 = vmatprep.subr.bf16.mxu0 %v70_v36 }
  0x19   :  { %166 = vmatpush3.bf16.msra.mxu0 %v62_v41 }
  0x1a   :  { %167 = vmatprep.subr.bf16.mxu0 %v71_v42 }
  0x1d   :  { %168 = vmatpush3.bf16.msra.mxu0 %v63_v47 }
  0x1e   :  { %169 = vmatprep.subr.bf16.mxu0 %v72_v48 }
  0x21   :  { %170 = vmatpush3.bf16.msra.mxu0 %v64_v51 }
  0x24   :  { %116 = vmatmul.mubr.bf16.vlgmr.msra.gmra.mrb[0].mxu0 %v179_v52 }
  0x88   :  { %v138_v53 = vpop.permute.xlu0 %137 }
  0x8c   :  { %v143_v61 = vpop.permute.xlu0 %142 }
  0xf7   :  { %v171_v54 = vpop.f32.mrb[0].mxu0 }
  0xf8   :  { %v172_v55 = vpop.f32.mrb[1].mxu0 }
  0xf9   :  { %v173_v56 = vadd.f32 %v172_v55, %v171_v54  ;;  %v174_v57 = vpop.f32.mrb[2].mxu0 }
  0xfa   :  { %v175_v58 = vpop.f32.mrb[3].mxu0 }
  0xfb   :  { %v145_v59 = vadd.f32 %v173_v56, %v138_v53  ;;  %v176_v60 = vadd.f32 %v175_v58, %v174_v57 }
  0xfd   :  { %147 = vst [vmem:[%s320_s3] sm:$0xff] %v145_v59  ;;  %v146_v62 = vadd.f32 %v176_v60, %v143_v61 }
  0xff   :  { %148 = vst [vmem:[%s320_s3 + $0x8] sm:$0xff] %v146_v62 }

// kernel: encoder_forward.39
= control target key start
LH: loop header
LB: loop body
LE: loop exit
PB: predicated region body
PF: predicated region fallthrough
CT: control target
= control target key end

     0   :  { %s447_s12 = smov 0   ;;  %s488_s0 = inlined_call_operand.vmem [shape: f32[8,2,2,64], index: 0, kind: input, shape index: {}]   ;;  %s489_s1 = inlined_call_operand.vmem [shape: f32[8,2,1,1], index: 1, kind: input, shape index: {}]   ;;  %s490_s2 = inlined_call_operand.vmem [shape: f32[8,2,1,1], index: 2, kind: input, shape index: {}]   ;;  %s491_s3 = inlined_call_operand.vmem [shape: f32[8,2,2,64], index: 3, kind: output, shape index: {}]  }
   0x1 LB: > { %s376_s13 = sadd.s32 4294967295, %s424_s12   ;;  %p380_p0 = scmp.ge.s32.totalorder %s424_s12, 1  ;;  %s424_s12 = sphi %s447_s12, %s13_s12  }
   0x2   : > { %p155_p1 = scmp.lt.s32.totalorder %s424_s12, 9 }
   0x4   : > { %p156_p2 = pnand %p380_p0, %p155_p1 }
   0x5   : > { %p187_p3 = scmp.lt.s32.totalorder (!%p156_p2), %s376_s13, 7  ;;  %v426_v0 = vmov (!%p156_p2), 0   ;;  %vm207_vm0 = vcmask (!%p156_p2), 517120   ;;  %vm214_vm1 = vcmask (!%p156_p2), 1041408  }
   0x6   : > { %159 = sbr.rel (%p156_p2) target bundleno = 374 (0x176), region = 32  ;;  %407 = vset.pattern.permute.xlu1 (!%p156_p2), %v426_v0  ;;  %406 = vset.pattern.permute.xlu0 (!%p156_p2), %v426_v0 }
   0xd   : > { %s493_s13 = smov (!%p187_p3, %s376_s13), 7 }
   0xe   : > { %s395_s14 = sshll.u32 %s493_s13, 2  ;;  %s383_s15 = sshll.u32 %s493_s13, 1 }
   0xf   : > { %s191_s18 = scalar_lea.vmem %s488_s0, %s395_s14  ;;  %s195_s21 = scalar_lea.vmem %s489_s1, %s383_s15 }
  0x10   : > { %v205_v1 = vld [vmem:[%s191_s18] sm:$0x3]  ;;  %v206_v2 = vld [vmem:[%s191_s18 + $0x2] sm:$0x3]  ;;  %s199_s24 = scalar_lea.vmem %s490_s2, %s383_s15  ;;  %s204_s27 = scalar_lea.vmem %s491_s3, %s395_s14 }
  0x11   : > { %v208_v3 = vsel %vm207_vm0, %v205_v1, 0.0  ;;  %v388_v4 = vld [vmem:[%s195_s21 + $0x1] ss:$0 sm:$0xff]  ;;  %v211_v5 = vsel %vm207_vm0, %v206_v2, 0.0  ;;  %v389_v6 = vld [vmem:[%s199_s24] ss:$0 sm:$0xff] }
  0x12   : > { %209 = vadd.xlane.f32.xlu0 %v208_v3  ;;  %254 = vperm.xlu1 %407, %v388_v4   ;;  %v387_v7 = vld [vmem:[%s195_s21] ss:$0 sm:$0xff]  ;;  %v390_v20 = vld [vmem:[%s199_s24 + $0x1] ss:$0 sm:$0xff] }
  0x16   : > { %212 = vadd.xlane.f32.xlu0 %v211_v5  ;;  %272 = vperm.xlu1 %407, %v389_v6  }
  0x2c   : > { %250 = vperm.xlu0 %406, %v387_v7  }
  0x91   : > { %v255_v21 = vpop.permute.xlu1 %254 }
  0x95   : > { %v273_v22 = vpop.permute.xlu1 %272 }
  0x9f   : > { %v210_v8 = vpop.xlane.xlu0 %209 }
  0xa0   : > { %v215_v10 = vsel %vm214_vm1, %v210_v8, 0.0 }
  0xa3   : > { %v213_v9 = vpop.xlane.xlu0 %212 }
  0xa4   : > { %v216_v11 = vsel %vm214_vm1, %v213_v9, 0.0 }
  0xa5   : > { %v217_v12 = vadd.f32 %v216_v11, %v215_v10 }
  0xa7   : > { %v218_v13 = vmul.f32 0.0078125, %v217_v12 }
  0xa9   : > { %v219_v14 = vsub.f32 %v205_v1, %v218_v13  ;;  %v220_v15 = vsub.f32 %v206_v2, %v218_v13 }
  0xab   : > { %v221_v16 = vmul.f32 %v219_v14, %v219_v14  ;;  %v222_v18 = vmul.f32 %v220_v15, %v220_v15  ;;  %v251_v31 = vpop.permute.xlu0 %250 }
  0xad   : > { %v223_v17 = vsel %vm207_vm0, %v221_v16, 0.0  ;;  %v226_v19 = vsel %vm207_vm0, %v222_v18, 0.0 }
  0xae   : > { %224 = vadd.xlane.f32.xlu1 %v223_v17 }
  0xb2   : > { %227 = vadd.xlane.f32.xlu1 %v226_v19 }
  0xc3   : > { %276 = vperm.xlu1 %407, %v390_v20  }
 0x13b   : > { %v225_v23 = vpop.xlane.xlu1 %224 }
 0x13c   : > { %v229_v25 = vsel %vm214_vm1, %v225_v23, 0.0 }
 0x13f   : > { %v228_v24 = vpop.xlane.xlu1 %227 }
 0x140   : > { %v230_v26 = vsel %vm214_vm1, %v228_v24, 0.0 }
 0x141   : > { %v231_v27 = vadd.f32 %v230_v26, %v229_v25 }
 0x143   : > { %v232_v28 = vmul.f32 0.0078125, %v231_v27  ;;  %v277_v36 = vpop.permute.xlu1 %276 }
 0x145   : > { %v233_v29 = vadd.f32 1e-06, %v232_v28 }
 0x147   : > { %408 = vrsqrt.f32 %v233_v29 }
 0x151   : > { %v409_v30 = vpop.eup %408 }
 0x152   : > { %v236_v32 = vmul.f32 %v409_v30, %v220_v15  ;;  %v235_v33 = vmul.f32 %v409_v30, %v219_v14 }
 0x154   : > { %v258_v34 = vmul.f32 %v255_v21, %v236_v32  ;;  %v257_v35 = vmul.f32 %v251_v31, %v235_v33 }
 0x156   : > { %v280_v37 = vadd.f32 %v277_v36, %v258_v34  ;;  %v279_v38 = vadd.f32 %v273_v22, %v257_v35 }
 0x158   : > { %v392_v39 = vmul.f32 -1.442695, %v280_v37  ;;  %v391_v40 = vmul.f32 -1.442695, %v279_v38 }
 0x15a   : > { %410 = vpow2.f32 %v392_v39 }
 0x15b   : > { %412 = vpow2.f32 %v391_v40 }
 0x164   : > { %v411_v41 = vpop.eup %410 }
 0x165   : > { %v413_v42 = vpop.eup %412  ;;  %v288_v43 = vadd.f32 1.0, %v411_v41 }
 0x166   : > { %v287_v44 = vadd.f32 1.0, %v413_v42 }
 0x167   : > { %414 = vrcp.f32 %v288_v43 }
 0x168   : > { %416 = vrcp.f32 %v287_v44 }
 0x171   : > { %v415_v45 = vpop.eup %414 }
 0x172   : > { %v417_v46 = vpop.eup %416  ;;  %v294_v47 = vmul.f32 %v415_v45, %v280_v37 }
 0x173   : > { %v293_v48 = vmul.f32 %v417_v46, %v279_v38 }
 0x174   : > { %296 = vst.msk [vmem:[%s204_s27 + $0x2] sm:$0x3] %vm207_vm0, %v294_v47 }
 0x175   : > { %295 = vst.msk [vmem:[%s204_s27] sm:$0x3] %vm207_vm0, %v293_v48 }
 0x176 PF: > { %s13_s12 = sadd.s32 1, %s424_s12  }
 0x177   : > { %p10_p4 = scmp.ge.s32.totalorder %s13_s12, 10  }
 0x179   :  { %12 = sbr.rel (!%p10_p4) target bundleno = 1 (0x1), region = 68 }

// kernel: encoder_forward.42
= control target key start
LH: loop header
LB: loop body
LE: loop exit
PB: predicated region body
PF: predicated region fallthrough
CT: control target
= control target key end

     0   :  { %v256_v3 = vmov 0   ;;  %s409_s1 = inlined_call_operand.vmem [shape: f32[256,128], index: 1, kind: input, shape index: {}]   ;;  %s410_s0 = inlined_call_operand.vmem [shape: bf16[32,256], index: 0, kind: input, shape index: {}]   ;;  %s411_s2 = inlined_call_operand.vmem [shape: f32[32,1], index: 2, kind: input, shape index: {}]   ;;  %s412_s3 = inlined_call_operand.vmem [shape: f32[32,128], index: 3, kind: output, shape index: {}]  }
   0x1   :  { %v47_v0 = vld [vmem:[%s409_s1 + $0x80] sm:$0xff]  ;;  %v48_v1 = vld [vmem:[%s409_s1 + $0x88] sm:$0xff]  ;;  %249 = vset.pattern.permute.xlu1 %v256_v3  ;;  %248 = vset.pattern.permute.xlu0 %v256_v3  ;;  %v49_v6 = vld [vmem:[%s409_s1 + $0x90] sm:$0xff] }
   0x2   :  { %v31_v2 = vld [vmem:[%s409_s1] sm:$0xff]  ;;  %v71_v4 = vpack.c.bf16 %v48_v1, %v47_v0  ;;  %v32_v5 = vld [vmem:[%s409_s1 + $0x8] sm:$0xff]  ;;  %v50_v7 = vld [vmem:[%s409_s1 + $0x98] sm:$0xff] }
   0x3   :  { %v63_v8 = vpack.c.bf16 %v32_v5, %v31_v2  ;;  %v72_v9 = vpack.c.bf16 %v50_v7, %v49_v6  ;;  %v33_v10 = vld [vmem:[%s409_s1 + $0x10] sm:$0xff]  ;;  %v34_v11 = vld [vmem:[%s409_s1 + $0x18] sm:$0xff]  ;;  %v51_v12 = vld [vmem:[%s409_s1 + $0xa0] sm:$0xff] }
   0x4   :  { %203 = vmatprep.subr.bf16.mxu0 %v71_v4  ;;  %231 = vmatprep.subr.bf16.mxu1 %v71_v4  ;;  %v52_v13 = vld [vmem:[%s409_s1 + $0xa8] sm:$0xff]  ;;  %v64_v14 = vpack.c.bf16 %v34_v11, %v33_v10  ;;  %v35_v16 = vld [vmem:[%s409_s1 + $0x20] sm:$0xff]  ;;  %v53_v18 = vld [vmem:[%s409_s1 + $0xb0] sm:$0xff] }
   0x5   :  { %204 = vmatpush3.bf16.msra.mxu0 %v63_v8  ;;  %239 = vmatpush3.bf16.msra.mxu1 %v63_v8  ;;  %v73_v15 = vpack.c.bf16 %v52_v13, %v51_v12  ;;  %v36_v17 = vld [vmem:[%s409_s1 + $0x28] sm:$0xff]  ;;  %v54_v19 = vld [vmem:[%s409_s1 + $0xb8] sm:$0xff]  ;;  %v37_v22 = vld [vmem:[%s409_s1 + $0x30] sm:$0xff] }
   0x6   :  { %205 = vmatprep.subr.bf16.mxu0 %v72_v9  ;;  %232 = vmatprep.subr.bf16.mxu1 %v72_v9  ;;  %v65_v20 = vpack.c.bf16 %v36_v17, %v35_v16  ;;  %v74_v21 = vpack.c.bf16 %v54_v19, %v53_v18  ;;  %v38_v23 = vld [vmem:[%s409_s1 + $0x38] sm:$0xff]  ;;  %v55_v24 = vld [vmem:[%s409_s1 + $0xc0] sm:$0xff]  ;;  %v56_v25 = vld [vmem:[%s409_s1 + $0xc8] sm:$0xff] }
   0x7   :  { %v39_v26 = vld [vmem:[%s409_s1 + $0x40] sm:$0xff]  ;;  %v66_v28 = vpack.c.bf16 %v38_v23, %v37_v22  ;;  %v40_v29 = vld [vmem:[%s409_s1 + $0x48] sm:$0xff]  ;;  %v75_v30 = vpack.c.bf16 %v56_v25, %v55_v24  ;;  %v255_v31 = vld [vmem:[%s410_s0 + $0x14] ss:$8 sps:$4 sm:$0xff]  }
   0x8   :  { %v252_v27 = vld [vmem:[%s410_s0 + $0x4] ss:$8 sps:$4 sm:$0xff]   ;;  %v165_v32 = vld [vmem:[%s411_s2 + $0x10] sm:$0xff]  ;;  %v58_v35 = vld [vmem:[%s409_s1 + $0xd8] sm:$0xff]  ;;  %139 = vmatprep.mubr.bf16.mxu1 %v255_v31  ;;  %v67_v37 = vpack.c.bf16 %v40_v29, %v39_v26 }
   0x9   :  { %206 = vmatpush3.bf16.msra.mxu0 %v64_v14  ;;  %240 = vmatpush3.bf16.msra.mxu1 %v64_v14  ;;  %v163_v33 = vld [vmem:[%s411_s2] sm:$0xff]  ;;  %v57_v34 = vld [vmem:[%s409_s1 + $0xd0] sm:$0xff]  ;;  %v166_v36 = vld [vmem:[%s411_s2 + $0x18] sm:$0xff] }
   0xa   :  { %207 = vmatprep.subr.bf16.mxu0 %v73_v15  ;;  %233 = vmatprep.subr.bf16.mxu1 %v73_v15  ;;  %v164_v38 = vld [vmem:[%s411_s2 + $0x8] sm:$0xff]  ;;  %v76_v39 = vpack.c.bf16 %v58_v35, %v57_v34  ;;  %v41_v40 = vld [vmem:[%s409_s1 + $0x50] sm:$0xff]  ;;  %v42_v41 = vld [vmem:[%s409_s1 + $0x58] sm:$0xff] }
   0xb   :  { %131 = vmatprep.mubr.bf16.mxu0 %v252_v27  ;;  %179 = vperm.xlu1 %249, %v165_v32   ;;  %v59_v42 = vld [vmem:[%s409_s1 + $0xe0] sm:$0xff]  ;;  %v60_v43 = vld [vmem:[%s409_s1 + $0xe8] sm:$0xff]  ;;  %v68_v44 = vpack.c.bf16 %v42_v41, %v41_v40  ;;  %v61_v48 = vld [vmem:[%s409_s1 + $0xf0] sm:$0xff] }
   0xc   :  { %169 = vperm.xlu0 %248, %v163_v33   ;;  %v77_v45 = vpack.c.bf16 %v60_v43, %v59_v42  ;;  %v43_v46 = vld [vmem:[%s409_s1 + $0x60] sm:$0xff]  ;;  %v44_v47 = vld [vmem:[%s409_s1 + $0x68] sm:$0xff]  ;;  %v62_v49 = vld [vmem:[%s409_s1 + $0xf8] sm:$0xff] }
   0xd   :  { %208 = vmatpush3.bf16.msra.mxu0 %v65_v20  ;;  %241 = vmatpush3.bf16.msra.mxu1 %v65_v20  ;;  %v69_v50 = vpack.c.bf16 %v44_v47, %v43_v46  ;;  %v78_v51 = vpack.c.bf16 %v62_v49, %v61_v48  ;;  %v45_v52 = vld [vmem:[%s409_s1 + $0x70] sm:$0xff]  ;;  %v46_v53 = vld [vmem:[%s409_s1 + $0x78] sm:$0xff]  ;;  %v250_v55 = vld [vmem:[%s410_s0] ss:$8 sps:$4 sm:$0xff]  }
   0xe   :  { %209 = vmatprep.subr.bf16.mxu0 %v74_v21  ;;  %234 = vmatprep.subr.bf16.mxu1 %v74_v21  ;;  %v70_v54 = vpack.c.bf16 %v46_v53, %v45_v52  ;;  %v253_v56 = vld [vmem:[%s410_s0 + $0x10] ss:$8 sps:$4 sm:$0xff]  }
   0xf   :  { %184 = vperm.xlu1 %249, %v166_v36  }
  0x10   :  { %174 = vperm.xlu0 %248, %v164_v38  }
  0x11   :  { %210 = vmatpush3.bf16.msra.mxu0 %v66_v28  ;;  %242 = vmatpush3.bf16.msra.mxu1 %v66_v28 }
  0x12   :  { %211 = vmatprep.subr.bf16.mxu0 %v75_v30  ;;  %235 = vmatprep.subr.bf16.mxu1 %v75_v30 }
  0x15   :  { %212 = vmatpush3.bf16.msra.mxu0 %v67_v37  ;;  %243 = vmatpush3.bf16.msra.mxu1 %v67_v37 }
  0x16   :  { %213 = vmatprep.subr.bf16.mxu0 %v76_v39  ;;  %236 = vmatprep.subr.bf16.mxu1 %v76_v39 }
  0x19   :  { %214 = vmatpush3.bf16.msra.mxu0 %v68_v44  ;;  %244 = vmatpush3.bf16.msra.mxu1 %v68_v44 }
  0x1a   :  { %215 = vmatprep.subr.bf16.mxu0 %v77_v45  ;;  %237 = vmatprep.subr.bf16.mxu1 %v77_v45 }
  0x1d   :  { %216 = vmatpush3.bf16.msra.mxu0 %v69_v50  ;;  %245 = vmatpush3.bf16.msra.mxu1 %v69_v50 }
  0x1e   :  { %217 = vmatprep.subr.bf16.mxu0 %v78_v51  ;;  %238 = vmatprep.subr.bf16.mxu1 %v78_v51 }
  0x21   :  { %218 = vmatpush3.bf16.msra.mxu0 %v70_v54  ;;  %246 = vmatpush3.bf16.msra.mxu1 %v70_v54 }
  0x24   :  { %132 = vmatmul.mubr.bf16.vlgmr.msra.gmra.mrb[0].mxu0 %v250_v55  ;;  %140 = vmatmul.mubr.bf16.vlgmr.msra.gmra.mrb[0].mxu1 %v253_v56 }
  0x8a   :  { %v180_v57 = vpop.permute.xlu1 %179 }
  0x8b   :  { %v170_v58 = vpop.permute.xlu0 %169 }
  0x8e   :  { %v185_v9 = vpop.permute.xlu1 %184 }
  0x8f   :  { %v175_v10 = vpop.permute.xlu0 %174 }
  0xf7   :  { %v219_v59 = vpop.f32.mrb[0].mxu0  ;;  %v225_v60 = vpop.f32.mrb[0].mxu1 }
  0xf8   :  { %v220_v61 = vpop.f32.mrb[1].mxu0  ;;  %v226_v62 = vpop.f32.mrb[1].mxu1 }
  0xf9   :  { %v221_v63 = vadd.f32 %v220_v61, %v219_v59  ;;  %v227_v0 = vadd.f32 %v226_v62, %v225_v60  ;;  %v222_v1 = vpop.f32.mrb[2].mxu0  ;;  %v228_v2 = vpop.f32.mrb[2].mxu1 }
  0xfa   :  { %v223_v3 = vpop.f32.mrb[3].mxu0  ;;  %v229_v4 = vpop.f32.mrb[3].mxu1 }
  0xfb   :  { %v187_v5 = vadd.f32 %v221_v63, %v170_v58  ;;  %v189_v6 = vadd.f32 %v227_v0, %v180_v57  ;;  %v224_v7 = vadd.f32 %v223_v3, %v222_v1  ;;  %v230_v8 = vadd.f32 %v229_v4, %v228_v2 }
  0xfd   :  { %191 = vst [vmem:[%s412_s3] sm:$0xff] %v187_v5  ;;  %193 = vst [vmem:[%s412_s3 + $0x10] sm:$0xff] %v189_v6  ;;  %v188_v11 = vadd.f32 %v224_v7, %v175_v10  ;;  %v190_v12 = vadd.f32 %v230_v8, %v185_v9 }
  0xff   :  { %192 = vst [vmem:[%s412_s3 + $0x8] sm:$0xff] %v188_v11  ;;  %194 = vst [vmem:[%s412_s3 + $0x18] sm:$0xff] %v190_v12 }

// kernel: encoder_forward.41
= control target key start
LH: loop header
LB: loop body
LE: loop exit
PB: predicated region body
PF: predicated region fallthrough
CT: control target
= control target key end

     0   :  { %s549_s12 = smov 0   ;;  %s600_s0 = inlined_call_operand.vmem [shape: f32[8,4,2,64], index: 0, kind: input, shape index: {}]   ;;  %s601_s1 = inlined_call_operand.vmem [shape: f32[8,4,1,1], index: 1, kind: input, shape index: {}]   ;;  %s602_s2 = inlined_call_operand.vmem [shape: f32[8,4,1,1], index: 2, kind: input, shape index: {}]   ;;  %s603_s3 = inlined_call_operand.vmem [shape: f32[8,4,2,64], index: 3, kind: output, shape index: {}]  }
   0x1 LB: > { %s464_s13 = sadd.s32 4294967295, %s526_s12   ;;  %p468_p0 = scmp.ge.s32.totalorder %s526_s12, 1  ;;  %s526_s12 = sphi %s549_s12, %s13_s12  }
   0x2   : > { %p155_p1 = scmp.lt.s32.totalorder %s526_s12, 9 }
   0x4   : > { %p156_p2 = pnand %p468_p0, %p155_p1 }
   0x5   : > { %p187_p3 = scmp.lt.s32.totalorder (!%p156_p2), %s464_s13, 7  ;;  %vm209_vm0 = vcmask (!%p156_p2), 517120   ;;  %v528_v8 = vmov (!%p156_p2), 0   ;;  %vm222_vm1 = vcmask (!%p156_p2), 1041408  }
   0x6   : > { %159 = sbr.rel (%p156_p2) target bundleno = 449 (0x1c1), region = 32  ;;  %501 = vset.pattern.permute.xlu1 (!%p156_p2), %v528_v8  ;;  %500 = vset.pattern.permute.xlu0 (!%p156_p2), %v528_v8 }
   0xd   : > { %s605_s13 = smov (!%p187_p3, %s464_s13), 7 }
   0xe   : > { %s489_s14 = sshll.u32 %s605_s13, 3  ;;  %s471_s18 = sshll.u32 %s605_s13, 2 }
   0xf   : > { %s191_s17 = scalar_lea.vmem %s600_s0, %s489_s14  ;;  %s195_s21 = scalar_lea.vmem %s601_s1, %s471_s18 }
  0x10   : > { %v205_v0 = vld [vmem:[%s191_s17] sm:$0x3]  ;;  %v207_v1 = vld [vmem:[%s191_s17 + $0x4] sm:$0x3]  ;;  %v206_v2 = vld [vmem:[%s191_s17 + $0x2] sm:$0x3]  ;;  %s199_s24 = scalar_lea.vmem %s602_s2, %s471_s18  ;;  %s204_s27 = scalar_lea.vmem %s603_s3, %s489_s14 }
  0x11   : > { %v210_v3 = vsel %vm209_vm0, %v205_v0, 0.0  ;;  %v216_v4 = vsel %vm209_vm0, %v207_v1, 0.0  ;;  %v208_v5 = vld [vmem:[%s191_s17 + $0x6] sm:$0x3]  ;;  %v213_v6 = vsel %vm209_vm0, %v206_v2, 0.0 }
  0x12   : > { %211 = vadd.xlane.f32.xlu0 %v210_v3  ;;  %217 = vadd.xlane.f32.xlu1 %v216_v4  ;;  %v219_v7 = vsel %vm209_vm0, %v208_v5, 0.0  ;;  %v476_v30 = vld [vmem:[%s195_s21 + $0x1] ss:$0 sm:$0xff]  ;;  %v477_v31 = vld [vmem:[%s195_s21 + $0x2] ss:$0 sm:$0xff] }
  0x13   : > { %v478_v32 = vld [vmem:[%s195_s21 + $0x3] ss:$0 sm:$0xff]  ;;  %v475_v33 = vld [vmem:[%s195_s21] ss:$0 sm:$0xff]  ;;  %v480_v35 = vld [vmem:[%s199_s24 + $0x1] ss:$0 sm:$0xff] }
  0x14   : > { %v479_v34 = vld [vmem:[%s199_s24] ss:$0 sm:$0xff]  ;;  %v481_v36 = vld [vmem:[%s199_s24 + $0x2] ss:$0 sm:$0xff]  ;;  %v482_v40 = vld [vmem:[%s199_s24 + $0x3] ss:$0 sm:$0xff] }
  0x16   : > { %214 = vadd.xlane.f32.xlu0 %v213_v6  ;;  %220 = vadd.xlane.f32.xlu1 %v219_v7 }
  0x9f   : > { %v212_v9 = vpop.xlane.xlu0 %211  ;;  %v218_v10 = vpop.xlane.xlu1 %217 }
  0xa0   : > { %v223_v13 = vsel %vm222_vm1, %v212_v9, 0.0  ;;  %v226_v16 = vsel %vm222_vm1, %v218_v10, 0.0 }
  0xa3   : > { %v215_v11 = vpop.xlane.xlu0 %214  ;;  %v221_v12 = vpop.xlane.xlu1 %220 }
  0xa4   : > { %v224_v14 = vsel %vm222_vm1, %v215_v11, 0.0  ;;  %v228_v17 = vsel %vm222_vm1, %v221_v12, 0.0 }
  0xa5   : > { %v225_v15 = vadd.f32 %v224_v14, %v223_v13 }
  0xa7   : > { %v227_v18 = vadd.f32 %v226_v16, %v225_v15 }
  0xa9   : > { %v229_v19 = vadd.f32 %v228_v17, %v227_v18 }
  0xab   : > { %v230_v20 = vmul.f32 0.00390625, %v229_v19 }
  0xad   : > { %v232_v21 = vsub.f32 %v206_v2, %v230_v20  ;;  %v231_v22 = vsub.f32 %v205_v0, %v230_v20  ;;  %v233_v23 = vsub.f32 %v207_v1, %v230_v20  ;;  %v234_v37 = vsub.f32 %v208_v5, %v230_v20 }
  0xaf   : > { %v236_v24 = vmul.f32 %v232_v21, %v232_v21  ;;  %v235_v25 = vmul.f32 %v231_v22, %v231_v22  ;;  %v237_v28 = vmul.f32 %v233_v23, %v233_v23  ;;  %v238_v38 = vmul.f32 %v234_v37, %v234_v37 }
  0xb1   : > { %v242_v26 = vsel %vm209_vm0, %v236_v24, 0.0  ;;  %v239_v27 = vsel %vm209_vm0, %v235_v25, 0.0  ;;  %v245_v29 = vsel %vm209_vm0, %v237_v28, 0.0  ;;  %v248_v39 = vsel %vm209_vm0, %v238_v38, 0.0 }
  0xb2   : > { %243 = vadd.xlane.f32.xlu1 %v242_v26  ;;  %240 = vadd.xlane.f32.xlu0 %v239_v27 }
  0xb6   : > { %246 = vadd.xlane.f32.xlu0 %v245_v29 }
  0xc3   : > { %294 = vperm.xlu1 %501, %v476_v30  }
  0xc7   : > { %298 = vperm.xlu1 %501, %v477_v31  }
  0xcb   : > { %302 = vperm.xlu1 %501, %v478_v32  }
  0xcc   : > { %290 = vperm.xlu0 %500, %v475_v33  }
  0xcf   : > { %334 = vperm.xlu1 %501, %v479_v34  }
  0xd3   : > { %338 = vperm.xlu1 %501, %v480_v35  }
  0xd7   : > { %342 = vperm.xlu1 %501, %v481_v36  }
  0xfb   : > { %249 = vadd.xlane.f32.xlu1 %v248_v39 }
 0x10c   : > { %346 = vperm.xlu1 %501, %v482_v40  }
 0x13f   : > { %v244_v41 = vpop.xlane.xlu1 %243  ;;  %v241_v46 = vpop.xlane.xlu0 %240 }
 0x140   : > { %v252_v49 = vsel %vm222_vm1, %v244_v41, 0.0  ;;  %v251_v50 = vsel %vm222_vm1, %v241_v46, 0.0 }
 0x141   : > { %v253_v53 = vadd.f32 %v252_v49, %v251_v50 }
 0x143   : > { %v295_v42 = vpop.permute.xlu1 %294  ;;  %v247_v48 = vpop.xlane.xlu0 %246 }
 0x144   : > { %v254_v52 = vsel %vm222_vm1, %v247_v48, 0.0 }
 0x145   : > { %v255_v54 = vadd.f32 %v254_v52, %v253_v53 }
 0x147   : > { %v299_v43 = vpop.permute.xlu1 %298 }
 0x14b   : > { %v303_v44 = vpop.permute.xlu1 %302  ;;  %v291_v61 = vpop.permute.xlu0 %290 }
 0x14f   : > { %v335_v45 = vpop.permute.xlu1 %334 }
 0x153   : > { %v339_v47 = vpop.permute.xlu1 %338 }
 0x157   : > { %v343_v51 = vpop.permute.xlu1 %342 }
 0x188   : > { %v250_v55 = vpop.xlane.xlu1 %249 }
 0x189   : > { %v256_v56 = vsel %vm222_vm1, %v250_v55, 0.0 }
 0x18a   : > { %v257_v57 = vadd.f32 %v256_v56, %v255_v54 }
 0x18c   : > { %v258_v58 = vmul.f32 0.00390625, %v257_v57  ;;  %v347_v6 = vpop.permute.xlu1 %346 }
 0x18e   : > { %v259_v59 = vadd.f32 1e-06, %v258_v58 }
 0x190   : > { %502 = vrsqrt.f32 %v259_v59 }
 0x19a   : > { %v503_v60 = vpop.eup %502 }
 0x19b   : > { %v262_v62 = vmul.f32 %v503_v60, %v232_v21  ;;  %v263_v63 = vmul.f32 %v503_v60, %v233_v23  ;;  %v264_v0 = vmul.f32 %v503_v60, %v234_v37  ;;  %v261_v1 = vmul.f32 %v503_v60, %v231_v22 }
 0x19d   : > { %v306_v2 = vmul.f32 %v295_v42, %v262_v62  ;;  %v307_v3 = vmul.f32 %v299_v43, %v263_v63  ;;  %v308_v4 = vmul.f32 %v303_v44, %v264_v0  ;;  %v305_v5 = vmul.f32 %v291_v61, %v261_v1 }
 0x19f   : > { %v350_v7 = vadd.f32 %v339_v47, %v306_v2  ;;  %v351_v8 = vadd.f32 %v343_v51, %v307_v3  ;;  %v352_v9 = vadd.f32 %v347_v6, %v308_v4  ;;  %v349_v10 = vadd.f32 %v335_v45, %v305_v5 }
 0x1a1   : > { %v484_v11 = vmul.f32 -1.442695, %v350_v7  ;;  %v485_v12 = vmul.f32 -1.442695, %v351_v8  ;;  %v486_v13 = vmul.f32 -1.442695, %v352_v9 }
 0x1a2   : > { %v483_v14 = vmul.f32 -1.442695, %v349_v10 }
 0x1a3   : > { %504 = vpow2.f32 %v484_v11 }
 0x1a4   : > { %506 = vpow2.f32 %v485_v12 }
 0x1a5   : > { %508 = vpow2.f32 %v486_v13 }
 0x1a6   : > { %510 = vpow2.f32 %v483_v14 }
 0x1ad   : > { %v505_v15 = vpop.eup %504 }
 0x1ae   : > { %v507_v16 = vpop.eup %506  ;;  %v366_v17 = vadd.f32 1.0, %v505_v15 }
 0x1af   : > { %v509_v18 = vpop.eup %508  ;;  %v367_v19 = vadd.f32 1.0, %v507_v16 }
 0x1b0   : > { %v511_v20 = vpop.eup %510  ;;  %512 = vrcp.f32 %v366_v17  ;;  %v368_v21 = vadd.f32 1.0, %v509_v18 }
 0x1b1   : > { %514 = vrcp.f32 %v367_v19  ;;  %v365_v22 = vadd.f32 1.0, %v511_v20 }
 0x1b2   : > { %516 = vrcp.f32 %v368_v21 }
 0x1b3   : > { %518 = vrcp.f32 %v365_v22 }
 0x1ba   : > { %v513_v23 = vpop.eup %512 }
 0x1bb   : > { %v515_v24 = vpop.eup %514  ;;  %v378_v25 = vmul.f32 %v513_v23, %v350_v7 }
 0x1bc   : > { %v517_v26 = vpop.eup %516  ;;  %v379_v27 = vmul.f32 %v515_v24, %v351_v8 }
 0x1bd   : > { %v519_v28 = vpop.eup %518  ;;  %382 = vst.msk [vmem:[%s204_s27 + $0x2] sm:$0x3] %vm209_vm0, %v378_v25  ;;  %v380_v29 = vmul.f32 %v517_v26, %v352_v9 }
 0x1be   : > { %383 = vst.msk [vmem:[%s204_s27 + $0x4] sm:$0x3] %vm209_vm0, %v379_v27  ;;  %v377_v30 = vmul.f32 %v519_v28, %v349_v10 }
 0x1bf   : > { %384 = vst.msk [vmem:[%s204_s27 + $0x6] sm:$0x3] %vm209_vm0, %v380_v29 }
 0x1c0   : > { %381 = vst.msk [vmem:[%s204_s27] sm:$0x3] %vm209_vm0, %v377_v30 }
 0x1c1 PF: > { %s13_s12 = sadd.s32 1, %s526_s12  }
 0x1c2   : > { %p10_p4 = scmp.ge.s32.totalorder %s13_s12, 10  }
 0x1c4   :  { %12 = sbr.rel (!%p10_p4) target bundleno = 1 (0x1), region = 68 }

// kernel: encoder_forward.43
= control target key start
LH: loop header
LB: loop body
LE: loop exit
PB: predicated region body
PF: predicated region fallthrough
CT: control target
= control target key end

     0   :  { %v374_v3 = vmov 0   ;;  %s598_s1 = inlined_call_operand.vmem [shape: f32[384,128], index: 1, kind: input, shape index: {}]   ;;  %s599_s0 = inlined_call_operand.vmem [shape: bf16[32,384], index: 0, kind: input, shape index: {}]   ;;  %s600_s2 = inlined_call_operand.vmem [shape: f32[32,1], index: 2, kind: input, shape index: {}]   ;;  %s601_s3 = inlined_call_operand.vmem [shape: f32[32,128], index: 3, kind: input, shape index: {}]   ;;  %s602_s4 = inlined_call_operand.vmem [shape: f32[32,128], index: 4, kind: output, shape index: {}]  }
   0x1   :  { %v54_v0 = vld [vmem:[%s598_s1 + $0x80] sm:$0xff]  ;;  %v55_v1 = vld [vmem:[%s598_s1 + $0x88] sm:$0xff]  ;;  %364 = vset.pattern.permute.xlu0 %v374_v3  ;;  %365 = vset.pattern.permute.xlu1 %v374_v3  ;;  %v56_v10 = vld [vmem:[%s598_s1 + $0x90] sm:$0xff] }
   0x2   :  { %v38_v2 = vld [vmem:[%s598_s1] sm:$0xff]  ;;  %v94_v4 = vpack.c.bf16 %v55_v1, %v54_v0  ;;  %v39_v5 = vld [vmem:[%s598_s1 + $0x8] sm:$0xff]  ;;  %v57_v11 = vld [vmem:[%s598_s1 + $0x98] sm:$0xff] }
   0x3   :  { %v70_v6 = vld [vmem:[%s598_s1 + $0x100] sm:$0xff]  ;;  %v71_v7 = vld [vmem:[%s598_s1 + $0x108] sm:$0xff]  ;;  %v86_v8 = vpack.c.bf16 %v39_v5, %v38_v2  ;;  %v40_v12 = vld [vmem:[%s598_s1 + $0x10] sm:$0xff]  ;;  %v95_v13 = vpack.c.bf16 %v57_v11, %v56_v10 }
   0x4   :  { %v102_v9 = vpack.c.bf16 %v71_v7, %v70_v6  ;;  %305 = vmatprep.subr.bf16.mxu0 %v94_v4  ;;  %v41_v14 = vld [vmem:[%s598_s1 + $0x18] sm:$0xff]  ;;  %v72_v15 = vld [vmem:[%s598_s1 + $0x110] sm:$0xff]  ;;  %v58_v19 = vld [vmem:[%s598_s1 + $0xa0] sm:$0xff] }
   0x5   :  { %v73_v16 = vld [vmem:[%s598_s1 + $0x118] sm:$0xff]  ;;  %306 = vmatpush3.bf16.msra.mxu0 %v86_v8  ;;  %v87_v17 = vpack.c.bf16 %v41_v14, %v40_v12  ;;  %v59_v20 = vld [vmem:[%s598_s1 + $0xa8] sm:$0xff]  ;;  %v42_v21 = vld [vmem:[%s598_s1 + $0x20] sm:$0xff] }
   0x6   :  { %343 = vmatprep.subr.bf16.mxu1 %v102_v9  ;;  %v103_v18 = vpack.c.bf16 %v73_v16, %v72_v15  ;;  %307 = vmatprep.subr.bf16.mxu0 %v95_v13  ;;  %v96_v22 = vpack.c.bf16 %v59_v20, %v58_v19  ;;  %v43_v23 = vld [vmem:[%s598_s1 + $0x28] sm:$0xff]  ;;  %v74_v24 = vld [vmem:[%s598_s1 + $0x120] sm:$0xff]  ;;  %v60_v27 = vld [vmem:[%s598_s1 + $0xb0] sm:$0xff] }
   0x7   :  { %344 = vmatpush3.bf16.msra.mxu1 %v102_v9  ;;  %v75_v25 = vld [vmem:[%s598_s1 + $0x128] sm:$0xff]  ;;  %v61_v28 = vld [vmem:[%s598_s1 + $0xb8] sm:$0xff]  ;;  %v76_v29 = vld [vmem:[%s598_s1 + $0x130] sm:$0xff]  ;;  %v88_v31 = vpack.c.bf16 %v43_v23, %v42_v21 }
   0x8   :  { %345 = vmatprep.subr.bf16.mxu1 %v103_v18  ;;  %v104_v26 = vpack.c.bf16 %v75_v25, %v74_v24  ;;  %v77_v30 = vld [vmem:[%s598_s1 + $0x138] sm:$0xff]  ;;  %v97_v32 = vpack.c.bf16 %v61_v28, %v60_v27  ;;  %v44_v33 = vld [vmem:[%s598_s1 + $0x30] sm:$0xff]  ;;  %v62_v36 = vld [vmem:[%s598_s1 + $0xc0] sm:$0xff] }
   0x9   :  { %308 = vmatpush3.bf16.msra.mxu0 %v87_v17  ;;  %v45_v34 = vld [vmem:[%s598_s1 + $0x38] sm:$0xff]  ;;  %v105_v35 = vpack.c.bf16 %v77_v30, %v76_v29  ;;  %v63_v37 = vld [vmem:[%s598_s1 + $0xc8] sm:$0xff]  ;;  %v78_v38 = vld [vmem:[%s598_s1 + $0x140] sm:$0xff] }
   0xa   :  { %309 = vmatprep.subr.bf16.mxu0 %v96_v22  ;;  %v79_v39 = vld [vmem:[%s598_s1 + $0x148] sm:$0xff]  ;;  %v89_v40 = vpack.c.bf16 %v45_v34, %v44_v33  ;;  %v98_v41 = vpack.c.bf16 %v63_v37, %v62_v36  ;;  %v46_v42 = vld [vmem:[%s598_s1 + $0x40] sm:$0xff]  ;;  %v64_v45 = vld [vmem:[%s598_s1 + $0xd0] sm:$0xff] }
   0xb   :  { %346 = vmatpush3.bf16.msra.mxu1 %v103_v18  ;;  %v47_v43 = vld [vmem:[%s598_s1 + $0x48] sm:$0xff]  ;;  %v106_v44 = vpack.c.bf16 %v79_v39, %v78_v38  ;;  %v65_v46 = vld [vmem:[%s598_s1 + $0xd8] sm:$0xff]  ;;  %v48_v47 = vld [vmem:[%s598_s1 + $0x50] sm:$0xff] }
   0xc   :  { %347 = vmatprep.subr.bf16.mxu1 %v104_v26  ;;  %v49_v48 = vld [vmem:[%s598_s1 + $0x58] sm:$0xff]  ;;  %v80_v49 = vld [vmem:[%s598_s1 + $0x150] sm:$0xff]  ;;  %v90_v51 = vpack.c.bf16 %v47_v43, %v46_v42  ;;  %v66_v52 = vld [vmem:[%s598_s1 + $0xe0] sm:$0xff]  ;;  %v99_v54 = vpack.c.bf16 %v65_v46, %v64_v45 }
   0xd   :  { %310 = vmatpush3.bf16.msra.mxu0 %v88_v31  ;;  %v81_v50 = vld [vmem:[%s598_s1 + $0x158] sm:$0xff]  ;;  %v67_v53 = vld [vmem:[%s598_s1 + $0xe8] sm:$0xff]  ;;  %v82_v55 = vld [vmem:[%s598_s1 + $0x160] sm:$0xff]  ;;  %v91_v60 = vpack.c.bf16 %v49_v48, %v48_v47 }
   0xe   :  { %311 = vmatprep.subr.bf16.mxu0 %v97_v32  ;;  %v368_v56 = vld [vmem:[%s599_s0 + $0x4] ss:$12 sps:$4 sm:$0xff]   ;;  %v107_v57 = vpack.c.bf16 %v81_v50, %v80_v49  ;;  %v369_v58 = vld [vmem:[%s599_s0 + $0x8] ss:$12 sps:$4 sm:$0xff]   ;;  %v100_v62 = vpack.c.bf16 %v67_v53, %v66_v52  ;;  %v69_v4 = vld [vmem:[%s598_s1 + $0xf8] sm:$0xff] }
   0xf   :  { %348 = vmatpush3.bf16.msra.mxu1 %v104_v26  ;;  %v83_v59 = vld [vmem:[%s598_s1 + $0x168] sm:$0xff]  ;;  %174 = vmatprep.mubr.bf16.mxu0 %v368_v56  ;;  %v255_v61 = vld [vmem:[%s600_s2] sm:$0xff]  ;;  %v257_v1 = vld [vmem:[%s600_s2 + $0x10] sm:$0xff] }
  0x10   :  { %349 = vmatprep.subr.bf16.mxu1 %v105_v35  ;;  %359 = vmatprep.mubr.bf16.mxu1 %v369_v58  ;;  %v50_v63 = vld [vmem:[%s598_s1 + $0x60] sm:$0xff]  ;;  %v51_v0 = vld [vmem:[%s598_s1 + $0x68] sm:$0xff]  ;;  %v108_v2 = vpack.c.bf16 %v83_v59, %v82_v55  ;;  %v68_v3 = vld [vmem:[%s598_s1 + $0xf0] sm:$0xff] }
  0x11   :  { %312 = vmatpush3.bf16.msra.mxu0 %v89_v40  ;;  %261 = vperm.xlu0 %364, %v255_v61   ;;  %v84_v5 = vld [vmem:[%s598_s1 + $0x170] sm:$0xff]  ;;  %v85_v6 = vld [vmem:[%s598_s1 + $0x178] sm:$0xff]  ;;  %v256_v7 = vld [vmem:[%s600_s2 + $0x8] sm:$0xff]  ;;  %v92_v8 = vpack.c.bf16 %v51_v0, %v50_v63  ;;  %v101_v10 = vpack.c.bf16 %v69_v4, %v68_v3 }
  0x12   :  { %313 = vmatprep.subr.bf16.mxu0 %v98_v41  ;;  %271 = vperm.xlu1 %365, %v257_v1   ;;  %v258_v9 = vld [vmem:[%s600_s2 + $0x18] sm:$0xff]  ;;  %v52_v11 = vld [vmem:[%s598_s1 + $0x70] sm:$0xff]  ;;  %v109_v13 = vpack.c.bf16 %v85_v6, %v84_v5  ;;  %v366_v15 = vld [vmem:[%s599_s0] ss:$12 sps:$4 sm:$0xff]  }
  0x13   :  { %350 = vmatpush3.bf16.msra.mxu1 %v105_v35  ;;  %v53_v12 = vld [vmem:[%s598_s1 + $0x78] sm:$0xff]  ;;  %v370_v16 = vld [vmem:[%s599_s0 + $0x20] ss:$12 sps:$4 sm:$0xff]   ;;  %v285_v47 = vld [vmem:[%s601_s3 + $0x10] sm:$0xff] }
  0x14   :  { %351 = vmatprep.subr.bf16.mxu1 %v106_v44  ;;  %v93_v14 = vpack.c.bf16 %v53_v12, %v52_v11  ;;  %v371_v17 = vld [vmem:[%s599_s0 + $0x1c] ss:$12 sps:$4 sm:$0xff]   ;;  %v373_v18 = vld [vmem:[%s599_s0 + $0x18] ss:$12 sps:$4 sm:$0xff]  }
  0x15   :  { %314 = vmatpush3.bf16.msra.mxu0 %v90_v51  ;;  %266 = vperm.xlu0 %364, %v256_v7   ;;  %v283_v31 = vld [vmem:[%s601_s3] sm:$0xff]  ;;  %v284_v35 = vld [vmem:[%s601_s3 + $0x8] sm:$0xff]  ;;  %v286_v51 = vld [vmem:[%s601_s3 + $0x18] sm:$0xff] }
  0x16   :  { %315 = vmatprep.subr.bf16.mxu0 %v99_v54  ;;  %276 = vperm.xlu1 %365, %v258_v9  }
  0x17   :  { %352 = vmatpush3.bf16.msra.mxu1 %v106_v44 }
  0x18   :  { %353 = vmatprep.subr.bf16.mxu1 %v107_v57 }
  0x19   :  { %316 = vmatpush3.bf16.msra.mxu0 %v91_v60 }
  0x1a   :  { %317 = vmatprep.subr.bf16.mxu0 %v100_v62 }
  0x1b   :  { %354 = vmatpush3.bf16.msra.mxu1 %v107_v57 }
  0x1c   :  { %355 = vmatprep.subr.bf16.mxu1 %v108_v2 }
  0x1d   :  { %318 = vmatpush3.bf16.msra.mxu0 %v92_v8 }
  0x1e   :  { %319 = vmatprep.subr.bf16.mxu0 %v101_v10 }
  0x1f   :  { %356 = vmatpush3.bf16.msra.mxu1 %v108_v2 }
  0x20   :  { %357 = vmatprep.subr.bf16.mxu1 %v109_v13 }
  0x21   :  { %320 = vmatpush3.bf16.msra.mxu0 %v93_v14 }
  0x23   :  { %358 = vmatpush3.bf16.msra.mxu1 %v109_v13 }
  0x24   :  { %175 = vmatmul.mubr.bf16.vlgmr.msra.gmra.mrb[0].mxu0 %v366_v15 }
  0x25   :  { %182 = vmatprep.mubr.bf16.mxu0 %v371_v17 }
  0x26   :  { %360 = vmatmul.mubr.bf16.vlgmr.msra.gmra.mrb[0].mxu1 %v370_v16 }
  0x2c   :  { %183 = vmatmul.mubr.bf16.gmra.mrb[4].mxu0 %v373_v18 }
  0x90   :  { %v262_v19 = vpop.permute.xlu0 %261 }
  0x91   :  { %v272_v39 = vpop.permute.xlu1 %271 }
  0x94   :  { %v267_v32 = vpop.permute.xlu0 %266 }
  0x95   :  { %v277_v50 = vpop.permute.xlu1 %276 }
  0xf7   :  { %v321_v20 = vpop.f32.mrb[0].mxu0 }
  0xf8   :  { %v322_v21 = vpop.f32.mrb[1].mxu0 }
  0xf9   :  { %v361_v22 = vpop.f32.mrb[0].mxu1  ;;  %v323_v23 = vadd.f32 %v322_v21, %v321_v20  ;;  %v324_v24 = vpop.f32.mrb[2].mxu0 }
  0xfa   :  { %v225_v25 = vpop.f32.mrb[1].mxu1  ;;  %v325_v26 = vpop.f32.mrb[3].mxu0 }
  0xfb   :  { %v362_v27 = vpop.f32.mrb[2].mxu1  ;;  %v326_v28 = vadd.f32 %v325_v26, %v324_v24  ;;  %v226_v29 = vadd.f32 %v323_v23, %v225_v25 }
  0xfc   :  { %v228_v30 = vpop.f32.mrb[3].mxu1 }
  0xfd   :  { %v279_v33 = vadd.f32 %v262_v19, %v226_v29  ;;  %v229_v34 = vadd.f32 %v326_v28, %v228_v30 }
  0xff   :  { %v287_v36 = vadd.f32 %v283_v31, %v279_v33  ;;  %v280_v37 = vadd.f32 %v267_v32, %v229_v34  ;;  %v327_v38 = vpop.f32.mrb[4].mxu0 }
 0x100   :  { %v328_v40 = vpop.f32.mrb[5].mxu0 }
 0x101   :  { %291 = vst [vmem:[%s602_s4] sm:$0xff] %v287_v36  ;;  %v288_v41 = vadd.f32 %v284_v35, %v280_v37  ;;  %v329_v42 = vadd.f32 %v328_v40, %v327_v38  ;;  %v330_v43 = vpop.f32.mrb[6].mxu0 }
 0x102   :  { %v331_v44 = vpop.f32.mrb[7].mxu0 }
 0x103   :  { %292 = vst [vmem:[%s602_s4 + $0x8] sm:$0xff] %v288_v41  ;;  %v234_v45 = vadd.f32 %v361_v22, %v329_v42  ;;  %v332_v46 = vadd.f32 %v331_v44, %v330_v43 }
 0x105   :  { %v281_v48 = vadd.f32 %v272_v39, %v234_v45  ;;  %v237_v49 = vadd.f32 %v362_v27, %v332_v46 }
 0x107   :  { %v289_v52 = vadd.f32 %v285_v47, %v281_v48  ;;  %v282_v53 = vadd.f32 %v277_v50, %v237_v49 }
 0x109   :  { %293 = vst [vmem:[%s602_s4 + $0x10] sm:$0xff] %v289_v52  ;;  %v290_v54 = vadd.f32 %v286_v51, %v282_v53 }
 0x10b   :  { %294 = vst [vmem:[%s602_s4 + $0x18] sm:$0xff] %v290_v54 }

// kernel: encoder_forward.44
= control target key start
LH: loop header
LB: loop body
LE: loop exit
PB: predicated region body
PF: predicated region fallthrough
CT: control target
= control target key end

     0   :  { %s501_s12 = smov 0   ;;  %s552_s0 = inlined_call_operand.vmem [shape: f32[8,4,2,64], index: 0, kind: input, shape index: {}]   ;;  %s553_s1 = inlined_call_operand.vmem [shape: f32[8,4,1,1], index: 1, kind: input, shape index: {}]   ;;  %s554_s2 = inlined_call_operand.vmem [shape: f32[8,4,1,1], index: 2, kind: input, shape index: {}]   ;;  %s555_s3 = inlined_call_operand.vmem [shape: f32[8,4,2,64], index: 3, kind: output, shape index: {}]  }
   0x1 LB: > { %s436_s13 = sadd.s32 4294967295, %s478_s12   ;;  %p440_p0 = scmp.ge.s32.totalorder %s478_s12, 1  ;;  %s478_s12 = sphi %s501_s12, %s13_s12  }
   0x2   : > { %p155_p1 = scmp.lt.s32.totalorder %s478_s12, 9 }
   0x4   : > { %p156_p2 = pnand %p440_p0, %p155_p1 }
   0x5   : > { %p187_p3 = scmp.lt.s32.totalorder (!%p156_p2), %s436_s13, 7  ;;  %vm209_vm0 = vcmask (!%p156_p2), 517120   ;;  %v480_v8 = vmov (!%p156_p2), 0   ;;  %vm222_vm1 = vcmask (!%p156_p2), 1041408  }
   0x6   : > { %159 = sbr.rel (%p156_p2) target bundleno = 419 (0x1a3), region = 32  ;;  %469 = vset.pattern.permute.xlu1 (!%p156_p2), %v480_v8  ;;  %468 = vset.pattern.permute.xlu0 (!%p156_p2), %v480_v8 }
   0xd   : > { %s557_s13 = smov (!%p187_p3, %s436_s13), 7 }
   0xe   : > { %s457_s14 = sshll.u32 %s557_s13, 3  ;;  %s443_s18 = sshll.u32 %s557_s13, 2 }
   0xf   : > { %s191_s17 = scalar_lea.vmem %s552_s0, %s457_s14  ;;  %s195_s21 = scalar_lea.vmem %s553_s1, %s443_s18 }
  0x10   : > { %v205_v0 = vld [vmem:[%s191_s17] sm:$0x3]  ;;  %v207_v1 = vld [vmem:[%s191_s17 + $0x4] sm:$0x3]  ;;  %v206_v2 = vld [vmem:[%s191_s17 + $0x2] sm:$0x3]  ;;  %s199_s24 = scalar_lea.vmem %s554_s2, %s443_s18  ;;  %s204_s27 = scalar_lea.vmem %s555_s3, %s457_s14 }
  0x11   : > { %v210_v3 = vsel %vm209_vm0, %v205_v0, 0.0  ;;  %v216_v4 = vsel %vm209_vm0, %v207_v1, 0.0  ;;  %v208_v5 = vld [vmem:[%s191_s17 + $0x6] sm:$0x3]  ;;  %v213_v6 = vsel %vm209_vm0, %v206_v2, 0.0 }
  0x12   : > { %211 = vadd.xlane.f32.xlu0 %v210_v3  ;;  %217 = vadd.xlane.f32.xlu1 %v216_v4  ;;  %v219_v7 = vsel %vm209_vm0, %v208_v5, 0.0  ;;  %v448_v30 = vld [vmem:[%s195_s21 + $0x1] ss:$0 sm:$0xff]  ;;  %v449_v31 = vld [vmem:[%s195_s21 + $0x2] ss:$0 sm:$0xff] }
  0x13   : > { %v450_v32 = vld [vmem:[%s195_s21 + $0x3] ss:$0 sm:$0xff]  ;;  %v447_v33 = vld [vmem:[%s195_s21] ss:$0 sm:$0xff]  ;;  %v452_v35 = vld [vmem:[%s199_s24 + $0x1] ss:$0 sm:$0xff] }
  0x14   : > { %v451_v34 = vld [vmem:[%s199_s24] ss:$0 sm:$0xff]  ;;  %v453_v36 = vld [vmem:[%s199_s24 + $0x2] ss:$0 sm:$0xff]  ;;  %v454_v40 = vld [vmem:[%s199_s24 + $0x3] ss:$0 sm:$0xff] }
  0x16   : > { %214 = vadd.xlane.f32.xlu0 %v213_v6  ;;  %220 = vadd.xlane.f32.xlu1 %v219_v7 }
  0x9f   : > { %v212_v9 = vpop.xlane.xlu0 %211  ;;  %v218_v10 = vpop.xlane.xlu1 %217 }
  0xa0   : > { %v223_v13 = vsel %vm222_vm1, %v212_v9, 0.0  ;;  %v226_v16 = vsel %vm222_vm1, %v218_v10, 0.0 }
  0xa3   : > { %v215_v11 = vpop.xlane.xlu0 %214  ;;  %v221_v12 = vpop.xlane.xlu1 %220 }
  0xa4   : > { %v224_v14 = vsel %vm222_vm1, %v215_v11, 0.0  ;;  %v228_v17 = vsel %vm222_vm1, %v221_v12, 0.0 }
  0xa5   : > { %v225_v15 = vadd.f32 %v224_v14, %v223_v13 }
  0xa7   : > { %v227_v18 = vadd.f32 %v226_v16, %v225_v15 }
  0xa9   : > { %v229_v19 = vadd.f32 %v228_v17, %v227_v18 }
  0xab   : > { %v230_v20 = vmul.f32 0.00390625, %v229_v19 }
  0xad   : > { %v232_v21 = vsub.f32 %v206_v2, %v230_v20  ;;  %v231_v22 = vsub.f32 %v205_v0, %v230_v20  ;;  %v233_v23 = vsub.f32 %v207_v1, %v230_v20  ;;  %v234_v37 = vsub.f32 %v208_v5, %v230_v20 }
  0xaf   : > { %v236_v24 = vmul.f32 %v232_v21, %v232_v21  ;;  %v235_v25 = vmul.f32 %v231_v22, %v231_v22  ;;  %v237_v28 = vmul.f32 %v233_v23, %v233_v23  ;;  %v238_v38 = vmul.f32 %v234_v37, %v234_v37 }
  0xb1   : > { %v242_v26 = vsel %vm209_vm0, %v236_v24, 0.0  ;;  %v239_v27 = vsel %vm209_vm0, %v235_v25, 0.0  ;;  %v245_v29 = vsel %vm209_vm0, %v237_v28, 0.0  ;;  %v248_v39 = vsel %vm209_vm0, %v238_v38, 0.0 }
  0xb2   : > { %243 = vadd.xlane.f32.xlu1 %v242_v26  ;;  %240 = vadd.xlane.f32.xlu0 %v239_v27 }
  0xb6   : > { %246 = vadd.xlane.f32.xlu0 %v245_v29 }
  0xc3   : > { %294 = vperm.xlu1 %469, %v448_v30  }
  0xc7   : > { %298 = vperm.xlu1 %469, %v449_v31  }
  0xcb   : > { %302 = vperm.xlu1 %469, %v450_v32  }
  0xcc   : > { %290 = vperm.xlu0 %468, %v447_v33  }
  0xcf   : > { %334 = vperm.xlu1 %469, %v451_v34  }
  0xd3   : > { %338 = vperm.xlu1 %469, %v452_v35  }
  0xd7   : > { %342 = vperm.xlu1 %469, %v453_v36  }
  0xfb   : > { %249 = vadd.xlane.f32.xlu1 %v248_v39 }
 0x10c   : > { %346 = vperm.xlu1 %469, %v454_v40  }
 0x13f   : > { %v244_v41 = vpop.xlane.xlu1 %243  ;;  %v241_v46 = vpop.xlane.xlu0 %240 }
 0x140   : > { %v252_v49 = vsel %vm222_vm1, %v244_v41, 0.0  ;;  %v251_v50 = vsel %vm222_vm1, %v241_v46, 0.0 }
 0x141   : > { %v253_v53 = vadd.f32 %v252_v49, %v251_v50 }
 0x143   : > { %v295_v42 = vpop.permute.xlu1 %294  ;;  %v247_v48 = vpop.xlane.xlu0 %246 }
 0x144   : > { %v254_v52 = vsel %vm222_vm1, %v247_v48, 0.0 }
 0x145   : > { %v255_v54 = vadd.f32 %v254_v52, %v253_v53 }
 0x147   : > { %v299_v43 = vpop.permute.xlu1 %298 }
 0x14b   : > { %v303_v44 = vpop.permute.xlu1 %302  ;;  %v291_v61 = vpop.permute.xlu0 %290 }
 0x14f   : > { %v335_v45 = vpop.permute.xlu1 %334 }
 0x153   : > { %v339_v47 = vpop.permute.xlu1 %338 }
 0x157   : > { %v343_v51 = vpop.permute.xlu1 %342 }
 0x188   : > { %v250_v55 = vpop.xlane.xlu1 %249 }
 0x189   : > { %v256_v56 = vsel %vm222_vm1, %v250_v55, 0.0 }
 0x18a   : > { %v257_v57 = vadd.f32 %v256_v56, %v255_v54 }
 0x18c   : > { %v258_v58 = vmul.f32 0.00390625, %v257_v57  ;;  %v347_v6 = vpop.permute.xlu1 %346 }
 0x18e   : > { %v259_v59 = vadd.f32 1e-06, %v258_v58 }
 0x190   : > { %470 = vrsqrt.f32 %v259_v59 }
 0x19a   : > { %v471_v60 = vpop.eup %470 }
 0x19b   : > { %v262_v62 = vmul.f32 %v471_v60, %v232_v21  ;;  %v263_v63 = vmul.f32 %v471_v60, %v233_v23  ;;  %v264_v0 = vmul.f32 %v471_v60, %v234_v37  ;;  %v261_v1 = vmul.f32 %v471_v60, %v231_v22 }
 0x19d   : > { %v306_v2 = vmul.f32 %v295_v42, %v262_v62  ;;  %v307_v3 = vmul.f32 %v299_v43, %v263_v63  ;;  %v308_v4 = vmul.f32 %v303_v44, %v264_v0  ;;  %v305_v5 = vmul.f32 %v291_v61, %v261_v1 }
 0x19f   : > { %v350_v7 = vadd.f32 %v339_v47, %v306_v2  ;;  %v351_v8 = vadd.f32 %v343_v51, %v307_v3  ;;  %v352_v9 = vadd.f32 %v347_v6, %v308_v4  ;;  %v349_v10 = vadd.f32 %v335_v45, %v305_v5 }
 0x1a1   : > { %354 = vst.msk [vmem:[%s204_s27 + $0x2] sm:$0x3] %vm209_vm0, %v350_v7  ;;  %355 = vst.msk [vmem:[%s204_s27 + $0x4] sm:$0x3] %vm209_vm0, %v351_v8 }
 0x1a2   : > { %356 = vst.msk [vmem:[%s204_s27 + $0x6] sm:$0x3] %vm209_vm0, %v352_v9  ;;  %353 = vst.msk [vmem:[%s204_s27] sm:$0x3] %vm209_vm0, %v349_v10 }
 0x1a3 PF: > { %s13_s12 = sadd.s32 1, %s478_s12  }
 0x1a4   : > { %p10_p4 = scmp.ge.s32.totalorder %s13_s12, 10  }
 0x1a6   :  { %12 = sbr.rel (!%p10_p4) target bundleno = 1 (0x1), region = 68 }

// kernel: encoder_forward.46
= control target key start
LH: loop header
LB: loop body
LE: loop exit
PB: predicated region body
PF: predicated region fallthrough
CT: control target
= control target key end

     0   :  { %v204_v3 = vmov 0   ;;  %s303_s1 = inlined_call_operand.vmem [shape: f32[128,128], index: 1, kind: input, shape index: {}]   ;;  %s304_s0 = inlined_call_operand.vmem [shape: bf16[32,128], index: 0, kind: input, shape index: {}]   ;;  %s305_s2 = inlined_call_operand.vmem [shape: f32[32,1], index: 2, kind: input, shape index: {}]   ;;  %s306_s3 = inlined_call_operand.vmem [shape: f32[32,128], index: 3, kind: output, shape index: {}]  }
   0x1   :  { %v31_v0 = vld [vmem:[%s303_s1] sm:$0xff]  ;;  %v32_v1 = vld [vmem:[%s303_s1 + $0x8] sm:$0xff]  ;;  %v33_v2 = vld [vmem:[%s303_s1 + $0x10] sm:$0xff]  ;;  %201 = vset.pattern.permute.xlu1 %v204_v3  ;;  %200 = vset.pattern.permute.xlu0 %v204_v3 }
   0x2   :  { %v47_v4 = vpack.c.bf16 %v32_v1, %v31_v0  ;;  %v34_v5 = vld [vmem:[%s303_s1 + $0x18] sm:$0xff]  ;;  %v35_v7 = vld [vmem:[%s303_s1 + $0x20] sm:$0xff]  ;;  %v36_v8 = vld [vmem:[%s303_s1 + $0x28] sm:$0xff] }
   0x3   :  { %v48_v6 = vpack.c.bf16 %v34_v5, %v33_v2  ;;  %v37_v9 = vld [vmem:[%s303_s1 + $0x30] sm:$0xff]  ;;  %v49_v10 = vpack.c.bf16 %v36_v8, %v35_v7  ;;  %v38_v11 = vld [vmem:[%s303_s1 + $0x38] sm:$0xff]  ;;  %v202_v12 = vld [vmem:[%s304_s0] sm:$0xff]  }
   0x4   :  { %179 = vmatprep.subr.bf16.mxu0 %v47_v4  ;;  %v133_v13 = vld [vmem:[%s305_s2 + $0x10] sm:$0xff]  ;;  %v131_v14 = vld [vmem:[%s305_s2] sm:$0xff]  ;;  %195 = vmatprep.mubr.bf16.mxu0 %v202_v12  ;;  %v50_v15 = vpack.c.bf16 %v38_v11, %v37_v9  ;;  %v40_v17 = vld [vmem:[%s303_s1 + $0x48] sm:$0xff] }
   0x5   :  { %180 = vmatpush3.bf16.msra.mxu0 %v47_v4  ;;  %147 = vperm.xlu1 %201, %v133_v13   ;;  %v39_v16 = vld [vmem:[%s303_s1 + $0x40] sm:$0xff]  ;;  %v134_v18 = vld [vmem:[%s305_s2 + $0x18] sm:$0xff]  ;;  %v132_v19 = vld [vmem:[%s305_s2 + $0x8] sm:$0xff] }
   0x6   :  { %181 = vmatprep.subr.bf16.mxu0 %v48_v6  ;;  %137 = vperm.xlu0 %200, %v131_v14   ;;  %v51_v20 = vpack.c.bf16 %v40_v17, %v39_v16  ;;  %v41_v21 = vld [vmem:[%s303_s1 + $0x50] sm:$0xff]  ;;  %v42_v22 = vld [vmem:[%s303_s1 + $0x58] sm:$0xff]  ;;  %v43_v24 = vld [vmem:[%s303_s1 + $0x60] sm:$0xff] }
   0x7   :  { %v52_v23 = vpack.c.bf16 %v42_v22, %v41_v21  ;;  %v44_v25 = vld [vmem:[%s303_s1 + $0x68] sm:$0xff]  ;;  %v45_v27 = vld [vmem:[%s303_s1 + $0x70] sm:$0xff]  ;;  %v46_v28 = vld [vmem:[%s303_s1 + $0x78] sm:$0xff] }
   0x8   :  { %v53_v26 = vpack.c.bf16 %v44_v25, %v43_v24  ;;  %v54_v29 = vpack.c.bf16 %v46_v28, %v45_v27  ;;  %v203_v30 = vld [vmem:[%s304_s0 + $0x8] sm:$0xff]  }
   0x9   :  { %182 = vmatpush3.bf16.msra.mxu0 %v48_v6  ;;  %152 = vperm.xlu1 %201, %v134_v18  }
   0xa   :  { %183 = vmatprep.subr.bf16.mxu0 %v49_v10  ;;  %142 = vperm.xlu0 %200, %v132_v19  }
   0xd   :  { %184 = vmatpush3.bf16.msra.mxu0 %v49_v10 }
   0xe   :  { %185 = vmatprep.subr.bf16.mxu0 %v50_v15 }
  0x11   :  { %186 = vmatpush3.bf16.msra.mxu0 %v50_v15 }
  0x12   :  { %187 = vmatprep.subr.bf16.mxu0 %v51_v20 }
  0x15   :  { %188 = vmatpush3.bf16.msra.mxu0 %v51_v20 }
  0x16   :  { %189 = vmatprep.subr.bf16.mxu0 %v52_v23 }
  0x19   :  { %190 = vmatpush3.bf16.msra.mxu0 %v52_v23 }
  0x1a   :  { %191 = vmatprep.subr.bf16.mxu0 %v53_v26 }
  0x1d   :  { %192 = vmatpush3.bf16.msra.mxu0 %v53_v26 }
  0x1e   :  { %193 = vmatprep.subr.bf16.mxu0 %v54_v29 }
  0x21   :  { %194 = vmatpush3.bf16.msra.mxu0 %v54_v29 }
  0x24   :  { %196 = vmatmul.mubr.bf16.vlgmr.msra.gmra.mrb[0].mxu0 %v203_v30 }
  0x84   :  { %v148_v31 = vpop.permute.xlu1 %147 }
  0x85   :  { %v138_v32 = vpop.permute.xlu0 %137 }
  0x88   :  { %v153_v36 = vpop.permute.xlu1 %152 }
  0x89   :  { %v143_v39 = vpop.permute.xlu0 %142 }
  0xf7   :  { %v197_v33 = vpop.f32.mrb[0].mxu0 }
  0xf8   :  { %v157_v34 = vadd.f32 %v197_v33, %v148_v31  ;;  %v101_v35 = vpop.f32.mrb[1].mxu0 }
  0xf9   :  { %v155_v37 = vadd.f32 %v138_v32, %v101_v35  ;;  %v198_v38 = vpop.f32.mrb[2].mxu0 }
  0xfa   :  { %161 = vst [vmem:[%s306_s3 + $0x10] sm:$0xff] %v157_v34  ;;  %v158_v40 = vadd.f32 %v198_v38, %v153_v36  ;;  %v104_v41 = vpop.f32.mrb[3].mxu0 }
  0xfb   :  { %159 = vst [vmem:[%s306_s3] sm:$0xff] %v155_v37  ;;  %v156_v42 = vadd.f32 %v143_v39, %v104_v41 }
  0xfc   :  { %162 = vst [vmem:[%s306_s3 + $0x18] sm:$0xff] %v158_v40 }
  0xfd   :  { %160 = vst [vmem:[%s306_s3 + $0x8] sm:$0xff] %v156_v42 }

// kernel: encoder_forward.48
= control target key start
LH: loop header
LB: loop body
LE: loop exit
PB: predicated region body
PF: predicated region fallthrough
CT: control target
= control target key end

     0   :  { %s1152_s12 = smov 0   ;;  %s1154_s13 = smov 0   ;;  %s1443_s0 = inlined_call_operand.vmem [shape: f32[2,64,32], index: 0, kind: input, shape index: {}]   ;;  %s1444_s1 = inlined_call_operand.vmem [shape: f32[2,64,32], index: 1, kind: input, shape index: {}]   ;;  %s1445_s2 = inlined_call_operand.vmem [shape: f32[2,64,32], index: 2, kind: input, shape index: {}]   ;;  %s1446_s3 = inlined_call_operand.vmem [shape: f32[2,64,32], index: 3, kind: output, shape index: {}]  }
   0x1   :  { %s1156_s14 = smov 0  }
   0x2 LB: > { %s25_s15 = sadd.s32 1, %s1123_s13  ;;  %p953_p0 = scmp.ge.s32.totalorder %s1127_s14, 1  ;;  %s1127_s14 = sphi %s1156_s14, %s13_s14   ;;  %s1123_s13 = sphi %s1154_s13, %s1448_s13   ;;  %s1119_s12 = sphi %s1152_s12, %s1447_s12  }
   0x3   : > { %p27_p1 = scmp.ge.s32.totalorder %s25_s15, 2  ;;  %p183_p2 = scmp.lt.s32.totalorder %s1127_s14, 3 }
   0x5   : > { %s1450_s15 = smov (%p27_p1, %s25_s15), 0  ;;  %p184_p3 = pnand %p953_p0, %p183_p2 }
   0x6   : > { %p225_p4 = scmp.lt.s32.totalorder (!%p184_p3), %s1119_s12, 1  ;;  %vm277_vm0 = vcmask (!%p184_p3), 261120   ;;  %vm260_vm1 = vcmask (!%p184_p3), 7168   ;;  %v1129_v28 = vmov (!%p184_p3), -inf   ;;  %vm420_vm2 = vcmask (!%p184_p3), 523264  }
   0x7   : > { %187 = sbr.rel (%p184_p3) target bundleno = 875 (0x36b), region = 32  ;;  %263 = vst.msk [vmem:[#allocation2 + $0x10] sm:$0xff] (!%p184_p3), %vm260_vm1, %v1129_v28  ;;  %261 = vst.msk [vmem:[#allocation2] sm:$0xff] (!%p184_p3), %vm260_vm1, %v1129_v28  ;;  %v1130_v53 = vmov (!%p184_p3), 0   ;;  %v1131_v54 = vmov (!%p184_p3), 0.0  }
   0x8   : > { %262 = vst.msk [vmem:[#allocation2 + $0x8] sm:$0xff] (!%p184_p3), %vm260_vm1, %v1129_v28  ;;  %264 = vst.msk [vmem:[#allocation2 + $0x18] sm:$0xff] (!%p184_p3), %vm260_vm1, %v1129_v28  ;;  %1055 = vset.pattern.permute.xlu0 (!%p184_p3), %v1130_v53  ;;  %1056 = vset.pattern.permute.xlu1 (!%p184_p3), %v1130_v53 }
   0x9   : > { %265 = vst.msk [vmem:[#allocation2 + $0x20] sm:$0xff] (!%p184_p3), %vm260_vm1, %v1129_v28  ;;  %266 = vst.msk [vmem:[#allocation2 + $0x28] sm:$0xff] (!%p184_p3), %vm260_vm1, %v1129_v28 }
   0xa   : > { %267 = vst.msk [vmem:[#allocation2 + $0x30] sm:$0xff] (!%p184_p3), %vm260_vm1, %v1129_v28  ;;  %268 = vst.msk [vmem:[#allocation2 + $0x38] sm:$0xff] (!%p184_p3), %vm260_vm1, %v1129_v28 }
   0xb   : > { %271 = vst.msk [vmem:[#allocation3 + $0x10] sm:$0xff] (!%p184_p3), %vm260_vm1, %v1131_v54  ;;  %269 = vst.msk [vmem:[#allocation3] sm:$0xff] (!%p184_p3), %vm260_vm1, %v1131_v54 }
   0xc   : > { %270 = vst.msk [vmem:[#allocation3 + $0x8] sm:$0xff] (!%p184_p3), %vm260_vm1, %v1131_v54  ;;  %272 = vst.msk [vmem:[#allocation3 + $0x18] sm:$0xff] (!%p184_p3), %vm260_vm1, %v1131_v54 }
   0xd   : > { %273 = vst.msk [vmem:[#allocation3 + $0x20] sm:$0xff] (!%p184_p3), %vm260_vm1, %v1131_v54  ;;  %274 = vst.msk [vmem:[#allocation3 + $0x28] sm:$0xff] (!%p184_p3), %vm260_vm1, %v1131_v54 }
   0xe   : > { %s1452_s12 = smov (!%p225_p4, %s1119_s12), 1  ;;  %275 = vst.msk [vmem:[#allocation3 + $0x30] sm:$0xff] %vm260_vm1, %v1131_v54  ;;  %276 = vst.msk [vmem:[#allocation3 + $0x38] sm:$0xff] %vm260_vm1, %v1131_v54  ;;  %v1258_v55 = vld [vmem:[#allocation2 + $0x10] sm:$0xff]  ;;  %v1260_v56 = vld [vmem:[#allocation2] sm:$0xff] }
   0xf   : > { %s1170_s16 = sshll.u32 %s1452_s12, 6  ;;  %278 = vst.msk [vmem:[#allocation4] sm:$0xff] %vm277_vm0, %v1131_v54  ;;  %279 = vst.msk [vmem:[#allocation4 + $0x8] sm:$0xff] %vm277_vm0, %v1131_v54  ;;  %v1268_v61 = vld [vmem:[#allocation2 + $0x18] sm:$0xff]  ;;  %v1275_v63 = vld [vmem:[#allocation2 + $0x8] sm:$0xff] }
  0x10   : > { %s238_s19 = scalar_lea.vmem %s1444_s1, %s1170_s16  ;;  %s1180_s22 = scalar_lea.vmem %s1443_s0, %s1170_s16  ;;  %280 = vst.msk [vmem:[#allocation4 + $0x10] sm:$0xff] %vm277_vm0, %v1131_v54  ;;  %281 = vst.msk [vmem:[#allocation4 + $0x18] sm:$0xff] %vm277_vm0, %v1131_v54 }
  0x11   : > { %v298_v0 = vld [vmem:[%s238_s19] sm:$0xff]  ;;  %v299_v1 = vld [vmem:[%s238_s19 + $0x8] sm:$0xff]  ;;  %v300_v2 = vld [vmem:[%s238_s19 + $0x10] sm:$0xff]  ;;  %282 = vst.msk [vmem:[#allocation4 + $0x20] sm:$0xff] %vm277_vm0, %v1131_v54  ;;  %s1305_s25 = scalar_lea.vmem %s1445_s2, %s1170_s16  ;;  %s1416_s28 = scalar_lea.vmem %s1446_s3, %s1170_s16 }
  0x12   : > { %v306_v3 = vpack.c.bf16 %v299_v1, %v298_v0  ;;  %v301_v4 = vld [vmem:[%s238_s19 + $0x18] sm:$0xff]  ;;  %v286_v6 = vld [vmem:[%s1180_s22] sm:$0xff]  ;;  %v287_v8 = vld [vmem:[%s1180_s22 + $0x8] sm:$0xff]  ;;  %283 = vst.msk [vmem:[#allocation4 + $0x28] sm:$0xff] %vm277_vm0, %v1131_v54 }
  0x13   : > { %v307_v5 = vpack.c.bf16 %v301_v4, %v300_v2  ;;  %v294_v9 = vpack.c.bf16 %v287_v8, %v286_v6  ;;  %v302_v10 = vld [vmem:[%s238_s19 + $0x20] sm:$0xff]  ;;  %v303_v11 = vld [vmem:[%s238_s19 + $0x28] sm:$0xff]  ;;  %v304_v14 = vld [vmem:[%s238_s19 + $0x30] sm:$0xff]  ;;  %284 = vst.msk [vmem:[#allocation4 + $0x30] sm:$0xff] %vm277_vm0, %v1131_v54 }
  0x14   : > { %1024 = vmatprep.subr.msk.bf16.mxu0 %vm277_vm0, %v306_v3  ;;  %v336_v7 = vsel %vm277_vm0, %v306_v3, 0  ;;  %v308_v13 = vpack.c.bf16 %v303_v11, %v302_v10  ;;  %v305_v15 = vld [vmem:[%s238_s19 + $0x38] sm:$0xff]  ;;  %v288_v19 = vld [vmem:[%s1180_s22 + $0x10] sm:$0xff]  ;;  %v290_v21 = vld [vmem:[%s1180_s22 + $0x20] sm:$0xff]  ;;  %285 = vst.msk [vmem:[#allocation4 + $0x38] sm:$0xff] %vm277_vm0, %v1131_v54 }
  0x15   : > { %993 = vmatpush3.bf16.xpose.msra.mxu0 %v336_v7  ;;  %1000 = vmatprep.mubr.msk.bf16.mxu0 %vm277_vm0, %v294_v9  ;;  %v339_v12 = vsel %vm277_vm0, %v307_v5, 0  ;;  %v309_v17 = vpack.c.bf16 %v305_v15, %v304_v14  ;;  %v289_v20 = vld [vmem:[%s1180_s22 + $0x18] sm:$0xff]  ;;  %v291_v22 = vld [vmem:[%s1180_s22 + $0x28] sm:$0xff]  ;;  %v292_v25 = vld [vmem:[%s1180_s22 + $0x30] sm:$0xff] }
  0x16   : > { %1025 = vmatprep.subr.msk.bf16.mxu0 %vm277_vm0, %v307_v5  ;;  %v342_v16 = vsel %vm277_vm0, %v308_v13, 0  ;;  %v295_v23 = vpack.c.bf16 %v289_v20, %v288_v19  ;;  %v296_v24 = vpack.c.bf16 %v291_v22, %v290_v21  ;;  %v293_v26 = vld [vmem:[%s1180_s22 + $0x38] sm:$0xff]  ;;  %v1293_v6 = vld [vmem:[#allocation2 + $0x20] sm:$0xff]  ;;  %v1299_v9 = vld [vmem:[#allocation2 + $0x28] sm:$0xff] }
  0x17   : > { %v345_v18 = vsel %vm277_vm0, %v309_v17, 0  ;;  %v297_v27 = vpack.c.bf16 %v293_v26, %v292_v25  ;;  %v310_v11 = vld [vmem:[%s1305_s25] sm:$0xff]  ;;  %v1313_v14 = vld [vmem:[#allocation2 + $0x30] sm:$0xff]  ;;  %v1322_v19 = vld [vmem:[#allocation2 + $0x38] sm:$0xff] }
  0x18   : > { %v312_v22 = vld [vmem:[%s1305_s25 + $0x10] sm:$0xff] }
  0x1d   : > { %995 = vmatpush3.bf16.xpose.msra.mxu0 %v339_v12  ;;  %v311_v12 = vld [vmem:[%s1305_s25 + $0x8] sm:$0xff] }
  0x1e   : > { %1026 = vmatprep.subr.msk.bf16.mxu0 %vm277_vm0, %v308_v13  ;;  %v318_v15 = vpack.c.bf16 %v311_v12, %v310_v11 }
  0x20   : > { %1008 = vmatprep.subr.bf16.mxu1 %v318_v15 }
  0x21   : > { %1009 = vmatpush3.bf16.msra.mxu1 %v318_v15 }
  0x25   : > { %997 = vmatpush3.bf16.xpose.msra.mxu0 %v342_v16 }
  0x26   : > { %1027 = vmatprep.subr.msk.bf16.mxu0 %vm277_vm0, %v309_v17 }
  0x2d   : > { %999 = vmatpush3.bf16.xpose.msra.mxu0 %v345_v18 }
  0x34   : > { %1001 = vmatmul.mubr.msk.bf16.vlgmr.msra.gmra.mrb[0].mxu0 %vm277_vm0, %v295_v23  ;;  %v313_v23 = vld [vmem:[%s1305_s25 + $0x18] sm:$0xff] }
  0x35   : > { %1004 = vmatprep.mubr.msk.bf16.mxu0 %vm277_vm0, %v296_v24  ;;  %v319_v25 = vpack.c.bf16 %v313_v23, %v312_v22 }
  0x37   : > { %1010 = vmatprep.subr.bf16.mxu1 %v319_v25 }
  0x38   : > { %1011 = vmatpush3.bf16.msra.mxu1 %v319_v25 }
  0x3c   : > { %1005 = vmatmul.mubr.msk.bf16.gmra.mrb[4].mxu0 %vm277_vm0, %v297_v27 }
 0x107   : > { %v1002_v29 = vpop.f32.mrb[0].mxu0 }
 0x108   : > { %v1210_v30 = vmul.f32 0.17677669, %v1002_v29  ;;  %v381_v31 = vpop.f32.mrb[1].mxu0  ;;  %v314_v29 = vld [vmem:[%s1305_s25 + $0x20] sm:$0xff] }
 0x109   : > { %v1212_v32 = vmul.f32 0.17677669, %v381_v31  ;;  %v1003_v33 = vpop.f32.mrb[2].mxu0  ;;  %v315_v31 = vld [vmem:[%s1305_s25 + $0x28] sm:$0xff] }
 0x10a   : > { %v1214_v34 = vmul.f32 0.17677669, %v1003_v33  ;;  %v384_v35 = vpop.f32.mrb[3].mxu0  ;;  %v427_v36 = vsel %vm420_vm2, %v1210_v30, -inf  ;;  %v320_v33 = vpack.c.bf16 %v315_v31, %v314_v29 }
 0x10b   : > { %v1218_v37 = vmul.f32 0.17677669, %v384_v35  ;;  %428 = vmax.xlane.f32.xlu1 %v427_v36  ;;  %v421_v38 = vsel %vm420_vm2, %v1212_v32, -inf  ;;  %v316_v35 = vld [vmem:[%s1305_s25 + $0x30] sm:$0xff]  ;;  %v317_v36 = vld [vmem:[%s1305_s25 + $0x38] sm:$0xff] }
 0x10c   : > { %422 = vmax.xlane.f32.xlu0 %v421_v38  ;;  %v430_v39 = vsel %vm420_vm2, %v1214_v34, -inf  ;;  %1012 = vmatprep.subr.bf16.mxu1 %v320_v33  ;;  %v321_v38 = vpack.c.bf16 %v317_v36, %v316_v35 }
 0x10d   : > { %v424_v41 = vsel %vm420_vm2, %v1218_v37, -inf  ;;  %1013 = vmatpush3.bf16.msra.mxu1 %v320_v33 }
 0x10e   : > { %1014 = vmatprep.subr.bf16.mxu1 %v321_v38 }
 0x10f   : > { %431 = vmax.xlane.f32.xlu1 %v430_v39  ;;  %v1006_v40 = vpop.f32.mrb[4].mxu0 }
 0x110   : > { %425 = vmax.xlane.f32.xlu0 %v424_v41  ;;  %v397_v42 = vpop.f32.mrb[5].mxu0  ;;  %v1228_v46 = vmul.f32 0.17677669, %v1006_v40 }
 0x111   : > { %v1226_v43 = vmul.f32 0.17677669, %v397_v42  ;;  %v1007_v44 = vpop.f32.mrb[6].mxu0  ;;  %1015 = vmatpush3.bf16.msra.mxu1 %v321_v38 }
 0x112   : > { %v400_v45 = vpop.f32.mrb[7].mxu0  ;;  %v1234_v49 = vmul.f32 0.17677669, %v1007_v44  ;;  %v439_v51 = vsel %vm420_vm2, %v1228_v46, -inf }
 0x113   : > { %v1230_v47 = vmul.f32 0.17677669, %v400_v45  ;;  %v433_v48 = vsel %vm420_vm2, %v1226_v43, -inf }
 0x114   : > { %434 = vmax.xlane.f32.xlu0 %v433_v48  ;;  %v442_v52 = vsel %vm420_vm2, %v1234_v49, -inf }
 0x115   : > { %v436_v50 = vsel %vm420_vm2, %v1230_v47, -inf }
 0x116   : > { %437 = vmax.xlane.f32.xlu1 %v436_v50 }
 0x118   : > { %440 = vmax.xlane.f32.xlu0 %v439_v51 }
 0x11a   : > { %443 = vmax.xlane.f32.xlu1 %v442_v52 }
 0x198   : > { %v429_v57 = vpop.xlane.xlu1 %428 }
 0x199   : > { %v1263_v58 = vmax.f32 %v1258_v55, %v429_v57  ;;  %v423_v59 = vpop.xlane.xlu0 %422 }
 0x19a   : > { %v1266_v60 = vmax.f32 %v1260_v56, %v423_v59 }
 0x19b   : > { %v463_v62 = vsub.f32 %v1258_v55, %v1263_v58  ;;  %761 = vst.msk [vmem:[#allocation2 + $0x10] sm:$0xff] %vm260_vm1, %v1263_v58  ;;  %497 = vperm.xlu1 %1056, %v1263_v58  }
 0x19c   : > { %v461_v0 = vsub.f32 %v1260_v56, %v1266_v60  ;;  %759 = vst.msk [vmem:[#allocation2] sm:$0xff] %vm260_vm1, %v1266_v60  ;;  %v432_v1 = vpop.xlane.xlu1 %431  ;;  %487 = vperm.xlu0 %1055, %v1266_v60  }
 0x19d   : > { %v1283_v2 = vmax.f32 %v1268_v61, %v432_v1  ;;  %v426_v3 = vpop.xlane.xlu0 %425 }
 0x19e   : > { %v1286_v4 = vmax.f32 %v1275_v63, %v426_v3 }
 0x19f   : > { %v464_v5 = vsub.f32 %v1268_v61, %v1283_v2  ;;  %762 = vst.msk [vmem:[#allocation2 + $0x18] sm:$0xff] %vm260_vm1, %v1283_v2  ;;  %502 = vperm.xlu1 %1056, %v1283_v2  }
 0x1a0   : > { %v462_v7 = vsub.f32 %v1275_v63, %v1286_v4  ;;  %760 = vst.msk [vmem:[#allocation2 + $0x8] sm:$0xff] %vm260_vm1, %v1286_v4 }
 0x1a1   : > { %v435_v8 = vpop.xlane.xlu0 %434 }
 0x1a2   : > { %v1308_v10 = vmax.f32 %v1293_v6, %v435_v8 }
 0x1a3   : > { %492 = vperm.xlu1 %1056, %v1286_v4   ;;  %v438_v13 = vpop.xlane.xlu1 %437 }
 0x1a4   : > { %v465_v16 = vsub.f32 %v1293_v6, %v1308_v10  ;;  %763 = vst.msk [vmem:[#allocation2 + $0x20] sm:$0xff] %vm260_vm1, %v1308_v10  ;;  %v1320_v17 = vmax.f32 %v1299_v9, %v438_v13 }
 0x1a5   : > { %v441_v18 = vpop.xlane.xlu0 %440 }
 0x1a6   : > { %v466_v20 = vsub.f32 %v1299_v9, %v1320_v17  ;;  %764 = vst.msk [vmem:[#allocation2 + $0x28] sm:$0xff] %vm260_vm1, %v1320_v17  ;;  %v1329_v21 = vmax.f32 %v1313_v14, %v441_v18  ;;  %v477_v63 = vmul.f32 1.442695, %v465_v16  ;;  %v549_v9 = vld [vmem:[#allocation3] sm:$0xff] }
 0x1a7   : > { %v444_v24 = vpop.xlane.xlu1 %443 }
 0x1a8   : > { %v467_v26 = vsub.f32 %v1313_v14, %v1329_v21  ;;  %765 = vst.msk [vmem:[#allocation2 + $0x30] sm:$0xff] %vm260_vm1, %v1329_v21  ;;  %v1338_v27 = vmax.f32 %v1322_v19, %v444_v24  ;;  %517 = vperm.xlu1 %1056, %v1329_v21   ;;  %v479_v56 = vmul.f32 1.442695, %v466_v20  ;;  %v552_v20 = vld [vmem:[#allocation3 + $0x18] sm:$0xff] }
 0x1aa   : > { %v468_v28 = vsub.f32 %v1322_v19, %v1338_v27  ;;  %766 = vst.msk [vmem:[#allocation2 + $0x38] sm:$0xff] %vm260_vm1, %v1338_v27  ;;  %v481_v55 = vmul.f32 1.442695, %v467_v26 }
 0x1ac   : > { %507 = vperm.xlu1 %1056, %v1308_v10   ;;  %v483_v58 = vmul.f32 1.442695, %v468_v28 }
 0x1b0   : > { %512 = vperm.xlu1 %1056, %v1320_v17  }
 0x1b4   : > { %522 = vperm.xlu1 %1056, %v1338_v27   ;;  %v550_v27 = vld [vmem:[#allocation3 + $0x8] sm:$0xff] }
 0x21a   : > { %v498_v39 = vpop.permute.xlu1 %497 }
 0x21b   : > { %v527_v40 = vsub.f32 %v1210_v30, %v498_v39  ;;  %v488_v41 = vpop.permute.xlu0 %487 }
 0x21c   : > { %v525_v42 = vsub.f32 %v1212_v32, %v488_v41 }
 0x21d   : > { %v537_v44 = vmul.f32 1.442695, %v527_v40 }
 0x21e   : > { %v533_v45 = vmul.f32 1.442695, %v525_v42  ;;  %v503_v48 = vpop.permute.xlu1 %502 }
 0x21f   : > { %1057 = vpow2.f32 %v537_v44  ;;  %v528_v50 = vsub.f32 %v1214_v34, %v503_v48  ;;  %v471_v44 = vmul.f32 1.442695, %v462_v7  ;;  %v473_v48 = vmul.f32 1.442695, %v463_v62  ;;  %v551_v7 = vld [vmem:[#allocation3 + $0x10] sm:$0xff] }
 0x220   : > { %1059 = vpow2.f32 %v533_v45  ;;  %v469_v45 = vmul.f32 1.442695, %v461_v0 }
 0x221   : > { %v539_v51 = vmul.f32 1.442695, %v528_v50  ;;  %v475_v50 = vmul.f32 1.442695, %v464_v5 }
 0x222   : > { %v493_v52 = vpop.permute.xlu1 %492 }
 0x223   : > { %1061 = vpow2.f32 %v539_v51  ;;  %v526_v53 = vsub.f32 %v1218_v37, %v493_v52 }
 0x225   : > { %v535_v54 = vmul.f32 1.442695, %v526_v53 }
 0x227   : > { %1063 = vpow2.f32 %v535_v54  ;;  %v518_v57 = vpop.permute.xlu1 %517 }
 0x228   : > { %v531_v1 = vsub.f32 %v1228_v46, %v518_v57 }
 0x229   : > { %v1058_v59 = vpop.eup %1057 }
 0x22a   : > { %v1060_v30 = vpop.eup %1059  ;;  %v571_v32 = vsel %vm420_vm2, %v1058_v59, 0.0  ;;  %v545_v12 = vmul.f32 1.442695, %v531_v1 }
 0x22b   : > { %572 = vadd.xlane.f32.xlu0 %v571_v32  ;;  %v508_v3 = vpop.permute.xlu1 %507  ;;  %v565_v8 = vsel %vm420_vm2, %v1060_v30, 0.0 }
 0x22c   : > { %v529_v34 = vsub.f32 %v1226_v43, %v508_v3  ;;  %566 = vadd.xlane.f32.xlu1 %v565_v8  ;;  %v555_v8 = vld [vmem:[#allocation3 + $0x30] sm:$0xff] }
 0x22d   : > { %v1062_v11 = vpop.eup %1061 }
 0x22e   : > { %v541_v13 = vmul.f32 1.442695, %v529_v34  ;;  %v574_v37 = vsel %vm420_vm2, %v1062_v11, 0.0  ;;  %v663_v43 = vpack.c.bf16 %v1062_v11, %v1058_v59  ;;  %v554_v34 = vld [vmem:[#allocation3 + $0x28] sm:$0xff] }
 0x22f   : > { %v513_v15 = vpop.permute.xlu1 %512 }
 0x230   : > { %1065 = vpow2.f32 %v541_v13  ;;  %v530_v18 = vsub.f32 %v1230_v47, %v513_v15  ;;  %575 = vadd.xlane.f32.xlu1 %v574_v37 }
 0x231   : > { %v1064_v46 = vpop.eup %1063  ;;  %1067 = vpow2.f32 %v545_v12 }
 0x232   : > { %v543_v22 = vmul.f32 1.442695, %v530_v18  ;;  %v568_v23 = vsel %vm420_vm2, %v1064_v46, 0.0  ;;  %v662_v24 = vpack.c.bf16 %v1064_v46, %v1060_v30  ;;  %v553_v30 = vld [vmem:[#allocation3 + $0x20] sm:$0xff] }
 0x233   : > { %569 = vadd.xlane.f32.xlu0 %v568_v23  ;;  %v523_v25 = vpop.permute.xlu1 %522 }
 0x234   : > { %1069 = vpow2.f32 %v543_v22  ;;  %v532_v29 = vsub.f32 %v1234_v49, %v523_v25  ;;  %1016 = vmatprep.mubr.msk.bf16.mxu1 %vm420_vm2, %v662_v24  ;;  %v556_v22 = vld [vmem:[#allocation3 + $0x38] sm:$0xff] }
 0x235   : > { %1017 = vmatmul.mubr.msk.bf16.vlgmr.msra.gmra.mrb[0].mxu1 %vm420_vm2, %v663_v43 }
 0x236   : > { %v547_v31 = vmul.f32 1.442695, %v532_v29 }
 0x238   : > { %1071 = vpow2.f32 %v547_v31 }
 0x239   : > { %1073 = vpow2.f32 %v471_v44 }
 0x23a   : > { %v1066_v47 = vpop.eup %1065  ;;  %1075 = vpow2.f32 %v469_v45 }
 0x23b   : > { %v577_v33 = vsel %vm420_vm2, %v1066_v47, 0.0  ;;  %v1068_v35 = vpop.eup %1067  ;;  %1077 = vpow2.f32 %v473_v48  ;;  %v608_v48 = vld [vmem:[#allocation4 + $0x10] sm:$0xff] }
 0x23c   : > { %578 = vadd.xlane.f32.xlu0 %v577_v33  ;;  %v583_v38 = vsel %vm420_vm2, %v1068_v35, 0.0  ;;  %1079 = vpow2.f32 %v475_v50 }
 0x23d   : > { %1081 = vpow2.f32 %v477_v63  ;;  %v606_v63 = vld [vmem:[#allocation4] sm:$0xff] }
 0x23e   : > { %v1070_v36 = vpop.eup %1069  ;;  %1083 = vpow2.f32 %v479_v56  ;;  %v609_v56 = vld [vmem:[#allocation4 + $0x18] sm:$0xff] }
 0x23f   : > { %v580_v39 = vsel %vm420_vm2, %v1070_v36, 0.0  ;;  %v664_v40 = vpack.c.bf16 %v1070_v36, %v1066_v47  ;;  %1085 = vpow2.f32 %v481_v55 }
 0x240   : > { %584 = vadd.xlane.f32.xlu0 %v583_v38  ;;  %581 = vadd.xlane.f32.xlu1 %v580_v39  ;;  %1087 = vpow2.f32 %v483_v58  ;;  %v607_v58 = vld [vmem:[#allocation4 + $0x8] sm:$0xff] }
 0x241   : > { %1020 = vmatprep.mubr.msk.bf16.mxu1 %vm420_vm2, %v664_v40 }
 0x242   : > { %v1072_v49 = vpop.eup %1071 }
 0x243   : > { %v586_v41 = vsel %vm420_vm2, %v1072_v49, 0.0  ;;  %v665_v42 = vpack.c.bf16 %v1072_v49, %v1068_v35  ;;  %v1074_v60 = vpop.eup %1073 }
 0x244   : > { %587 = vadd.xlane.f32.xlu1 %v586_v41  ;;  %v1076_v61 = vpop.eup %1075  ;;  %v558_v52 = vmul.f32 %v1074_v60, %v550_v27 }
 0x245   : > { %1021 = vmatmul.mubr.msk.bf16.gmra.mrb[4].mxu1 %vm420_vm2, %v665_v42  ;;  %v1078_v62 = vpop.eup %1077  ;;  %v557_v16 = vmul.f32 %v1076_v61, %v549_v9 }
 0x246   : > { %v1080_v0 = vpop.eup %1079  ;;  %v559_v10 = vmul.f32 %v1078_v62, %v551_v7 }
 0x247   : > { %v1082_v2 = vpop.eup %1081  ;;  %v560_v26 = vmul.f32 %v1080_v0, %v552_v20 }
 0x248   : > { %v1084_v4 = vpop.eup %1083  ;;  %v561_v32 = vmul.f32 %v1082_v2, %v553_v30 }
 0x249   : > { %v1086_v5 = vpop.eup %1085  ;;  %v562_v37 = vmul.f32 %v1084_v4, %v554_v34 }
 0x24a   : > { %v1088_v6 = vpop.eup %1087  ;;  %v563_v13 = vmul.f32 %v1086_v5, %v555_v8 }
 0x24b   : > { %v564_v25 = vmul.f32 %v1088_v6, %v556_v22 }
 0x255   : > { %621 = vperm.xlu1 %1056, %v1074_v60  }
 0x256   : > { %616 = vperm.xlu0 %1055, %v1076_v61  }
 0x259   : > { %626 = vperm.xlu1 %1056, %v1078_v62  }
 0x25a   : > { %631 = vperm.xlu0 %1055, %v1080_v0  }
 0x25d   : > { %636 = vperm.xlu1 %1056, %v1082_v2  }
 0x25e   : > { %641 = vperm.xlu0 %1055, %v1084_v4  }
 0x261   : > { %646 = vperm.xlu1 %1056, %v1086_v5  }
 0x262   : > { %651 = vperm.xlu0 %1055, %v1088_v6  }
 0x2b8   : > { %v573_v14 = vpop.xlane.xlu0 %572 }
 0x2b9   : > { %v591_v17 = vadd.f32 %v573_v14, %v559_v10  ;;  %v567_v19 = vpop.xlane.xlu1 %566 }
 0x2ba   : > { %v589_v21 = vadd.f32 %v567_v19, %v557_v16  ;;  %v612_v19 = vld [vmem:[#allocation4 + $0x30] sm:$0xff] }
 0x2bb   : > { %600 = vst.msk [vmem:[#allocation3 + $0x10] sm:$0xff] %vm260_vm1, %v591_v17 }
 0x2bc   : > { %598 = vst.msk [vmem:[#allocation3] sm:$0xff] %vm260_vm1, %v589_v21  ;;  %v610_v21 = vld [vmem:[#allocation4 + $0x20] sm:$0xff] }
 0x2bd   : > { %v576_v28 = vpop.xlane.xlu1 %575 }
 0x2be   : > { %v592_v51 = vadd.f32 %v576_v28, %v560_v26  ;;  %v613_v26 = vld [vmem:[#allocation4 + $0x38] sm:$0xff]  ;;  %v611_v28 = vld [vmem:[#allocation4 + $0x28] sm:$0xff] }
 0x2c0   : > { %601 = vst.msk [vmem:[#allocation3 + $0x18] sm:$0xff] %vm260_vm1, %v592_v51  ;;  %v570_v53 = vpop.xlane.xlu0 %569 }
 0x2c1   : > { %v590_v54 = vadd.f32 %v570_v53, %v558_v52 }
 0x2c2   : > { %v780_v57 = vld [vmem:[#allocation3 + $0x10] sm:$0xff] }
 0x2c3   : > { %599 = vst.msk [vmem:[#allocation3 + $0x8] sm:$0xff] %vm260_vm1, %v590_v54  ;;  %1089 = vrcp.f32 %v780_v57  ;;  %v778_v59 = vld [vmem:[#allocation3] sm:$0xff] }
 0x2c4   : > { %1091 = vrcp.f32 %v778_v59 }
 0x2c7   : > { %v781_v1 = vld [vmem:[#allocation3 + $0x18] sm:$0xff] }
 0x2c8   : > { %1093 = vrcp.f32 %v781_v1 }
 0x2c9   : > { %v579_v3 = vpop.xlane.xlu0 %578 }
 0x2ca   : > { %v593_v11 = vadd.f32 %v579_v3, %v561_v32  ;;  %v779_v12 = vld [vmem:[#allocation3 + $0x8] sm:$0xff] }
 0x2cb   : > { %1095 = vrcp.f32 %v779_v12 }
 0x2cc   : > { %602 = vst.msk [vmem:[#allocation3 + $0x20] sm:$0xff] %vm260_vm1, %v593_v11 }
 0x2cd   : > { %v1090_v15 = vpop.eup %1089  ;;  %v585_v18 = vpop.xlane.xlu0 %584 }
 0x2ce   : > { %v582_v46 = vpop.xlane.xlu1 %581  ;;  %v595_v23 = vadd.f32 %v585_v18, %v563_v13  ;;  %806 = vperm.xlu1 %1056, %v1090_v15   ;;  %v1092_v43 = vpop.eup %1091 }
 0x2cf   : > { %v594_v24 = vadd.f32 %v582_v46, %v562_v37 }
 0x2d0   : > { %604 = vst.msk [vmem:[#allocation3 + $0x30] sm:$0xff] %vm260_vm1, %v595_v23 }
 0x2d1   : > { %603 = vst.msk [vmem:[#allocation3 + $0x28] sm:$0xff] %vm260_vm1, %v594_v24 }
 0x2d2   : > { %v588_v29 = vpop.xlane.xlu1 %587  ;;  %v1094_v31 = vpop.eup %1093  ;;  %796 = vperm.xlu1 %1056, %v1092_v43  }
 0x2d3   : > { %v596_v47 = vadd.f32 %v588_v29, %v564_v25  ;;  %811 = vperm.xlu0 %1055, %v1094_v31   ;;  %v782_v33 = vld [vmem:[#allocation3 + $0x20] sm:$0xff] }
 0x2d4   : > { %1097 = vrcp.f32 %v782_v33 }
 0x2d5   : > { %605 = vst.msk [vmem:[#allocation3 + $0x38] sm:$0xff] %vm260_vm1, %v596_v47  ;;  %v1096_v35 = vpop.eup %1095  ;;  %v617_v45 = vpop.permute.xlu0 %616 }
 0x2d6   : > { %v622_v44 = vpop.permute.xlu1 %621  ;;  %v654_v61 = vmul.f32 %v617_v45, %v606_v63 }
 0x2d7   : > { %801 = vperm.xlu0 %1055, %v1096_v35   ;;  %v784_v36 = vld [vmem:[#allocation3 + $0x30] sm:$0xff]  ;;  %v655_v5 = vmul.f32 %v622_v44, %v607_v58 }
 0x2d8   : > { %v783_v38 = vld [vmem:[#allocation3 + $0x28] sm:$0xff]  ;;  %1099 = vrcp.f32 %v784_v36 }
 0x2d9   : > { %1101 = vrcp.f32 %v783_v38  ;;  %v632_v55 = vpop.permute.xlu0 %631 }
 0x2da   : > { %v627_v50 = vpop.permute.xlu1 %626  ;;  %v657_v0 = vmul.f32 %v632_v55, %v609_v56 }
 0x2db   : > { %v656_v60 = vmul.f32 %v627_v50, %v608_v48 }
 0x2dc   : > { %v785_v39 = vld [vmem:[#allocation3 + $0x38] sm:$0xff] }
 0x2dd   : > { %1103 = vrcp.f32 %v785_v39  ;;  %v642_v17 = vpop.permute.xlu0 %641 }
 0x2de   : > { %v1098_v40 = vpop.eup %1097  ;;  %v637_v16 = vpop.permute.xlu1 %636  ;;  %v659_v30 = vmul.f32 %v642_v17, %v611_v28 }
 0x2df   : > { %816 = vperm.xlu1 %1056, %v1098_v40   ;;  %v658_v52 = vmul.f32 %v637_v16, %v610_v21 }
 0x2e1   : > { %v652_v27 = vpop.permute.xlu0 %651 }
 0x2e2   : > { %v1100_v49 = vpop.eup %1099  ;;  %v647_v20 = vpop.permute.xlu1 %646  ;;  %v661_v54 = vmul.f32 %v652_v27, %v613_v26 }
 0x2e3   : > { %v1102_v41 = vpop.eup %1101  ;;  %826 = vperm.xlu1 %1056, %v1100_v49   ;;  %v660_v51 = vmul.f32 %v647_v20, %v612_v19 }
 0x2e4   : > { %821 = vperm.xlu0 %1055, %v1102_v41  }
 0x2e7   : > { %v1104_v42 = vpop.eup %1103 }
 0x2e8   : > { %831 = vperm.xlu0 %1055, %v1104_v42  }
 0x308   : > { %v1018_v62 = vpop.f32.mrb[0].mxu1 }
 0x309   : > { %v745_v2 = vadd.f32 %v1018_v62, %v656_v60  ;;  %v712_v4 = vpop.f32.mrb[1].mxu1 }
 0x30a   : > { %v743_v6 = vadd.f32 %v712_v4, %v654_v61  ;;  %v1019_v7 = vpop.f32.mrb[2].mxu1 }
 0x30b   : > { %753 = vst.msk [vmem:[#allocation4 + $0x10] sm:$0xff] %vm277_vm0, %v745_v2  ;;  %v746_v9 = vadd.f32 %v1019_v7, %v657_v0  ;;  %v715_v10 = vpop.f32.mrb[3].mxu1 }
 0x30c   : > { %751 = vst.msk [vmem:[#allocation4] sm:$0xff] %vm277_vm0, %v743_v6  ;;  %v744_v14 = vadd.f32 %v715_v10, %v655_v5 }
 0x30d   : > { %754 = vst.msk [vmem:[#allocation4 + $0x18] sm:$0xff] %vm277_vm0, %v746_v9 }
 0x30e   : > { %752 = vst.msk [vmem:[#allocation4 + $0x8] sm:$0xff] %vm277_vm0, %v744_v14 }
 0x312   : > { %v772_v11 = vld [vmem:[#allocation4 + $0x10] sm:$0xff] }
 0x313   : > { %v770_v37 = vld [vmem:[#allocation4] sm:$0xff] }
 0x314   : > { %v773_v46 = vld [vmem:[#allocation4 + $0x18] sm:$0xff] }
 0x315   : > { %v771_v25 = vld [vmem:[#allocation4 + $0x8] sm:$0xff] }
 0x318   : > { %v1022_v53 = vpop.f32.mrb[4].mxu1 }
 0x319   : > { %v749_v57 = vadd.f32 %v1022_v53, %v660_v51  ;;  %v728_v59 = vpop.f32.mrb[5].mxu1 }
 0x31a   : > { %v747_v1 = vadd.f32 %v728_v59, %v658_v52  ;;  %v1023_v32 = vpop.f32.mrb[6].mxu1 }
 0x31b   : > { %757 = vst.msk [vmem:[#allocation4 + $0x30] sm:$0xff] %vm277_vm0, %v749_v57  ;;  %v750_v3 = vadd.f32 %v1023_v32, %v661_v54  ;;  %v731_v8 = vpop.f32.mrb[7].mxu1 }
 0x31c   : > { %755 = vst.msk [vmem:[#allocation4 + $0x20] sm:$0xff] %vm277_vm0, %v747_v1  ;;  %v748_v34 = vadd.f32 %v731_v8, %v659_v30 }
 0x31d   : > { %758 = vst.msk [vmem:[#allocation4 + $0x38] sm:$0xff] %vm277_vm0, %v750_v3 }
 0x31e   : > { %756 = vst.msk [vmem:[#allocation4 + $0x28] sm:$0xff] %vm277_vm0, %v748_v34 }
 0x322   : > { %v776_v33 = vld [vmem:[#allocation4 + $0x30] sm:$0xff] }
 0x323   : > { %v774_v29 = vld [vmem:[#allocation4 + $0x20] sm:$0xff] }
 0x324   : > { %v777_v49 = vld [vmem:[#allocation4 + $0x38] sm:$0xff] }
 0x325   : > { %v775_v36 = vld [vmem:[#allocation4 + $0x28] sm:$0xff] }
 0x34d   : > { %v807_v12 = vpop.permute.xlu1 %806 }
 0x34e   : > { %v836_v13 = vmul.f32 %v807_v12, %v772_v11 }
 0x350   : > { %844 = vst.msk [vmem:[%s1416_s28 + $0x10] sm:$0xff] %vm277_vm0, %v836_v13 }
 0x351   : > { %v797_v15 = vpop.permute.xlu1 %796 }
 0x352   : > { %v834_v18 = vmul.f32 %v797_v15, %v770_v37  ;;  %v812_v22 = vpop.permute.xlu0 %811 }
 0x353   : > { %v837_v23 = vmul.f32 %v812_v22, %v773_v46 }
 0x354   : > { %842 = vst.msk [vmem:[%s1416_s28] sm:$0xff] %vm277_vm0, %v834_v18 }
 0x355   : > { %845 = vst.msk [vmem:[%s1416_s28 + $0x18] sm:$0xff] %vm277_vm0, %v837_v23 }
 0x356   : > { %v802_v24 = vpop.permute.xlu0 %801 }
 0x357   : > { %v835_v43 = vmul.f32 %v802_v24, %v771_v25 }
 0x359   : > { %843 = vst.msk [vmem:[%s1416_s28 + $0x8] sm:$0xff] %vm277_vm0, %v835_v43 }
 0x35e   : > { %v817_v31 = vpop.permute.xlu1 %816 }
 0x35f   : > { %v838_v47 = vmul.f32 %v817_v31, %v774_v29 }
 0x361   : > { %846 = vst.msk [vmem:[%s1416_s28 + $0x20] sm:$0xff] %vm277_vm0, %v838_v47 }
 0x362   : > { %v827_v35 = vpop.permute.xlu1 %826 }
 0x363   : > { %v822_v38 = vpop.permute.xlu0 %821  ;;  %v840_v39 = vmul.f32 %v827_v35, %v776_v33 }
 0x364   : > { %v839_v40 = vmul.f32 %v822_v38, %v775_v36 }
 0x365   : > { %848 = vst.msk [vmem:[%s1416_s28 + $0x30] sm:$0xff] %vm277_vm0, %v840_v39 }
 0x366   : > { %847 = vst.msk [vmem:[%s1416_s28 + $0x28] sm:$0xff] %vm277_vm0, %v839_v40 }
 0x367   : > { %v832_v41 = vpop.permute.xlu0 %831 }
 0x368   : > { %v841_v42 = vmul.f32 %v832_v41, %v777_v49 }
 0x36a   : > { %849 = vst.msk [vmem:[%s1416_s28 + $0x38] sm:$0xff] %vm277_vm0, %v841_v42 }
 0x36b PF: > { %s13_s14 = sadd.s32 1, %s1127_s14   ;;  %s1447_s12 = smov %s1123_s13 }
 0x36c   : > { %p10_p5 = scmp.ge.s32.totalorder %s13_s14, 4   ;;  %s1448_s13 = smov %s1450_s15 }
 0x36e   :  { %12 = sbr.rel (!%p10_p5) target bundleno = 2 (0x2), region = 76 }

// kernel: encoder_forward.49
= control target key start
LH: loop header
LB: loop body
LE: loop exit
PB: predicated region body
PF: predicated region fallthrough
CT: control target
= control target key end

     0   :  { %v215_v3 = vmov 0   ;;  %s331_s1 = inlined_call_operand.vmem [shape: f32[128,128], index: 1, kind: input, shape index: {}]   ;;  %s332_s0 = inlined_call_operand.vmem [shape: bf16[32,128], index: 0, kind: input, shape index: {}]   ;;  %s333_s2 = inlined_call_operand.vmem [shape: f32[32,1], index: 2, kind: input, shape index: {}]   ;;  %s334_s3 = inlined_call_operand.vmem [shape: f32[32,128], index: 3, kind: input, shape index: {}]   ;;  %s335_s4 = inlined_call_operand.vmem [shape: f32[32,128], index: 4, kind: output, shape index: {}]  }
   0x1   :  { %v34_v0 = vld [vmem:[%s331_s1] sm:$0xff]  ;;  %v35_v1 = vld [vmem:[%s331_s1 + $0x8] sm:$0xff]  ;;  %v36_v2 = vld [vmem:[%s331_s1 + $0x10] sm:$0xff]  ;;  %212 = vset.pattern.permute.xlu1 %v215_v3  ;;  %211 = vset.pattern.permute.xlu0 %v215_v3 }
   0x2   :  { %v50_v4 = vpack.c.bf16 %v35_v1, %v34_v0  ;;  %v37_v5 = vld [vmem:[%s331_s1 + $0x18] sm:$0xff]  ;;  %v38_v7 = vld [vmem:[%s331_s1 + $0x20] sm:$0xff]  ;;  %v39_v8 = vld [vmem:[%s331_s1 + $0x28] sm:$0xff] }
   0x3   :  { %v51_v6 = vpack.c.bf16 %v37_v5, %v36_v2  ;;  %v40_v9 = vld [vmem:[%s331_s1 + $0x30] sm:$0xff]  ;;  %v52_v10 = vpack.c.bf16 %v39_v8, %v38_v7  ;;  %v41_v11 = vld [vmem:[%s331_s1 + $0x38] sm:$0xff]  ;;  %v213_v12 = vld [vmem:[%s332_s0] sm:$0xff]  }
   0x4   :  { %190 = vmatprep.subr.bf16.mxu0 %v50_v4  ;;  %v136_v13 = vld [vmem:[%s333_s2 + $0x10] sm:$0xff]  ;;  %v134_v14 = vld [vmem:[%s333_s2] sm:$0xff]  ;;  %206 = vmatprep.mubr.bf16.mxu0 %v213_v12  ;;  %v53_v15 = vpack.c.bf16 %v41_v11, %v40_v9  ;;  %v43_v17 = vld [vmem:[%s331_s1 + $0x48] sm:$0xff] }
   0x5   :  { %191 = vmatpush3.bf16.msra.mxu0 %v50_v4  ;;  %150 = vperm.xlu1 %212, %v136_v13   ;;  %v42_v16 = vld [vmem:[%s331_s1 + $0x40] sm:$0xff]  ;;  %v137_v18 = vld [vmem:[%s333_s2 + $0x18] sm:$0xff]  ;;  %v135_v19 = vld [vmem:[%s333_s2 + $0x8] sm:$0xff] }
   0x6   :  { %192 = vmatprep.subr.bf16.mxu0 %v51_v6  ;;  %140 = vperm.xlu0 %211, %v134_v14   ;;  %v54_v20 = vpack.c.bf16 %v43_v17, %v42_v16  ;;  %v44_v21 = vld [vmem:[%s331_s1 + $0x50] sm:$0xff]  ;;  %v45_v22 = vld [vmem:[%s331_s1 + $0x58] sm:$0xff]  ;;  %v46_v24 = vld [vmem:[%s331_s1 + $0x60] sm:$0xff] }
   0x7   :  { %v55_v23 = vpack.c.bf16 %v45_v22, %v44_v21  ;;  %v47_v25 = vld [vmem:[%s331_s1 + $0x68] sm:$0xff]  ;;  %v48_v27 = vld [vmem:[%s331_s1 + $0x70] sm:$0xff]  ;;  %v49_v28 = vld [vmem:[%s331_s1 + $0x78] sm:$0xff] }
   0x8   :  { %v56_v26 = vpack.c.bf16 %v47_v25, %v46_v24  ;;  %v57_v29 = vpack.c.bf16 %v49_v28, %v48_v27  ;;  %v214_v30 = vld [vmem:[%s332_s0 + $0x8] sm:$0xff]   ;;  %v164_v34 = vld [vmem:[%s334_s3 + $0x10] sm:$0xff]  ;;  %v162_v37 = vld [vmem:[%s334_s3] sm:$0xff] }
   0x9   :  { %193 = vmatpush3.bf16.msra.mxu0 %v51_v6  ;;  %155 = vperm.xlu1 %212, %v137_v18   ;;  %v165_v41 = vld [vmem:[%s334_s3 + $0x18] sm:$0xff]  ;;  %v163_v46 = vld [vmem:[%s334_s3 + $0x8] sm:$0xff] }
   0xa   :  { %194 = vmatprep.subr.bf16.mxu0 %v52_v10  ;;  %145 = vperm.xlu0 %211, %v135_v19  }
   0xd   :  { %195 = vmatpush3.bf16.msra.mxu0 %v52_v10 }
   0xe   :  { %196 = vmatprep.subr.bf16.mxu0 %v53_v15 }
  0x11   :  { %197 = vmatpush3.bf16.msra.mxu0 %v53_v15 }
  0x12   :  { %198 = vmatprep.subr.bf16.mxu0 %v54_v20 }
  0x15   :  { %199 = vmatpush3.bf16.msra.mxu0 %v54_v20 }
  0x16   :  { %200 = vmatprep.subr.bf16.mxu0 %v55_v23 }
  0x19   :  { %201 = vmatpush3.bf16.msra.mxu0 %v55_v23 }
  0x1a   :  { %202 = vmatprep.subr.bf16.mxu0 %v56_v26 }
  0x1d   :  { %203 = vmatpush3.bf16.msra.mxu0 %v56_v26 }
  0x1e   :  { %204 = vmatprep.subr.bf16.mxu0 %v57_v29 }
  0x21   :  { %205 = vmatpush3.bf16.msra.mxu0 %v57_v29 }
  0x24   :  { %207 = vmatmul.mubr.bf16.vlgmr.msra.gmra.mrb[0].mxu0 %v214_v30 }
  0x84   :  { %v151_v31 = vpop.permute.xlu1 %150 }
  0x85   :  { %v141_v32 = vpop.permute.xlu0 %140 }
  0x88   :  { %v156_v38 = vpop.permute.xlu1 %155 }
  0x89   :  { %v146_v42 = vpop.permute.xlu0 %145 }
  0xf7   :  { %v208_v33 = vpop.f32.mrb[0].mxu0 }
  0xf8   :  { %v160_v35 = vadd.f32 %v208_v33, %v151_v31  ;;  %v104_v36 = vpop.f32.mrb[1].mxu0 }
  0xf9   :  { %v158_v39 = vadd.f32 %v141_v32, %v104_v36  ;;  %v209_v40 = vpop.f32.mrb[2].mxu0 }
  0xfa   :  { %v168_v43 = vadd.f32 %v164_v34, %v160_v35  ;;  %v161_v44 = vadd.f32 %v209_v40, %v156_v38  ;;  %v107_v45 = vpop.f32.mrb[3].mxu0 }
  0xfb   :  { %v166_v47 = vadd.f32 %v162_v37, %v158_v39  ;;  %v159_v48 = vadd.f32 %v146_v42, %v107_v45 }
  0xfc   :  { %172 = vst [vmem:[%s335_s4 + $0x10] sm:$0xff] %v168_v43  ;;  %v169_v49 = vadd.f32 %v165_v41, %v161_v44 }
  0xfd   :  { %170 = vst [vmem:[%s335_s4] sm:$0xff] %v166_v47  ;;  %v167_v50 = vadd.f32 %v163_v46, %v159_v48 }
  0xfe   :  { %173 = vst [vmem:[%s335_s4 + $0x18] sm:$0xff] %v169_v49 }
  0xff   :  { %171 = vst [vmem:[%s335_s4 + $0x8] sm:$0xff] %v167_v50 }

// kernel: encoder_forward.51
= control target key start
LH: loop header
LB: loop body
LE: loop exit
PB: predicated region body
PF: predicated region fallthrough
CT: control target
= control target key end

     0   :  { %v363_v3 = vmov 0   ;;  %s570_s1 = inlined_call_operand.vmem [shape: f32[384,128], index: 1, kind: input, shape index: {}]   ;;  %s571_s0 = inlined_call_operand.vmem [shape: bf16[32,384], index: 0, kind: input, shape index: {}]   ;;  %s572_s2 = inlined_call_operand.vmem [shape: f32[32,1], index: 2, kind: input, shape index: {}]   ;;  %s573_s3 = inlined_call_operand.vmem [shape: f32[32,128], index: 3, kind: output, shape index: {}]  }
   0x1   :  { %v51_v0 = vld [vmem:[%s570_s1 + $0x80] sm:$0xff]  ;;  %v52_v1 = vld [vmem:[%s570_s1 + $0x88] sm:$0xff]  ;;  %353 = vset.pattern.permute.xlu0 %v363_v3  ;;  %354 = vset.pattern.permute.xlu1 %v363_v3  ;;  %v53_v10 = vld [vmem:[%s570_s1 + $0x90] sm:$0xff] }
   0x2   :  { %v35_v2 = vld [vmem:[%s570_s1] sm:$0xff]  ;;  %v91_v4 = vpack.c.bf16 %v52_v1, %v51_v0  ;;  %v36_v5 = vld [vmem:[%s570_s1 + $0x8] sm:$0xff]  ;;  %v54_v11 = vld [vmem:[%s570_s1 + $0x98] sm:$0xff] }
   0x3   :  { %v67_v6 = vld [vmem:[%s570_s1 + $0x100] sm:$0xff]  ;;  %v68_v7 = vld [vmem:[%s570_s1 + $0x108] sm:$0xff]  ;;  %v83_v8 = vpack.c.bf16 %v36_v5, %v35_v2  ;;  %v37_v12 = vld [vmem:[%s570_s1 + $0x10] sm:$0xff]  ;;  %v92_v13 = vpack.c.bf16 %v54_v11, %v53_v10 }
   0x4   :  { %v99_v9 = vpack.c.bf16 %v68_v7, %v67_v6  ;;  %294 = vmatprep.subr.bf16.mxu0 %v91_v4  ;;  %v38_v14 = vld [vmem:[%s570_s1 + $0x18] sm:$0xff]  ;;  %v69_v15 = vld [vmem:[%s570_s1 + $0x110] sm:$0xff]  ;;  %v55_v19 = vld [vmem:[%s570_s1 + $0xa0] sm:$0xff] }
   0x5   :  { %v70_v16 = vld [vmem:[%s570_s1 + $0x118] sm:$0xff]  ;;  %295 = vmatpush3.bf16.msra.mxu0 %v83_v8  ;;  %v84_v17 = vpack.c.bf16 %v38_v14, %v37_v12  ;;  %v56_v20 = vld [vmem:[%s570_s1 + $0xa8] sm:$0xff]  ;;  %v39_v21 = vld [vmem:[%s570_s1 + $0x20] sm:$0xff] }
   0x6   :  { %332 = vmatprep.subr.bf16.mxu1 %v99_v9  ;;  %v100_v18 = vpack.c.bf16 %v70_v16, %v69_v15  ;;  %296 = vmatprep.subr.bf16.mxu0 %v92_v13  ;;  %v93_v22 = vpack.c.bf16 %v56_v20, %v55_v19  ;;  %v40_v23 = vld [vmem:[%s570_s1 + $0x28] sm:$0xff]  ;;  %v71_v24 = vld [vmem:[%s570_s1 + $0x120] sm:$0xff]  ;;  %v57_v27 = vld [vmem:[%s570_s1 + $0xb0] sm:$0xff] }
   0x7   :  { %333 = vmatpush3.bf16.msra.mxu1 %v99_v9  ;;  %v72_v25 = vld [vmem:[%s570_s1 + $0x128] sm:$0xff]  ;;  %v58_v28 = vld [vmem:[%s570_s1 + $0xb8] sm:$0xff]  ;;  %v73_v29 = vld [vmem:[%s570_s1 + $0x130] sm:$0xff]  ;;  %v85_v31 = vpack.c.bf16 %v40_v23, %v39_v21 }
   0x8   :  { %334 = vmatprep.subr.bf16.mxu1 %v100_v18  ;;  %v101_v26 = vpack.c.bf16 %v72_v25, %v71_v24  ;;  %v74_v30 = vld [vmem:[%s570_s1 + $0x138] sm:$0xff]  ;;  %v94_v32 = vpack.c.bf16 %v58_v28, %v57_v27  ;;  %v41_v33 = vld [vmem:[%s570_s1 + $0x30] sm:$0xff]  ;;  %v59_v36 = vld [vmem:[%s570_s1 + $0xc0] sm:$0xff] }
   0x9   :  { %297 = vmatpush3.bf16.msra.mxu0 %v84_v17  ;;  %v42_v34 = vld [vmem:[%s570_s1 + $0x38] sm:$0xff]  ;;  %v102_v35 = vpack.c.bf16 %v74_v30, %v73_v29  ;;  %v60_v37 = vld [vmem:[%s570_s1 + $0xc8] sm:$0xff]  ;;  %v75_v38 = vld [vmem:[%s570_s1 + $0x140] sm:$0xff] }
   0xa   :  { %298 = vmatprep.subr.bf16.mxu0 %v93_v22  ;;  %v76_v39 = vld [vmem:[%s570_s1 + $0x148] sm:$0xff]  ;;  %v86_v40 = vpack.c.bf16 %v42_v34, %v41_v33  ;;  %v95_v41 = vpack.c.bf16 %v60_v37, %v59_v36  ;;  %v43_v42 = vld [vmem:[%s570_s1 + $0x40] sm:$0xff]  ;;  %v61_v45 = vld [vmem:[%s570_s1 + $0xd0] sm:$0xff] }
   0xb   :  { %335 = vmatpush3.bf16.msra.mxu1 %v100_v18  ;;  %v44_v43 = vld [vmem:[%s570_s1 + $0x48] sm:$0xff]  ;;  %v103_v44 = vpack.c.bf16 %v76_v39, %v75_v38  ;;  %v62_v46 = vld [vmem:[%s570_s1 + $0xd8] sm:$0xff]  ;;  %v45_v47 = vld [vmem:[%s570_s1 + $0x50] sm:$0xff] }
   0xc   :  { %336 = vmatprep.subr.bf16.mxu1 %v101_v26  ;;  %v46_v48 = vld [vmem:[%s570_s1 + $0x58] sm:$0xff]  ;;  %v77_v49 = vld [vmem:[%s570_s1 + $0x150] sm:$0xff]  ;;  %v87_v51 = vpack.c.bf16 %v44_v43, %v43_v42  ;;  %v63_v52 = vld [vmem:[%s570_s1 + $0xe0] sm:$0xff]  ;;  %v96_v54 = vpack.c.bf16 %v62_v46, %v61_v45 }
   0xd   :  { %299 = vmatpush3.bf16.msra.mxu0 %v85_v31  ;;  %v78_v50 = vld [vmem:[%s570_s1 + $0x158] sm:$0xff]  ;;  %v64_v53 = vld [vmem:[%s570_s1 + $0xe8] sm:$0xff]  ;;  %v79_v55 = vld [vmem:[%s570_s1 + $0x160] sm:$0xff]  ;;  %v88_v60 = vpack.c.bf16 %v46_v48, %v45_v47 }
   0xe   :  { %300 = vmatprep.subr.bf16.mxu0 %v94_v32  ;;  %v357_v56 = vld [vmem:[%s571_s0 + $0x4] ss:$12 sps:$4 sm:$0xff]   ;;  %v104_v57 = vpack.c.bf16 %v78_v50, %v77_v49  ;;  %v358_v58 = vld [vmem:[%s571_s0 + $0x8] ss:$12 sps:$4 sm:$0xff]   ;;  %v97_v62 = vpack.c.bf16 %v64_v53, %v63_v52  ;;  %v66_v4 = vld [vmem:[%s570_s1 + $0xf8] sm:$0xff] }
   0xf   :  { %337 = vmatpush3.bf16.msra.mxu1 %v101_v26  ;;  %v80_v59 = vld [vmem:[%s570_s1 + $0x168] sm:$0xff]  ;;  %171 = vmatprep.mubr.bf16.mxu0 %v357_v56  ;;  %v252_v61 = vld [vmem:[%s572_s2] sm:$0xff]  ;;  %v254_v1 = vld [vmem:[%s572_s2 + $0x10] sm:$0xff] }
  0x10   :  { %338 = vmatprep.subr.bf16.mxu1 %v102_v35  ;;  %348 = vmatprep.mubr.bf16.mxu1 %v358_v58  ;;  %v47_v63 = vld [vmem:[%s570_s1 + $0x60] sm:$0xff]  ;;  %v48_v0 = vld [vmem:[%s570_s1 + $0x68] sm:$0xff]  ;;  %v105_v2 = vpack.c.bf16 %v80_v59, %v79_v55  ;;  %v65_v3 = vld [vmem:[%s570_s1 + $0xf0] sm:$0xff] }
  0x11   :  { %301 = vmatpush3.bf16.msra.mxu0 %v86_v40  ;;  %258 = vperm.xlu0 %353, %v252_v61   ;;  %v81_v5 = vld [vmem:[%s570_s1 + $0x170] sm:$0xff]  ;;  %v82_v6 = vld [vmem:[%s570_s1 + $0x178] sm:$0xff]  ;;  %v253_v7 = vld [vmem:[%s572_s2 + $0x8] sm:$0xff]  ;;  %v89_v8 = vpack.c.bf16 %v48_v0, %v47_v63  ;;  %v98_v10 = vpack.c.bf16 %v66_v4, %v65_v3 }
  0x12   :  { %302 = vmatprep.subr.bf16.mxu0 %v95_v41  ;;  %268 = vperm.xlu1 %354, %v254_v1   ;;  %v255_v9 = vld [vmem:[%s572_s2 + $0x18] sm:$0xff]  ;;  %v49_v11 = vld [vmem:[%s570_s1 + $0x70] sm:$0xff]  ;;  %v106_v13 = vpack.c.bf16 %v82_v6, %v81_v5  ;;  %v355_v15 = vld [vmem:[%s571_s0] ss:$12 sps:$4 sm:$0xff]  }
  0x13   :  { %339 = vmatpush3.bf16.msra.mxu1 %v102_v35  ;;  %v50_v12 = vld [vmem:[%s570_s1 + $0x78] sm:$0xff]  ;;  %v359_v16 = vld [vmem:[%s571_s0 + $0x20] ss:$12 sps:$4 sm:$0xff]  }
  0x14   :  { %340 = vmatprep.subr.bf16.mxu1 %v103_v44  ;;  %v90_v14 = vpack.c.bf16 %v50_v12, %v49_v11  ;;  %v360_v17 = vld [vmem:[%s571_s0 + $0x1c] ss:$12 sps:$4 sm:$0xff]   ;;  %v362_v18 = vld [vmem:[%s571_s0 + $0x18] ss:$12 sps:$4 sm:$0xff]  }
  0x15   :  { %303 = vmatpush3.bf16.msra.mxu0 %v87_v51  ;;  %263 = vperm.xlu0 %353, %v253_v7  }
  0x16   :  { %304 = vmatprep.subr.bf16.mxu0 %v96_v54  ;;  %273 = vperm.xlu1 %354, %v255_v9  }
  0x17   :  { %341 = vmatpush3.bf16.msra.mxu1 %v103_v44 }
  0x18   :  { %342 = vmatprep.subr.bf16.mxu1 %v104_v57 }
  0x19   :  { %305 = vmatpush3.bf16.msra.mxu0 %v88_v60 }
  0x1a   :  { %306 = vmatprep.subr.bf16.mxu0 %v97_v62 }
  0x1b   :  { %343 = vmatpush3.bf16.msra.mxu1 %v104_v57 }
  0x1c   :  { %344 = vmatprep.subr.bf16.mxu1 %v105_v2 }
  0x1d   :  { %307 = vmatpush3.bf16.msra.mxu0 %v89_v8 }
  0x1e   :  { %308 = vmatprep.subr.bf16.mxu0 %v98_v10 }
  0x1f   :  { %345 = vmatpush3.bf16.msra.mxu1 %v105_v2 }
  0x20   :  { %346 = vmatprep.subr.bf16.mxu1 %v106_v13 }
  0x21   :  { %309 = vmatpush3.bf16.msra.mxu0 %v90_v14 }
  0x23   :  { %347 = vmatpush3.bf16.msra.mxu1 %v106_v13 }
  0x24   :  { %172 = vmatmul.mubr.bf16.vlgmr.msra.gmra.mrb[0].mxu0 %v355_v15 }
  0x25   :  { %179 = vmatprep.mubr.bf16.mxu0 %v360_v17 }
  0x26   :  { %349 = vmatmul.mubr.bf16.vlgmr.msra.gmra.mrb[0].mxu1 %v359_v16 }
  0x2c   :  { %180 = vmatmul.mubr.bf16.gmra.mrb[4].mxu0 %v362_v18 }
  0x90   :  { %v259_v19 = vpop.permute.xlu0 %258 }
  0x91   :  { %v269_v36 = vpop.permute.xlu1 %268 }
  0x94   :  { %v264_v31 = vpop.permute.xlu0 %263 }
  0x95   :  { %v274_v45 = vpop.permute.xlu1 %273 }
  0xf7   :  { %v310_v20 = vpop.f32.mrb[0].mxu0 }
  0xf8   :  { %v311_v21 = vpop.f32.mrb[1].mxu0 }
  0xf9   :  { %v350_v22 = vpop.f32.mrb[0].mxu1  ;;  %v312_v23 = vadd.f32 %v311_v21, %v310_v20  ;;  %v313_v24 = vpop.f32.mrb[2].mxu0 }
  0xfa   :  { %v222_v25 = vpop.f32.mrb[1].mxu1  ;;  %v314_v26 = vpop.f32.mrb[3].mxu0 }
  0xfb   :  { %v351_v27 = vpop.f32.mrb[2].mxu1  ;;  %v315_v28 = vadd.f32 %v314_v26, %v313_v24  ;;  %v223_v29 = vadd.f32 %v312_v23, %v222_v25 }
  0xfc   :  { %v225_v30 = vpop.f32.mrb[3].mxu1 }
  0xfd   :  { %v276_v32 = vadd.f32 %v259_v19, %v223_v29  ;;  %v226_v33 = vadd.f32 %v315_v28, %v225_v30 }
  0xff   :  { %280 = vst [vmem:[%s573_s3] sm:$0xff] %v276_v32  ;;  %v277_v34 = vadd.f32 %v264_v31, %v226_v33  ;;  %v316_v35 = vpop.f32.mrb[4].mxu0 }
 0x100   :  { %v317_v37 = vpop.f32.mrb[5].mxu0 }
 0x101   :  { %281 = vst [vmem:[%s573_s3 + $0x8] sm:$0xff] %v277_v34  ;;  %v318_v38 = vadd.f32 %v317_v37, %v316_v35  ;;  %v319_v39 = vpop.f32.mrb[6].mxu0 }
 0x102   :  { %v320_v40 = vpop.f32.mrb[7].mxu0 }
 0x103   :  { %v231_v41 = vadd.f32 %v350_v22, %v318_v38  ;;  %v321_v42 = vadd.f32 %v320_v40, %v319_v39 }
 0x105   :  { %v278_v43 = vadd.f32 %v269_v36, %v231_v41  ;;  %v234_v44 = vadd.f32 %v351_v27, %v321_v42 }
 0x107   :  { %282 = vst [vmem:[%s573_s3 + $0x10] sm:$0xff] %v278_v43  ;;  %v279_v46 = vadd.f32 %v274_v45, %v234_v44 }
 0x109   :  { %283 = vst [vmem:[%s573_s3 + $0x18] sm:$0xff] %v279_v46 }

// kernel: encoder_forward.65
= control target key start
LH: loop header
LB: loop body
LE: loop exit
PB: predicated region body
PF: predicated region fallthrough
CT: control target
= control target key end

     0   :  { %v265_v2 = vmov 0.0   ;;  %vm266_vm0 = vmmov 0   ;;  %v267_v8 = vmov 0   ;;  %s453_s1 = inlined_call_operand.vmem [shape: f32[384,128], index: 1, kind: input, shape index: {}]   ;;  %s454_s0 = inlined_call_operand.vmem [shape: bf16[8,384], index: 0, kind: input, shape index: {}]   ;;  %s455_s2 = inlined_call_operand.vmem [shape: f32[8,1], index: 2, kind: input, shape index: {}]   ;;  %s456_s3 = inlined_call_operand.vmem [shape: f32[8,128], index: 3, kind: output, shape index: {}]  }
   0x1   :  { %v39_v0 = vld [vmem:[%s453_s1 + $0x80] sm:$0xff]  ;;  %v40_v1 = vld [vmem:[%s453_s1 + $0x88] sm:$0xff]  ;;  %238 = vmatprep.subr.bf16.mxu1 %v265_v2  ;;  %254 = vmatprep.mubr.msk.bf16.mxu1 %vm266_vm0, %v265_v2  ;;  %v41_v11 = vld [vmem:[%s453_s1 + $0x90] sm:$0xff] }
   0x2   :  { %v23_v3 = vld [vmem:[%s453_s1] sm:$0xff]  ;;  %v79_v4 = vpack.c.bf16 %v40_v1, %v39_v0  ;;  %v24_v5 = vld [vmem:[%s453_s1 + $0x8] sm:$0xff]  ;;  %261 = vset.pattern.permute.xlu0 %v267_v8  ;;  %v42_v12 = vld [vmem:[%s453_s1 + $0x98] sm:$0xff] }
   0x3   :  { %v55_v6 = vld [vmem:[%s453_s1 + $0x100] sm:$0xff]  ;;  %v56_v7 = vld [vmem:[%s453_s1 + $0x108] sm:$0xff]  ;;  %v71_v9 = vpack.c.bf16 %v24_v5, %v23_v3  ;;  %v25_v13 = vld [vmem:[%s453_s1 + $0x10] sm:$0xff]  ;;  %v80_v14 = vpack.c.bf16 %v42_v12, %v41_v11 }
   0x4   :  { %v87_v10 = vpack.c.bf16 %v56_v7, %v55_v6  ;;  %207 = vmatprep.subr.bf16.mxu0 %v79_v4  ;;  %v26_v15 = vld [vmem:[%s453_s1 + $0x18] sm:$0xff]  ;;  %v57_v16 = vld [vmem:[%s453_s1 + $0x110] sm:$0xff]  ;;  %v43_v20 = vld [vmem:[%s453_s1 + $0xa0] sm:$0xff] }
   0x5   :  { %v58_v17 = vld [vmem:[%s453_s1 + $0x118] sm:$0xff]  ;;  %208 = vmatpush3.bf16.msra.mxu0 %v71_v9  ;;  %v72_v18 = vpack.c.bf16 %v26_v15, %v25_v13  ;;  %v44_v21 = vld [vmem:[%s453_s1 + $0xa8] sm:$0xff]  ;;  %v27_v22 = vld [vmem:[%s453_s1 + $0x20] sm:$0xff] }
   0x6   :  { %239 = vmatpush3.bf16.msra.mxu1 %v87_v10  ;;  %v88_v19 = vpack.c.bf16 %v58_v17, %v57_v16  ;;  %209 = vmatprep.subr.bf16.mxu0 %v80_v14  ;;  %v81_v23 = vpack.c.bf16 %v44_v21, %v43_v20  ;;  %v28_v24 = vld [vmem:[%s453_s1 + $0x28] sm:$0xff]  ;;  %v59_v25 = vld [vmem:[%s453_s1 + $0x120] sm:$0xff]  ;;  %v45_v27 = vld [vmem:[%s453_s1 + $0xb0] sm:$0xff] }
   0x7   :  { %240 = vmatprep.subr.bf16.mxu1 %v265_v2  ;;  %v60_v26 = vld [vmem:[%s453_s1 + $0x128] sm:$0xff]  ;;  %v46_v28 = vld [vmem:[%s453_s1 + $0xb8] sm:$0xff]  ;;  %v73_v29 = vpack.c.bf16 %v28_v24, %v27_v22  ;;  %v29_v31 = vld [vmem:[%s453_s1 + $0x30] sm:$0xff] }
   0x8   :  { %v89_v30 = vpack.c.bf16 %v60_v26, %v59_v25  ;;  %v82_v32 = vpack.c.bf16 %v46_v28, %v45_v27  ;;  %v30_v33 = vld [vmem:[%s453_s1 + $0x38] sm:$0xff]  ;;  %v61_v34 = vld [vmem:[%s453_s1 + $0x130] sm:$0xff]  ;;  %v47_v36 = vld [vmem:[%s453_s1 + $0xc0] sm:$0xff] }
   0x9   :  { %210 = vmatpush3.bf16.msra.mxu0 %v72_v18  ;;  %v62_v35 = vld [vmem:[%s453_s1 + $0x138] sm:$0xff]  ;;  %v48_v37 = vld [vmem:[%s453_s1 + $0xc8] sm:$0xff]  ;;  %v74_v38 = vpack.c.bf16 %v30_v33, %v29_v31  ;;  %v31_v40 = vld [vmem:[%s453_s1 + $0x40] sm:$0xff] }
   0xa   :  { %241 = vmatpush3.bf16.msra.mxu1 %v88_v19  ;;  %211 = vmatprep.subr.bf16.mxu0 %v81_v23  ;;  %v90_v39 = vpack.c.bf16 %v62_v35, %v61_v34  ;;  %v83_v41 = vpack.c.bf16 %v48_v37, %v47_v36  ;;  %v32_v42 = vld [vmem:[%s453_s1 + $0x48] sm:$0xff]  ;;  %v63_v43 = vld [vmem:[%s453_s1 + $0x140] sm:$0xff]  ;;  %v49_v45 = vld [vmem:[%s453_s1 + $0xd0] sm:$0xff] }
   0xb   :  { %242 = vmatprep.subr.bf16.mxu1 %v265_v2  ;;  %v64_v44 = vld [vmem:[%s453_s1 + $0x148] sm:$0xff]  ;;  %v50_v46 = vld [vmem:[%s453_s1 + $0xd8] sm:$0xff]  ;;  %v33_v47 = vld [vmem:[%s453_s1 + $0x50] sm:$0xff]  ;;  %v75_v48 = vpack.c.bf16 %v32_v42, %v31_v40 }
   0xc   :  { %v91_v49 = vpack.c.bf16 %v64_v44, %v63_v43  ;;  %v34_v50 = vld [vmem:[%s453_s1 + $0x58] sm:$0xff]  ;;  %v21_v51 = vld [vmem:[%s454_s0] sm:$0xff]  ;;  %v84_v52 = vpack.c.bf16 %v50_v46, %v49_v45  ;;  %v65_v53 = vld [vmem:[%s453_s1 + $0x150] sm:$0xff] }
   0xd   :  { %212 = vmatpush3.bf16.msra.mxu0 %v73_v29  ;;  %v66_v54 = vld [vmem:[%s453_s1 + $0x158] sm:$0xff]  ;;  %v205_v55 = vcombine.high %v21_v51, %v21_v51  ;;  %v192_v56 = vld [vmem:[%s455_s2] sm:$0xff]  ;;  %v52_v58 = vld [vmem:[%s453_s1 + $0xe8] sm:$0xff]  ;;  %v76_v59 = vpack.c.bf16 %v34_v50, %v33_v47  ;;  %v204_v14 = vcombine.low %v21_v51, %v21_v51 }
   0xe   :  { %243 = vmatpush3.bf16.msra.mxu1 %v89_v30  ;;  %213 = vmatprep.subr.bf16.mxu0 %v82_v32  ;;  %v51_v57 = vld [vmem:[%s453_s1 + $0xe0] sm:$0xff]  ;;  %v92_v60 = vpack.c.bf16 %v66_v54, %v65_v53  ;;  %v36_v63 = vld [vmem:[%s453_s1 + $0x68] sm:$0xff]  ;;  %v53_v3 = vld [vmem:[%s453_s1 + $0xf0] sm:$0xff] }
   0xf   :  { %244 = vmatprep.subr.bf16.mxu1 %v265_v2  ;;  %195 = vperm.xlu0 %261, %v192_v56   ;;  %v35_v61 = vld [vmem:[%s453_s1 + $0x60] sm:$0xff]  ;;  %v85_v62 = vpack.c.bf16 %v52_v58, %v51_v57  ;;  %v68_v1 = vld [vmem:[%s453_s1 + $0x168] sm:$0xff]  ;;  %v54_v4 = vld [vmem:[%s453_s1 + $0xf8] sm:$0xff] }
  0x10   :  { %138 = vmatprep.mubr.bf16.mxu0 %v205_v55  ;;  %v67_v0 = vld [vmem:[%s453_s1 + $0x160] sm:$0xff]  ;;  %v77_v5 = vpack.c.bf16 %v36_v63, %v35_v61  ;;  %v37_v7 = vld [vmem:[%s453_s1 + $0x70] sm:$0xff]  ;;  %v86_v8 = vpack.c.bf16 %v54_v4, %v53_v3  ;;  %v38_v9 = vld [vmem:[%s453_s1 + $0x78] sm:$0xff] }
  0x11   :  { %214 = vmatpush3.bf16.msra.mxu0 %v74_v38  ;;  %v93_v6 = vpack.c.bf16 %v68_v1, %v67_v0  ;;  %v69_v10 = vld [vmem:[%s453_s1 + $0x170] sm:$0xff]  ;;  %v70_v11 = vld [vmem:[%s453_s1 + $0x178] sm:$0xff]  ;;  %v78_v12 = vpack.c.bf16 %v38_v9, %v37_v7  ;;  %v264_v15 = vld [vmem:[%s454_s0 + $0x8] ss:$0 sps:$4 sm:$0xff]  }
  0x12   :  { %245 = vmatpush3.bf16.msra.mxu1 %v90_v39  ;;  %215 = vmatprep.subr.bf16.mxu0 %v83_v41  ;;  %v94_v13 = vpack.c.bf16 %v70_v11, %v69_v10 }
  0x13   :  { %246 = vmatprep.subr.bf16.mxu1 %v265_v2 }
  0x15   :  { %216 = vmatpush3.bf16.msra.mxu0 %v75_v48 }
  0x16   :  { %247 = vmatpush3.bf16.msra.mxu1 %v91_v49  ;;  %217 = vmatprep.subr.bf16.mxu0 %v84_v52 }
  0x17   :  { %248 = vmatprep.subr.bf16.mxu1 %v265_v2 }
  0x19   :  { %218 = vmatpush3.bf16.msra.mxu0 %v76_v59 }
  0x1a   :  { %249 = vmatpush3.bf16.msra.mxu1 %v92_v60  ;;  %219 = vmatprep.subr.bf16.mxu0 %v85_v62 }
  0x1b   :  { %250 = vmatprep.subr.bf16.mxu1 %v265_v2 }
  0x1d   :  { %220 = vmatpush3.bf16.msra.mxu0 %v77_v5 }
  0x1e   :  { %251 = vmatpush3.bf16.msra.mxu1 %v93_v6  ;;  %221 = vmatprep.subr.bf16.mxu0 %v86_v8 }
  0x1f   :  { %252 = vmatprep.subr.bf16.mxu1 %v265_v2 }
  0x21   :  { %222 = vmatpush3.bf16.msra.mxu0 %v78_v12 }
  0x22   :  { %253 = vmatpush3.bf16.msra.mxu1 %v94_v13 }
  0x24   :  { %139 = vmatmul.mubr.bf16.vlgmr.msra.gmra.mrb[0].mxu0 %v204_v14 }
  0x25   :  { %255 = vmatmul.mubr.bf16.vlgmr.msra.gmra.mrb[0].mxu1 %v264_v15 }
  0x8e   :  { %v196_v16 = vpop.permute.xlu0 %195 }
  0xf7   :  { %v223_v17 = vpop.f32.mrb[0].mxu0 }
  0xf8   :  { %v180_v18 = vpop.f32.mrb[0].mxu1  ;;  %v224_v19 = vpop.f32.mrb[1].mxu0 }
  0xf9   :  { %v256_v20 = vpop.f32.mrb[1].mxu1  ;;  %v225_v21 = vadd.f32 %v224_v19, %v223_v17  ;;  %v226_v22 = vpop.f32.mrb[2].mxu0 }
  0xfa   :  { %v183_v23 = vpop.f32.mrb[2].mxu1  ;;  %v227_v24 = vpop.f32.mrb[3].mxu0 }
  0xfb   :  { %v257_v25 = vpop.f32.mrb[3].mxu1  ;;  %v181_v2 = vadd.f32 %v225_v21, %v180_v18 }
  0xfd   :  { %v198_v26 = vadd.f32 %v196_v16, %v181_v2 }
  0xff   :  { %199 = vst [vmem:[%s456_s3] sm:$0xff] %v198_v26 }

</bundles_post_ra>
